<compile_context>
chip_gen: v7x
topology: tpu7x:2x2x1
jax: 0.10.0
libtpu: 0.0.40
codegen_flags: <defaults>
</compile_context>

<pallas_src>
import numpy as np
import jax
import jax.numpy as jnp
from jax import lax
from jax.experimental import pallas as pl
from jax.experimental.pallas import tpu as pltpu


# ----------------------------- Pallas kernel ------------------------------ #

def _resnet_block_kernel(xp_ref, w1_ref, b1_ref, w2_ref, b2_ref, o_ref, h_ref):
    """Fused conv3x3 -> bias -> ReLU -> conv3x3 -> bias -> residual add.

    xp_ref: (1, H+2, W+2, C)  zero-padded NHWC input tile (one image)
    w1_ref: (3, 3, C, C)      conv1 weight, HWIO
    b1_ref: (1, C)            conv1 bias
    w2_ref: (3, 3, C, C)      conv2 weight, HWIO
    b2_ref: (1, C)            conv2 bias
    o_ref : (1, H, W, C)      output tile (NHWC)
    h_ref : (H+2, W+2, C)     VMEM scratch: zero-haloed intermediate (never in HBM)
    """
    H, W, C = o_ref.shape[1], o_ref.shape[2], o_ref.shape[3]

    # ---- conv1 + bias + ReLU: 9 shifted-window MXU matmuls, f32 accumulate ----
    acc = jnp.zeros((H * W, C), jnp.float32)
    for dy in range(3):
        for dx in range(3):
            xs = xp_ref[0, dy:dy + H, dx:dx + W, :].reshape(H * W, C)
            acc = acc + jnp.dot(xs.astype(jnp.float32), w1_ref[dy, dx],
                                preferred_element_type=jnp.float32)
    h = jnp.maximum(acc + b1_ref[...], 0.0)        # ReLU applied once, in VMEM

    # ---- keep h resident in VMEM; zero halo == conv2's zero padding ----------
    h_ref[...] = jnp.zeros_like(h_ref)
    h_ref[1:H + 1, 1:W + 1, :] = h.reshape(H, W, C)

    # ---- conv2 + bias + residual add (fused epilogue) -------------------------
    acc2 = jnp.zeros((H * W, C), jnp.float32)
    for dy in range(3):
        for dx in range(3):
            hs = h_ref[dy:dy + H, dx:dx + W, :].reshape(H * W, C)
            acc2 = acc2 + jnp.dot(hs, w2_ref[dy, dx],
                                  preferred_element_type=jnp.float32)
    x_center = xp_ref[0, 1:H + 1, 1:W + 1, :].reshape(H * W, C)
    out = acc2 + b2_ref[...] + x_center.astype(jnp.float32)
    o_ref[...] = out.reshape(1, H, W, C).astype(o_ref.dtype)


# ------------------------------ JAX wrapper -------------------------------- #

def resnet_block(x, w1, b1, w2, b2):
    """ResnetBlock forward.  x: (B, C, H, W) NCHW; w*: (C, C, 3, 3) OIHW; b*: (C,)."""
    B, C, H, W = x.shape
    # Layout plumbing in plain JAX (one-off): NCHW -> NHWC + 1-px zero halo,
    # OIHW -> HWIO so the channel contraction / output dim is the lane dim.
    x_nhwc = jnp.transpose(x, (0, 2, 3, 1))
    xp = jnp.pad(x_nhwc, ((0, 0), (1, 1), (1, 1), (0, 0)))
    w1h = jnp.transpose(w1, (2, 3, 1, 0)).astype(jnp.float32)
    w2h = jnp.transpose(w2, (2, 3, 1, 0)).astype(jnp.float32)
    b1r = b1.reshape(1, C).astype(jnp.float32)
    b2r = b2.reshape(1, C).astype(jnp.float32)

    flops = 4 * B * H * W * 9 * C * C              # 2 convs x 2 flops per MAC
    bytes_accessed = 4 * (xp.size + w1h.size + w2h.size + b1r.size + b2r.size
                          + B * H * W * C)

    out_nhwc = pl.pallas_call(
        _resnet_block_kernel,
        out_shape=jax.ShapeDtypeStruct((B, H, W, C), jnp.float32),
        grid=(B,),
        in_specs=[
            pl.BlockSpec((1, H + 2, W + 2, C), lambda b: (b, 0, 0, 0)),
            pl.BlockSpec((3, 3, C, C), lambda b: (0, 0, 0, 0)),   # constant block
            pl.BlockSpec((1, C), lambda b: (0, 0)),
            pl.BlockSpec((3, 3, C, C), lambda b: (0, 0, 0, 0)),   # constant block
            pl.BlockSpec((1, C), lambda b: (0, 0)),
        ],
        out_specs=pl.BlockSpec((1, H, W, C), lambda b: (b, 0, 0, 0)),
        scratch_shapes=[pltpu.VMEM((H + 2, W + 2, C), jnp.float32)],
        compiler_params=pltpu.CompilerParams(
            dimension_semantics=("parallel",),     # batch axis -> both v7x TCs
            vmem_limit_bytes=32 * 1024 * 1024,     # ~4 MiB actually used here
        ),
        cost_estimate=pl.CostEstimate(flops=flops, transcendentals=0,
                                      bytes_accessed=bytes_accessed),
    )(xp, w1h, b1r, w2h, b2r)
    return jnp.transpose(out_nhwc, (0, 3, 1, 2))


# ------------------------------ reference ---------------------------------- #

def reference_forward(x, w1, b1, w2, b2):
    dn = ("NCHW", "OIHW", "NCHW")
    y = lax.conv_general_dilated(x, w1, (1, 1), ((1, 1), (1, 1)),
                                 dimension_numbers=dn,
                                 precision=lax.Precision.HIGHEST)
    y = jnp.maximum(y + b1[None, :, None, None], 0.0)
    y = lax.conv_general_dilated(y, w2, (1, 1), ((1, 1), (1, 1)),
                                 dimension_numbers=dn,
                                 precision=lax.Precision.HIGHEST)
    y = y + b2[None, :, None, None]
    return x + y


# -------------------------------- main -------------------------------------- #

if __name__ == "__main__":
    key = jax.random.PRNGKey(0)
    k_x, k_w1, k_b1, k_w2, k_b2 = jax.random.split(key, 5)

    B, H, W = 2, 16, 16
    dim = 128        # small, but channel-last lane dim = 128 -> lane-dense stores

    x = jax.random.normal(k_x, (B, dim, H, W), dtype=jnp.float32)
    w1 = 0.05 * jax.random.normal(k_w1, (dim, dim, 3, 3), dtype=jnp.float32)
    b1 = 0.10 * jax.random.normal(k_b1, (dim,), dtype=jnp.float32)
    w2 = 0.05 * jax.random.normal(k_w2, (dim, dim, 3, 3), dtype=jnp.float32)
    b2 = 0.10 * jax.random.normal(k_b2, (dim,), dtype=jnp.float32)

    out = jax.block_until_ready(resnet_block(x, w1, b1, w2, b2))
    ref = jax.block_until_ready(reference_forward(x, w1, b1, w2, b2))

    assert out.shape == (B, dim, H, W), out.shape
    np.testing.assert_allclose(np.asarray(out), np.asarray(ref),
                               rtol=1e-3, atol=1e-3)

    print("KERNEL_OK")
</pallas_src>

<mosaic_0001>
module attributes {stable_mosaic.version = 11 : i64} {
  func.func @_resnet_block_kernel(%arg0: i32, %arg1: memref<1x18x18x128xf32, #tpu.memory_space<vmem>>, %arg2: memref<3x3x128x128xf32, #tpu.memory_space<vmem>>, %arg3: memref<1x128xf32, #tpu.memory_space<vmem>>, %arg4: memref<3x3x128x128xf32, #tpu.memory_space<vmem>>, %arg5: memref<1x128xf32, #tpu.memory_space<vmem>>, %arg6: memref<1x16x16x128xf32, #tpu.memory_space<vmem>>, %arg7: memref<18x18x128xf32, #tpu.memory_space<vmem>>) attributes {dimension_semantics = [#tpu.dimension_semantics<parallel>], iteration_bounds = array<i64: 2>, scalar_prefetch = 0 : i64, scratch_operands = 1 : i64, tpu.core_type = #tpu.core_type<tc>, window_params = [{transform_indices = @transform_0, window_bounds = array<i64: 1, 18, 18, 128>}, {pipeline_mode = #tpu.pipeline_mode<synchronous>, transform_indices = @transform_1, window_bounds = array<i64: 3, 3, 128, 128>}, {pipeline_mode = #tpu.pipeline_mode<synchronous>, transform_indices = @transform_2, window_bounds = array<i64: 1, 128>}, {pipeline_mode = #tpu.pipeline_mode<synchronous>, transform_indices = @transform_3, window_bounds = array<i64: 3, 3, 128, 128>}, {pipeline_mode = #tpu.pipeline_mode<synchronous>, transform_indices = @transform_4, window_bounds = array<i64: 1, 128>}, {transform_indices = @transform_5, window_bounds = array<i64: 1, 16, 16, 128>}]} {
    %cst = arith.constant 0.000000e+00 : f32
    %0 = vector.broadcast %cst : f32 to vector<256x128xf32>
    %c0 = arith.constant 0 : index
    %c0_0 = arith.constant 0 : index
    %c0_1 = arith.constant 0 : index
    %c0_2 = arith.constant 0 : index
    %1 = vector.load %arg1[%c0, %c0_0, %c0_1, %c0_2] : memref<1x18x18x128xf32, #tpu.memory_space<vmem>>, vector<1x16x16x128xf32>
    %2 = vector.shape_cast %1 : vector<1x16x16x128xf32> to vector<16x16x128xf32>
    %3 = vector.shape_cast %2 : vector<16x16x128xf32> to vector<256x128xf32>
    %c0_3 = arith.constant 0 : index
    %c0_4 = arith.constant 0 : index
    %c0_5 = arith.constant 0 : index
    %c0_6 = arith.constant 0 : index
    %4 = vector.load %arg2[%c0_3, %c0_4, %c0_5, %c0_6] : memref<3x3x128x128xf32, #tpu.memory_space<vmem>>, vector<1x1x128x128xf32>
    %5 = vector.shape_cast %4 : vector<1x1x128x128xf32> to vector<128x128xf32>
    %cst_7 = arith.constant dense<0.000000e+00> : vector<256x128xf32>
    %6 = tpu.matmul %3, %5, %cst_7 {dimension_numbers = #tpu.dot_dimension_numbers<[1], [0], [0], [1], [0, 0, 1, 1], [], []>} : vector<256x128xf32>, vector<128x128xf32>, vector<256x128xf32> -> vector<256x128xf32>
    %7 = arith.addf %0, %6 : vector<256x128xf32>
    %c0_8 = arith.constant 0 : index
    %c0_9 = arith.constant 0 : index
    %c1 = arith.constant 1 : index
    %c0_10 = arith.constant 0 : index
    %8 = vector.load %arg1[%c0_8, %c0_9, %c1, %c0_10] : memref<1x18x18x128xf32, #tpu.memory_space<vmem>>, vector<1x16x16x128xf32>
    %9 = vector.shape_cast %8 : vector<1x16x16x128xf32> to vector<16x16x128xf32>
    %10 = vector.shape_cast %9 : vector<16x16x128xf32> to vector<256x128xf32>
    %c0_11 = arith.constant 0 : index
    %c1_12 = arith.constant 1 : index
    %c0_13 = arith.constant 0 : index
    %c0_14 = arith.constant 0 : index
    %11 = vector.load %arg2[%c0_11, %c1_12, %c0_13, %c0_14] : memref<3x3x128x128xf32, #tpu.memory_space<vmem>>, vector<1x1x128x128xf32>
    %12 = vector.shape_cast %11 : vector<1x1x128x128xf32> to vector<128x128xf32>
    %cst_15 = arith.constant dense<0.000000e+00> : vector<256x128xf32>
    %13 = tpu.matmul %10, %12, %cst_15 {dimension_numbers = #tpu.dot_dimension_numbers<[1], [0], [0], [1], [0, 0, 1, 1], [], []>} : vector<256x128xf32>, vector<128x128xf32>, vector<256x128xf32> -> vector<256x128xf32>
    %14 = arith.addf %7, %13 : vector<256x128xf32>
    %c0_16 = arith.constant 0 : index
    %c0_17 = arith.constant 0 : index
    %c2 = arith.constant 2 : index
    %c0_18 = arith.constant 0 : index
    %15 = vector.load %arg1[%c0_16, %c0_17, %c2, %c0_18] : memref<1x18x18x128xf32, #tpu.memory_space<vmem>>, vector<1x16x16x128xf32>
    %16 = vector.shape_cast %15 : vector<1x16x16x128xf32> to vector<16x16x128xf32>
    %17 = vector.shape_cast %16 : vector<16x16x128xf32> to vector<256x128xf32>
    %c0_19 = arith.constant 0 : index
    %c2_20 = arith.constant 2 : index
    %c0_21 = arith.constant 0 : index
    %c0_22 = arith.constant 0 : index
    %18 = vector.load %arg2[%c0_19, %c2_20, %c0_21, %c0_22] : memref<3x3x128x128xf32, #tpu.memory_space<vmem>>, vector<1x1x128x128xf32>
    %19 = vector.shape_cast %18 : vector<1x1x128x128xf32> to vector<128x128xf32>
    %cst_23 = arith.constant dense<0.000000e+00> : vector<256x128xf32>
    %20 = tpu.matmul %17, %19, %cst_23 {dimension_numbers = #tpu.dot_dimension_numbers<[1], [0], [0], [1], [0, 0, 1, 1], [], []>} : vector<256x128xf32>, vector<128x128xf32>, vector<256x128xf32> -> vector<256x128xf32>
    %21 = arith.addf %14, %20 : vector<256x128xf32>
    %c0_24 = arith.constant 0 : index
    %c1_25 = arith.constant 1 : index
    %c0_26 = arith.constant 0 : index
    %c0_27 = arith.constant 0 : index
    %22 = vector.load %arg1[%c0_24, %c1_25, %c0_26, %c0_27] : memref<1x18x18x128xf32, #tpu.memory_space<vmem>>, vector<1x16x16x128xf32>
    %23 = vector.shape_cast %22 : vector<1x16x16x128xf32> to vector<16x16x128xf32>
    %24 = vector.shape_cast %23 : vector<16x16x128xf32> to vector<256x128xf32>
    %c1_28 = arith.constant 1 : index
    %c0_29 = arith.constant 0 : index
    %c0_30 = arith.constant 0 : index
    %c0_31 = arith.constant 0 : index
    %25 = vector.load %arg2[%c1_28, %c0_29, %c0_30, %c0_31] : memref<3x3x128x128xf32, #tpu.memory_space<vmem>>, vector<1x1x128x128xf32>
    %26 = vector.shape_cast %25 : vector<1x1x128x128xf32> to vector<128x128xf32>
    %cst_32 = arith.constant dense<0.000000e+00> : vector<256x128xf32>
    %27 = tpu.matmul %24, %26, %cst_32 {dimension_numbers = #tpu.dot_dimension_numbers<[1], [0], [0], [1], [0, 0, 1, 1], [], []>} : vector<256x128xf32>, vector<128x128xf32>, vector<256x128xf32> -> vector<256x128xf32>
    %28 = arith.addf %21, %27 : vector<256x128xf32>
    %c0_33 = arith.constant 0 : index
    %c1_34 = arith.constant 1 : index
    %c1_35 = arith.constant 1 : index
    %c0_36 = arith.constant 0 : index
    %29 = vector.load %arg1[%c0_33, %c1_34, %c1_35, %c0_36] : memref<1x18x18x128xf32, #tpu.memory_space<vmem>>, vector<1x16x16x128xf32>
    %30 = vector.shape_cast %29 : vector<1x16x16x128xf32> to vector<16x16x128xf32>
    %31 = vector.shape_cast %30 : vector<16x16x128xf32> to vector<256x128xf32>
    %c1_37 = arith.constant 1 : index
    %c1_38 = arith.constant 1 : index
    %c0_39 = arith.constant 0 : index
    %c0_40 = arith.constant 0 : index
    %32 = vector.load %arg2[%c1_37, %c1_38, %c0_39, %c0_40] : memref<3x3x128x128xf32, #tpu.memory_space<vmem>>, vector<1x1x128x128xf32>
    %33 = vector.shape_cast %32 : vector<1x1x128x128xf32> to vector<128x128xf32>
    %cst_41 = arith.constant dense<0.000000e+00> : vector<256x128xf32>
    %34 = tpu.matmul %31, %33, %cst_41 {dimension_numbers = #tpu.dot_dimension_numbers<[1], [0], [0], [1], [0, 0, 1, 1], [], []>} : vector<256x128xf32>, vector<128x128xf32>, vector<256x128xf32> -> vector<256x128xf32>
    %35 = arith.addf %28, %34 : vector<256x128xf32>
    %c0_42 = arith.constant 0 : index
    %c1_43 = arith.constant 1 : index
    %c2_44 = arith.constant 2 : index
    %c0_45 = arith.constant 0 : index
    %36 = vector.load %arg1[%c0_42, %c1_43, %c2_44, %c0_45] : memref<1x18x18x128xf32, #tpu.memory_space<vmem>>, vector<1x16x16x128xf32>
    %37 = vector.shape_cast %36 : vector<1x16x16x128xf32> to vector<16x16x128xf32>
    %38 = vector.shape_cast %37 : vector<16x16x128xf32> to vector<256x128xf32>
    %c1_46 = arith.constant 1 : index
    %c2_47 = arith.constant 2 : index
    %c0_48 = arith.constant 0 : index
    %c0_49 = arith.constant 0 : index
    %39 = vector.load %arg2[%c1_46, %c2_47, %c0_48, %c0_49] : memref<3x3x128x128xf32, #tpu.memory_space<vmem>>, vector<1x1x128x128xf32>
    %40 = vector.shape_cast %39 : vector<1x1x128x128xf32> to vector<128x128xf32>
    %cst_50 = arith.constant dense<0.000000e+00> : vector<256x128xf32>
    %41 = tpu.matmul %38, %40, %cst_50 {dimension_numbers = #tpu.dot_dimension_numbers<[1], [0], [0], [1], [0, 0, 1, 1], [], []>} : vector<256x128xf32>, vector<128x128xf32>, vector<256x128xf32> -> vector<256x128xf32>
    %42 = arith.addf %35, %41 : vector<256x128xf32>
    %c0_51 = arith.constant 0 : index
    %c2_52 = arith.constant 2 : index
    %c0_53 = arith.constant 0 : index
    %c0_54 = arith.constant 0 : index
    %43 = vector.load %arg1[%c0_51, %c2_52, %c0_53, %c0_54] : memref<1x18x18x128xf32, #tpu.memory_space<vmem>>, vector<1x16x16x128xf32>
    %44 = vector.shape_cast %43 : vector<1x16x16x128xf32> to vector<16x16x128xf32>
    %45 = vector.shape_cast %44 : vector<16x16x128xf32> to vector<256x128xf32>
    %c2_55 = arith.constant 2 : index
    %c0_56 = arith.constant 0 : index
    %c0_57 = arith.constant 0 : index
    %c0_58 = arith.constant 0 : index
    %46 = vector.load %arg2[%c2_55, %c0_56, %c0_57, %c0_58] : memref<3x3x128x128xf32, #tpu.memory_space<vmem>>, vector<1x1x128x128xf32>
    %47 = vector.shape_cast %46 : vector<1x1x128x128xf32> to vector<128x128xf32>
    %cst_59 = arith.constant dense<0.000000e+00> : vector<256x128xf32>
    %48 = tpu.matmul %45, %47, %cst_59 {dimension_numbers = #tpu.dot_dimension_numbers<[1], [0], [0], [1], [0, 0, 1, 1], [], []>} : vector<256x128xf32>, vector<128x128xf32>, vector<256x128xf32> -> vector<256x128xf32>
    %49 = arith.addf %42, %48 : vector<256x128xf32>
    %c0_60 = arith.constant 0 : index
    %c2_61 = arith.constant 2 : index
    %c1_62 = arith.constant 1 : index
    %c0_63 = arith.constant 0 : index
    %50 = vector.load %arg1[%c0_60, %c2_61, %c1_62, %c0_63] : memref<1x18x18x128xf32, #tpu.memory_space<vmem>>, vector<1x16x16x128xf32>
    %51 = vector.shape_cast %50 : vector<1x16x16x128xf32> to vector<16x16x128xf32>
    %52 = vector.shape_cast %51 : vector<16x16x128xf32> to vector<256x128xf32>
    %c2_64 = arith.constant 2 : index
    %c1_65 = arith.constant 1 : index
    %c0_66 = arith.constant 0 : index
    %c0_67 = arith.constant 0 : index
    %53 = vector.load %arg2[%c2_64, %c1_65, %c0_66, %c0_67] : memref<3x3x128x128xf32, #tpu.memory_space<vmem>>, vector<1x1x128x128xf32>
    %54 = vector.shape_cast %53 : vector<1x1x128x128xf32> to vector<128x128xf32>
    %cst_68 = arith.constant dense<0.000000e+00> : vector<256x128xf32>
    %55 = tpu.matmul %52, %54, %cst_68 {dimension_numbers = #tpu.dot_dimension_numbers<[1], [0], [0], [1], [0, 0, 1, 1], [], []>} : vector<256x128xf32>, vector<128x128xf32>, vector<256x128xf32> -> vector<256x128xf32>
    %56 = arith.addf %49, %55 : vector<256x128xf32>
    %c0_69 = arith.constant 0 : index
    %c2_70 = arith.constant 2 : index
    %c2_71 = arith.constant 2 : index
    %c0_72 = arith.constant 0 : index
    %57 = vector.load %arg1[%c0_69, %c2_70, %c2_71, %c0_72] : memref<1x18x18x128xf32, #tpu.memory_space<vmem>>, vector<1x16x16x128xf32>
    %58 = vector.shape_cast %57 : vector<1x16x16x128xf32> to vector<16x16x128xf32>
    %59 = vector.shape_cast %58 : vector<16x16x128xf32> to vector<256x128xf32>
    %c2_73 = arith.constant 2 : index
    %c2_74 = arith.constant 2 : index
    %c0_75 = arith.constant 0 : index
    %c0_76 = arith.constant 0 : index
    %60 = vector.load %arg2[%c2_73, %c2_74, %c0_75, %c0_76] : memref<3x3x128x128xf32, #tpu.memory_space<vmem>>, vector<1x1x128x128xf32>
    %61 = vector.shape_cast %60 : vector<1x1x128x128xf32> to vector<128x128xf32>
    %cst_77 = arith.constant dense<0.000000e+00> : vector<256x128xf32>
    %62 = tpu.matmul %59, %61, %cst_77 {dimension_numbers = #tpu.dot_dimension_numbers<[1], [0], [0], [1], [0, 0, 1, 1], [], []>} : vector<256x128xf32>, vector<128x128xf32>, vector<256x128xf32> -> vector<256x128xf32>
    %63 = arith.addf %56, %62 : vector<256x128xf32>
    %c0_78 = arith.constant 0 : index
    %c0_79 = arith.constant 0 : index
    %64 = vector.load %arg3[%c0_78, %c0_79] : memref<1x128xf32, #tpu.memory_space<vmem>>, vector<1x128xf32>
    %65 = vector.broadcast %64 : vector<1x128xf32> to vector<256x128xf32>
    %66 = arith.addf %63, %65 : vector<256x128xf32>
    %cst_80 = arith.constant 0.000000e+00 : f32
    %67 = vector.broadcast %cst_80 : f32 to vector<256x128xf32>
    %68 = arith.maximumf %66, %67 : vector<256x128xf32>
    %cst_81 = arith.constant 0.000000e+00 : f32
    %69 = vector.broadcast %cst_81 : f32 to vector<18x18x128xf32>
    %c0_82 = arith.constant 0 : index
    %c0_83 = arith.constant 0 : index
    %c0_84 = arith.constant 0 : index
    %70 = vector.load %arg7[%c0_82, %c0_83, %c0_84] : memref<18x18x128xf32, #tpu.memory_space<vmem>>, vector<18x18x128xf32>
    tpu.vector_store %arg7[%c0_82, %c0_83, %c0_84], %69 {strides = array<i32>} : memref<18x18x128xf32, #tpu.memory_space<vmem>>, vector<18x18x128xf32>,
    %71 = vector.shape_cast %68 : vector<256x128xf32> to vector<16x16x128xf32>
    %c1_85 = arith.constant 1 : index
    %c1_86 = arith.constant 1 : index
    %c0_87 = arith.constant 0 : index
    %72 = vector.load %arg7[%c1_85, %c1_86, %c0_87] : memref<18x18x128xf32, #tpu.memory_space<vmem>>, vector<16x16x128xf32>
    tpu.vector_store %arg7[%c1_85, %c1_86, %c0_87], %71 {strides = array<i32>} : memref<18x18x128xf32, #tpu.memory_space<vmem>>, vector<16x16x128xf32>,
    %cst_88 = arith.constant 0.000000e+00 : f32
    %73 = vector.broadcast %cst_88 : f32 to vector<256x128xf32>
    %c0_89 = arith.constant 0 : index
    %c0_90 = arith.constant 0 : index
    %c0_91 = arith.constant 0 : index
    %74 = vector.load %arg7[%c0_89, %c0_90, %c0_91] : memref<18x18x128xf32, #tpu.memory_space<vmem>>, vector<16x16x128xf32>
    %75 = vector.shape_cast %74 : vector<16x16x128xf32> to vector<256x128xf32>
    %c0_92 = arith.constant 0 : index
    %c0_93 = arith.constant 0 : index
    %c0_94 = arith.constant 0 : index
    %c0_95 = arith.constant 0 : index
    %76 = vector.load %arg4[%c0_92, %c0_93, %c0_94, %c0_95] : memref<3x3x128x128xf32, #tpu.memory_space<vmem>>, vector<1x1x128x128xf32>
    %77 = vector.shape_cast %76 : vector<1x1x128x128xf32> to vector<128x128xf32>
    %cst_96 = arith.constant dense<0.000000e+00> : vector<256x128xf32>
    %78 = tpu.matmul %75, %77, %cst_96 {dimension_numbers = #tpu.dot_dimension_numbers<[1], [0], [0], [1], [0, 0, 1, 1], [], []>} : vector<256x128xf32>, vector<128x128xf32>, vector<256x128xf32> -> vector<256x128xf32>
    %79 = arith.addf %73, %78 : vector<256x128xf32>
    %c0_97 = arith.constant 0 : index
    %c1_98 = arith.constant 1 : index
    %c0_99 = arith.constant 0 : index
    %80 = vector.load %arg7[%c0_97, %c1_98, %c0_99] : memref<18x18x128xf32, #tpu.memory_space<vmem>>, vector<16x16x128xf32>
    %81 = vector.shape_cast %80 : vector<16x16x128xf32> to vector<256x128xf32>
    %c0_100 = arith.constant 0 : index
    %c1_101 = arith.constant 1 : index
    %c0_102 = arith.constant 0 : index
    %c0_103 = arith.constant 0 : index
    %82 = vector.load %arg4[%c0_100, %c1_101, %c0_102, %c0_103] : memref<3x3x128x128xf32, #tpu.memory_space<vmem>>, vector<1x1x128x128xf32>
    %83 = vector.shape_cast %82 : vector<1x1x128x128xf32> to vector<128x128xf32>
    %cst_104 = arith.constant dense<0.000000e+00> : vector<256x128xf32>
    %84 = tpu.matmul %81, %83, %cst_104 {dimension_numbers = #tpu.dot_dimension_numbers<[1], [0], [0], [1], [0, 0, 1, 1], [], []>} : vector<256x128xf32>, vector<128x128xf32>, vector<256x128xf32> -> vector<256x128xf32>
    %85 = arith.addf %79, %84 : vector<256x128xf32>
    %c0_105 = arith.constant 0 : index
    %c2_106 = arith.constant 2 : index
    %c0_107 = arith.constant 0 : index
    %86 = vector.load %arg7[%c0_105, %c2_106, %c0_107] : memref<18x18x128xf32, #tpu.memory_space<vmem>>, vector<16x16x128xf32>
    %87 = vector.shape_cast %86 : vector<16x16x128xf32> to vector<256x128xf32>
    %c0_108 = arith.constant 0 : index
    %c2_109 = arith.constant 2 : index
    %c0_110 = arith.constant 0 : index
    %c0_111 = arith.constant 0 : index
    %88 = vector.load %arg4[%c0_108, %c2_109, %c0_110, %c0_111] : memref<3x3x128x128xf32, #tpu.memory_space<vmem>>, vector<1x1x128x128xf32>
    %89 = vector.shape_cast %88 : vector<1x1x128x128xf32> to vector<128x128xf32>
    %cst_112 = arith.constant dense<0.000000e+00> : vector<256x128xf32>
    %90 = tpu.matmul %87, %89, %cst_112 {dimension_numbers = #tpu.dot_dimension_numbers<[1], [0], [0], [1], [0, 0, 1, 1], [], []>} : vector<256x128xf32>, vector<128x128xf32>, vector<256x128xf32> -> vector<256x128xf32>
    %91 = arith.addf %85, %90 : vector<256x128xf32>
    %c1_113 = arith.constant 1 : index
    %c0_114 = arith.constant 0 : index
    %c0_115 = arith.constant 0 : index
    %92 = vector.load %arg7[%c1_113, %c0_114, %c0_115] : memref<18x18x128xf32, #tpu.memory_space<vmem>>, vector<16x16x128xf32>
    %93 = vector.shape_cast %92 : vector<16x16x128xf32> to vector<256x128xf32>
    %c1_116 = arith.constant 1 : index
    %c0_117 = arith.constant 0 : index
    %c0_118 = arith.constant 0 : index
    %c0_119 = arith.constant 0 : index
    %94 = vector.load %arg4[%c1_116, %c0_117, %c0_118, %c0_119] : memref<3x3x128x128xf32, #tpu.memory_space<vmem>>, vector<1x1x128x128xf32>
    %95 = vector.shape_cast %94 : vector<1x1x128x128xf32> to vector<128x128xf32>
    %cst_120 = arith.constant dense<0.000000e+00> : vector<256x128xf32>
    %96 = tpu.matmul %93, %95, %cst_120 {dimension_numbers = #tpu.dot_dimension_numbers<[1], [0], [0], [1], [0, 0, 1, 1], [], []>} : vector<256x128xf32>, vector<128x128xf32>, vector<256x128xf32> -> vector<256x128xf32>
    %97 = arith.addf %91, %96 : vector<256x128xf32>
    %c1_121 = arith.constant 1 : index
    %c1_122 = arith.constant 1 : index
    %c0_123 = arith.constant 0 : index
    %98 = vector.load %arg7[%c1_121, %c1_122, %c0_123] : memref<18x18x128xf32, #tpu.memory_space<vmem>>, vector<16x16x128xf32>
    %99 = vector.shape_cast %98 : vector<16x16x128xf32> to vector<256x128xf32>
    %c1_124 = arith.constant 1 : index
    %c1_125 = arith.constant 1 : index
    %c0_126 = arith.constant 0 : index
    %c0_127 = arith.constant 0 : index
    %100 = vector.load %arg4[%c1_124, %c1_125, %c0_126, %c0_127] : memref<3x3x128x128xf32, #tpu.memory_space<vmem>>, vector<1x1x128x128xf32>
    %101 = vector.shape_cast %100 : vector<1x1x128x128xf32> to vector<128x128xf32>
    %cst_128 = arith.constant dense<0.000000e+00> : vector<256x128xf32>
    %102 = tpu.matmul %99, %101, %cst_128 {dimension_numbers = #tpu.dot_dimension_numbers<[1], [0], [0], [1], [0, 0, 1, 1], [], []>} : vector<256x128xf32>, vector<128x128xf32>, vector<256x128xf32> -> vector<256x128xf32>
    %103 = arith.addf %97, %102 : vector<256x128xf32>
    %c1_129 = arith.constant 1 : index
    %c2_130 = arith.constant 2 : index
    %c0_131 = arith.constant 0 : index
    %104 = vector.load %arg7[%c1_129, %c2_130, %c0_131] : memref<18x18x128xf32, #tpu.memory_space<vmem>>, vector<16x16x128xf32>
    %105 = vector.shape_cast %104 : vector<16x16x128xf32> to vector<256x128xf32>
    %c1_132 = arith.constant 1 : index
    %c2_133 = arith.constant 2 : index
    %c0_134 = arith.constant 0 : index
    %c0_135 = arith.constant 0 : index
    %106 = vector.load %arg4[%c1_132, %c2_133, %c0_134, %c0_135] : memref<3x3x128x128xf32, #tpu.memory_space<vmem>>, vector<1x1x128x128xf32>
    %107 = vector.shape_cast %106 : vector<1x1x128x128xf32> to vector<128x128xf32>
    %cst_136 = arith.constant dense<0.000000e+00> : vector<256x128xf32>
    %108 = tpu.matmul %105, %107, %cst_136 {dimension_numbers = #tpu.dot_dimension_numbers<[1], [0], [0], [1], [0, 0, 1, 1], [], []>} : vector<256x128xf32>, vector<128x128xf32>, vector<256x128xf32> -> vector<256x128xf32>
    %109 = arith.addf %103, %108 : vector<256x128xf32>
    %c2_137 = arith.constant 2 : index
    %c0_138 = arith.constant 0 : index
    %c0_139 = arith.constant 0 : index
    %110 = vector.load %arg7[%c2_137, %c0_138, %c0_139] : memref<18x18x128xf32, #tpu.memory_space<vmem>>, vector<16x16x128xf32>
    %111 = vector.shape_cast %110 : vector<16x16x128xf32> to vector<256x128xf32>
    %c2_140 = arith.constant 2 : index
    %c0_141 = arith.constant 0 : index
    %c0_142 = arith.constant 0 : index
    %c0_143 = arith.constant 0 : index
    %112 = vector.load %arg4[%c2_140, %c0_141, %c0_142, %c0_143] : memref<3x3x128x128xf32, #tpu.memory_space<vmem>>, vector<1x1x128x128xf32>
    %113 = vector.shape_cast %112 : vector<1x1x128x128xf32> to vector<128x128xf32>
    %cst_144 = arith.constant dense<0.000000e+00> : vector<256x128xf32>
    %114 = tpu.matmul %111, %113, %cst_144 {dimension_numbers = #tpu.dot_dimension_numbers<[1], [0], [0], [1], [0, 0, 1, 1], [], []>} : vector<256x128xf32>, vector<128x128xf32>, vector<256x128xf32> -> vector<256x128xf32>
    %115 = arith.addf %109, %114 : vector<256x128xf32>
    %c2_145 = arith.constant 2 : index
    %c1_146 = arith.constant 1 : index
    %c0_147 = arith.constant 0 : index
    %116 = vector.load %arg7[%c2_145, %c1_146, %c0_147] : memref<18x18x128xf32, #tpu.memory_space<vmem>>, vector<16x16x128xf32>
    %117 = vector.shape_cast %116 : vector<16x16x128xf32> to vector<256x128xf32>
    %c2_148 = arith.constant 2 : index
    %c1_149 = arith.constant 1 : index
    %c0_150 = arith.constant 0 : index
    %c0_151 = arith.constant 0 : index
    %118 = vector.load %arg4[%c2_148, %c1_149, %c0_150, %c0_151] : memref<3x3x128x128xf32, #tpu.memory_space<vmem>>, vector<1x1x128x128xf32>
    %119 = vector.shape_cast %118 : vector<1x1x128x128xf32> to vector<128x128xf32>
    %cst_152 = arith.constant dense<0.000000e+00> : vector<256x128xf32>
    %120 = tpu.matmul %117, %119, %cst_152 {dimension_numbers = #tpu.dot_dimension_numbers<[1], [0], [0], [1], [0, 0, 1, 1], [], []>} : vector<256x128xf32>, vector<128x128xf32>, vector<256x128xf32> -> vector<256x128xf32>
    %121 = arith.addf %115, %120 : vector<256x128xf32>
    %c2_153 = arith.constant 2 : index
    %c2_154 = arith.constant 2 : index
    %c0_155 = arith.constant 0 : index
    %122 = vector.load %arg7[%c2_153, %c2_154, %c0_155] : memref<18x18x128xf32, #tpu.memory_space<vmem>>, vector<16x16x128xf32>
    %123 = vector.shape_cast %122 : vector<16x16x128xf32> to vector<256x128xf32>
    %c2_156 = arith.constant 2 : index
    %c2_157 = arith.constant 2 : index
    %c0_158 = arith.constant 0 : index
    %c0_159 = arith.constant 0 : index
    %124 = vector.load %arg4[%c2_156, %c2_157, %c0_158, %c0_159] : memref<3x3x128x128xf32, #tpu.memory_space<vmem>>, vector<1x1x128x128xf32>
    %125 = vector.shape_cast %124 : vector<1x1x128x128xf32> to vector<128x128xf32>
    %cst_160 = arith.constant dense<0.000000e+00> : vector<256x128xf32>
    %126 = tpu.matmul %123, %125, %cst_160 {dimension_numbers = #tpu.dot_dimension_numbers<[1], [0], [0], [1], [0, 0, 1, 1], [], []>} : vector<256x128xf32>, vector<128x128xf32>, vector<256x128xf32> -> vector<256x128xf32>
    %127 = arith.addf %121, %126 : vector<256x128xf32>
    %c0_161 = arith.constant 0 : index
    %c1_162 = arith.constant 1 : index
    %c1_163 = arith.constant 1 : index
    %c0_164 = arith.constant 0 : index
    %128 = vector.load %arg1[%c0_161, %c1_162, %c1_163, %c0_164] : memref<1x18x18x128xf32, #tpu.memory_space<vmem>>, vector<1x16x16x128xf32>
    %129 = vector.shape_cast %128 : vector<1x16x16x128xf32> to vector<16x16x128xf32>
    %130 = vector.shape_cast %129 : vector<16x16x128xf32> to vector<256x128xf32>
    %c0_165 = arith.constant 0 : index
    %c0_166 = arith.constant 0 : index
    %131 = vector.load %arg5[%c0_165, %c0_166] : memref<1x128xf32, #tpu.memory_space<vmem>>, vector<1x128xf32>
    %132 = vector.broadcast %131 : vector<1x128xf32> to vector<256x128xf32>
    %133 = arith.addf %127, %132 : vector<256x128xf32>
    %134 = arith.addf %133, %130 : vector<256x128xf32>
    %135 = vector.shape_cast %134 : vector<256x128xf32> to vector<1x16x16x128xf32>
    %c0_167 = arith.constant 0 : index
    %c0_168 = arith.constant 0 : index
    %c0_169 = arith.constant 0 : index
    %c0_170 = arith.constant 0 : index
    %136 = vector.load %arg6[%c0_167, %c0_168, %c0_169, %c0_170] : memref<1x16x16x128xf32, #tpu.memory_space<vmem>>, vector<1x16x16x128xf32>
    tpu.vector_store %arg6[%c0_167, %c0_168, %c0_169, %c0_170], %135 {strides = array<i32>} : memref<1x16x16x128xf32, #tpu.memory_space<vmem>>, vector<1x16x16x128xf32>,
    return
  }
  func.func @transform_0(%arg0: i32) -> (i32, i32, i32, i32) {
    %c0_i32 = arith.constant 0 : i32
    %c0_i32_0 = arith.constant 0 : i32
    %c0_i32_1 = arith.constant 0 : i32
    %c0_i32_2 = arith.constant 0 : i32
    return %arg0, %c0_i32, %c0_i32_0, %c0_i32_1 : i32, i32, i32, i32
  }
  func.func @transform_1(%arg0: i32) -> (i32, i32, i32, i32) {
    %c0_i32 = arith.constant 0 : i32
    %c0_i32_0 = arith.constant 0 : i32
    %c0_i32_1 = arith.constant 0 : i32
    %c0_i32_2 = arith.constant 0 : i32
    %c0_i32_3 = arith.constant 0 : i32
    return %c0_i32, %c0_i32_0, %c0_i32_1, %c0_i32_2 : i32, i32, i32, i32
  }
  func.func @transform_2(%arg0: i32) -> (i32, i32) {
    %c0_i32 = arith.constant 0 : i32
    %c0_i32_0 = arith.constant 0 : i32
    %c0_i32_1 = arith.constant 0 : i32
    return %c0_i32, %c0_i32_0 : i32, i32
  }
  func.func @transform_3(%arg0: i32) -> (i32, i32, i32, i32) {
    %c0_i32 = arith.constant 0 : i32
    %c0_i32_0 = arith.constant 0 : i32
    %c0_i32_1 = arith.constant 0 : i32
    %c0_i32_2 = arith.constant 0 : i32
    %c0_i32_3 = arith.constant 0 : i32
    return %c0_i32, %c0_i32_0, %c0_i32_1, %c0_i32_2 : i32, i32, i32, i32
  }
  func.func @transform_4(%arg0: i32) -> (i32, i32) {
    %c0_i32 = arith.constant 0 : i32
    %c0_i32_0 = arith.constant 0 : i32
    %c0_i32_1 = arith.constant 0 : i32
    return %c0_i32, %c0_i32_0 : i32, i32
  }
  func.func @transform_5(%arg0: i32) -> (i32, i32, i32, i32) {
    %c0_i32 = arith.constant 0 : i32
    %c0_i32_0 = arith.constant 0 : i32
    %c0_i32_1 = arith.constant 0 : i32
    %c0_i32_2 = arith.constant 0 : i32
    return %arg0, %c0_i32, %c0_i32_0, %c0_i32_1 : i32, i32, i32, i32
  }
}

</mosaic_0001>

<bundles_post_ra>
// kernel: tpu_custom_call.1
= control target key start
LH: loop header
LB: loop body
LE: loop exit
PB: predicated region body
PF: predicated region fallthrough
CT: control target
= control target key end

     0   :  { %10 = vsyncpa [#allocation4], 0  ;;  %s11732_s0 = inlined_call_operand.vmem [shape: f32[2,18,18,128], index: 0, kind: input, shape index: {}]   ;;  %s11733_s1 = inlined_call_operand.vmem [shape: f32[3,3,128,128], index: 1, kind: input, shape index: {}]   ;;  %s11734_s2 = inlined_call_operand.vmem [shape: f32[1,128], index: 2, kind: input, shape index: {}]   ;;  %s11735_s3 = inlined_call_operand.hbm [shape: f32[3,3,128,128], index: 3, kind: input, shape index: {}]   ;;  %s11736_s4 = inlined_call_operand.vmem [shape: f32[1,128], index: 4, kind: input, shape index: {}]   ;;  %s11737_s5 = inlined_call_operand.hbm [shape: f32[2,16,16,128], index: 5, kind: output, shape index: {}]  }
   0x1   :  { %11 = vsyncpa [#allocation5], 0 }
   0x2   :  { %13 = vsyncpa [#allocation5 + $0x1], 0  ;;  %s9950_s18 = smov 0   ;;  %s9952_s19 = smov 0  }
   0x3   :  { %s9954_s20 = smov 0   ;;  %s9956_s21 = smov 0  }
   0x4 LB: > { %s9971_s22 = sadd.s32 4294967295, %s9911_s21   ;;  %s6000_s23 = sadd.s32 4294967294, %s9911_s21   ;;  %s9911_s21 = sphi %s9956_s21, %s11964_s21   ;;  %s9907_s20 = sphi %s9954_s20, %s11963_s20   ;;  %s9903_s19 = sphi %s9952_s19, %s11962_s19   ;;  %s9899_s18 = sphi %s9950_s18, %s11961_s18  }
   0x5   : > { %s9975_s24 = sadd.s32 1, %s9911_s21   ;;  %s136_s25 = sadd.s32 1, %s9907_s20 }
   0x6   : > { %s133_s26 = ssub.s32 %s9911_s21, %s9975_s24  ;;  %p146_p0 = scmp.ne.s32.totalorder %s9907_s20, %s9903_s19 }
   0x7   : > { %p134_p1 = scmp.eq.s32.totalorder %s133_s26, 0  ;;  %p147_p2 = scmp.eq.s32.totalorder %s9971_s22, 1 }
   0x8   : > { %p152_p3 = scmp.ne.s32.totalorder %s9903_s19, %s9899_s18  ;;  %p153_p4 = scmp.eq.s32.totalorder %s6000_s23, 1 }
   0x9   : > { %s9986_s27 = scalar_select %p134_p1, %s9907_s20, %s136_s25  }
   0xa   : > { %p9988_p5 = por %p147_p2, %p146_p0  ;;  %p9992_p6 = por %p153_p4, %p152_p3 }
   0xb   : > { %p6001_p7 = scmp.ge.s32.totalorder %s9911_s21, 1  ;;  %p160_p8 = scmp.lt.s32.totalorder %s9911_s21, 3 }
   0xc   : > { %s11812_s28 = scalar_select %p9988_p5, 1, 0 }
   0xd   : > { %s11813_s29 = scalar_select %p9992_p6, 1, 0 }
   0xe   : > { %p11738_p9 = scmp.eq.s32.totalorder %s9971_s22, 0  ;;  %p9999_p10 = pnand %p6001_p7, %p160_p8 }
   0xf   : > { %s9913_s6 = smov [#allocation3]   ;;  %s9817_s11 = scalar_lea.hbm %s11735_s3, 18432 }
  0x10   : > { %s11814_s30 = scalar_select %p9999_p10, 1, 0 }
  0x11   : > { %s178_s7 = sshll.u32 %s9913_s6, 4  ;;  %p9767_p11 = pneg %p9999_p10  ;;  %s179_s7 = int_to_ptr.vmem [resolvable:$true] %s178_s7 }
  0x12   : > { %p9818_p13 = scmp.ne.s32.totalorder %s11735_s3, %s9817_s11  ;;  %p9824_p3 = scmp.lt.u32.totalorder %s9817_s11, %s11735_s3 }
  0x13   : > { %p10007_p12 = pnand %p11738_p9, %p9767_p11 }
  0x15   : > { %p9819_p0 = pneg %p10007_p12 }
  0x17   : > { %p9820_p1 = pnand %p9819_p0, %p9818_p13 }
  0x19   : > { %p9821_p2 = pneg %p9820_p1 }
  0x1b   : > { %p9826_p4 = pnand %p9824_p3, %p9821_p2 }
  0x1d   : > { %9829 = shalt.err (!%p9826_p4)
}
  0x1e   : > { %s9830_s16 = scalar_lea.vmem %s179_s7, 18432  ;;  %p9838_p9 = scmp.lt.s32.totalorder %s179_s7, %s179_s7 }
  0x1f   : > { %p9831_p7 = scmp.ne.s32.totalorder %s179_s7, %s9830_s16  ;;  %p9839_p6 = scmp.lt.s32.totalorder %s9830_s16, %s9830_s16 }
  0x21   : > { %p9833_p8 = pnand %p9831_p7, %p9819_p0  ;;  %p9840_p5 = por %p9839_p6, %p9838_p9 }
  0x23   : > { %p9834_p11 = pneg %p9833_p8 }
  0x25   : > { %p9841_p10 = pnand %p9840_p5, %p9834_p11 }
  0x27   : > { %9844 = shalt.err (!%p9841_p10)
}
  0x28   : > { %s9914_s17 = smov 128   ;;  %s9915_s23 = smov 8  }
  0x29   : > { %9770 = dma.hbm_to_vmem [thread:$0]  (!%p10007_p12), %s11735_s3, 18432, %s179_s7, [#allocation4], %s9914_s17, %s9914_s17, %s9915_s23  }
  0x2a   : > { %p11816_p13 = scmp.ne.s32.totalorder %s11814_s30, 0 }
  0x2c   : > { %205 = sbr.rel (%p11816_p13) target bundleno = 1619 (0x653), region = 40 }
  0x33   : > { %p11817_p1 = scmp.eq.s32.totalorder %s9971_s22, 0 }
  0x35   : > { %9890 = dma.done.wait (%p11817_p1), [#allocation4], 18432   ;;  %p11818_p0 = pmov %p11817_p1 }
  0x36   : > { %p233_p5 = scmp.lt.s32.totalorder %s9971_s22, 1  ;;  %v6008_v0 = vld [vmem:[%s11733_s1 + $0x80] sm:$0xff]  ;;  %v6009_v1 = vld [vmem:[%s11733_s1 + $0x88] sm:$0xff]  ;;  %v6010_v2 = vld [vmem:[%s11733_s1 + $0x90] sm:$0xff]  ;;  %s230_s14 = sand.u32 1, %s9903_s19  }
  0x37   : > { %9892 = vsyncadd (%p11818_p0), [#allocation4], 4294948864  ;;  %v8672_v3 = vpack.c.bf16 %v6009_v1, %v6008_v0  ;;  %v6011_v4 = vld [vmem:[%s11733_s1 + $0x98] sm:$0xff]  ;;  %v6012_v6 = vld [vmem:[%s11733_s1 + $0xa0] sm:$0xff]  ;;  %s6006_s17 = sshll.u32 %s230_s14, 8  ;;  %s6367_s25 = sshll.u32 %s9971_s22, 12 }
  0x38   : > { %s234_s6 = scalar_select %p233_p5, %s9971_s22, 1  ;;  %v8676_v5 = vpack.c.bf16 %v6011_v4, %v6010_v2  ;;  %v6013_v7 = vld [vmem:[%s11733_s1 + $0xa8] sm:$0xff]  ;;  %v6014_v10 = vld [vmem:[%s11733_s1 + $0xb0] sm:$0xff]  ;;  %v6015_v11 = vld [vmem:[%s11733_s1 + $0xb8] sm:$0xff] }
  0x39   : > { %8673 = vmatprep.subr.bf16.mxu0 %v8672_v3  ;;  %v8680_v8 = vpack.c.bf16 %v6013_v7, %v6012_v6  ;;  %v8684_v12 = vpack.c.bf16 %v6015_v11, %v6014_v10  ;;  %v6016_v13 = vld [vmem:[%s11733_s1 + $0xc0] sm:$0xff]  ;;  %v6017_v14 = vld [vmem:[%s11733_s1 + $0xc8] sm:$0xff]  ;;  %v6018_v16 = vld [vmem:[%s11733_s1 + $0xd0] sm:$0xff]  ;;  %s11587_s23 = scalar_lea.vmem [#allocation6], %s6006_s17  ;;  %s11683_s11 = scalar_lea.hbm %s11737_s5, %s6367_s25 }
  0x3a   : > { %s9760_s9 = smul.u32 432, %s234_s6  ;;  %8675 = vmatpush3.bf16.msra.mxu0 %v8672_v3  ;;  %v8688_v15 = vpack.c.bf16 %v6017_v14, %v6016_v13  ;;  %v6019_v17 = vld [vmem:[%s11733_s1 + $0xd8] sm:$0xff]  ;;  %v6020_v19 = vld [vmem:[%s11733_s1 + $0xe0] sm:$0xff]  ;;  %v6021_v20 = vld [vmem:[%s11733_s1 + $0xe8] sm:$0xff]  ;;  %s5926_s26 = sshll.u32 %s11587_s23, 4  ;;  %s11685_s26 = int_to_ptr.vmem [resolvable:$true] %s5926_s26 }
  0x3b   : > { %8677 = vmatprep.subr.bf16.mxu0 %v8676_v5  ;;  %v8692_v18 = vpack.c.bf16 %v6019_v17, %v6018_v16  ;;  %v8696_v21 = vpack.c.bf16 %v6021_v20, %v6020_v19  ;;  %v6022_v22 = vld [vmem:[%s11733_s1 + $0xf0] sm:$0xff]  ;;  %v6023_v23 = vld [vmem:[%s11733_s1 + $0xf8] sm:$0xff]  ;;  %v270_v25 = vld [vmem:[%s11733_s1] sm:$0xff]  ;;  %s11691_s22 = scalar_lea.sflag [#allocation5], %s230_s14  ;;  %p11959_p9 = scmp.ne.s32.totalorder %s11812_s28, 0 }
  0x3c   : > { %s10056_s6 = scalar_lea.vmem %s11732_s0, %s9760_s9  ;;  %v8700_v24 = vpack.c.bf16 %v6023_v23, %v6022_v22  ;;  %v271_v26 = vld [vmem:[%s11733_s1 + $0x8] sm:$0xff]  ;;  %v272_v28 = vld [vmem:[%s11733_s1 + $0x10] sm:$0xff]  ;;  %v273_v29 = vld [vmem:[%s11733_s1 + $0x18] sm:$0xff]  ;;  %s9917_s7 = smov [#allocation6]  }
  0x3d   : > { %v286_v9 = vld [vmem:[%s10056_s6 + $0x1] sm:$0xff]  ;;  %v8704_v27 = vpack.c.bf16 %v271_v26, %v270_v25  ;;  %v287_v30 = vld [vmem:[%s10056_s6 + $0x9] sm:$0xff]  ;;  %v10103_v31 = vld [vmem:[%s10056_s6 + $0x19] sm:$0xff]  ;;  %v8708_v32 = vpack.c.bf16 %v273_v29, %v272_v28  ;;  %s9849_s9 = sshll.u32 %s9917_s7, 4  ;;  %s9850_s9 = int_to_ptr.vmem [resolvable:$false] %s9849_s9 }
  0x3e   : > { %7264 = vmatprep.mubr.f32.mxu0 %v286_v9  ;;  %8679 = vmatpush3.bf16.msra.mxu0 %v8676_v5  ;;  %v274_v33 = vld [vmem:[%s11733_s1 + $0x20] sm:$0xff]  ;;  %v275_v34 = vld [vmem:[%s11733_s1 + $0x28] sm:$0xff]  ;;  %v10116_v36 = vld [vmem:[%s10056_s6 + $0x31] sm:$0xff]  ;;  %s9851_s30 = scalar_lea.vmem %s9850_s9, 8192  ;;  %p9852_p2 = scmp.lt.s32.totalorder %s11685_s26, %s9850_s9 }
  0x3f   : > { %8681 = vmatprep.subr.bf16.mxu0 %v8680_v8  ;;  %v10113_v35 = vld [vmem:[%s10056_s6 + $0x21] sm:$0xff]  ;;  %v8712_v37 = vpack.c.bf16 %v275_v34, %v274_v33  ;;  %v276_v38 = vld [vmem:[%s11733_s1 + $0x30] sm:$0xff]  ;;  %v277_v39 = vld [vmem:[%s11733_s1 + $0x38] sm:$0xff] }
  0x40   : > { %v10127_v40 = vld [vmem:[%s10056_s6 + $0x39] sm:$0xff]  ;;  %v10130_v41 = vld [vmem:[%s10056_s6 + $0x49] sm:$0xff]  ;;  %v8716_v42 = vpack.c.bf16 %v277_v39, %v276_v38  ;;  %v10141_v45 = vld [vmem:[%s10056_s6 + $0x51] sm:$0xff] }
  0x41   : > { %v278_v43 = vld [vmem:[%s11733_s1 + $0x40] sm:$0xff]  ;;  %v279_v44 = vld [vmem:[%s11733_s1 + $0x48] sm:$0xff]  ;;  %v280_v48 = vld [vmem:[%s11733_s1 + $0x50] sm:$0xff] }
  0x42   : > { %8683 = vmatpush3.bf16.msra.mxu0 %v8680_v8  ;;  %v10144_v46 = vld [vmem:[%s10056_s6 + $0x61] sm:$0xff]  ;;  %v8720_v47 = vpack.c.bf16 %v279_v44, %v278_v43  ;;  %v281_v49 = vld [vmem:[%s11733_s1 + $0x58] sm:$0xff]  ;;  %v10155_v50 = vld [vmem:[%s10056_s6 + $0x69] sm:$0xff] }
  0x43   : > { %8685 = vmatprep.subr.bf16.mxu0 %v8684_v12  ;;  %v10158_v51 = vld [vmem:[%s10056_s6 + $0x79] sm:$0xff]  ;;  %v8724_v52 = vpack.c.bf16 %v281_v49, %v280_v48  ;;  %v283_v54 = vld [vmem:[%s11733_s1 + $0x68] sm:$0xff]  ;;  %v10172_v56 = vld [vmem:[%s10056_s6 + $0x91] sm:$0xff] }
  0x44   : > { %v282_v53 = vld [vmem:[%s11733_s1 + $0x60] sm:$0xff]  ;;  %v284_v58 = vld [vmem:[%s11733_s1 + $0x70] sm:$0xff]  ;;  %v285_v59 = vld [vmem:[%s11733_s1 + $0x78] sm:$0xff] }
  0x45   : > { %v10169_v55 = vld [vmem:[%s10056_s6 + $0x81] sm:$0xff]  ;;  %v8728_v57 = vpack.c.bf16 %v283_v54, %v282_v53  ;;  %v10183_v60 = vld [vmem:[%s10056_s6 + $0x99] sm:$0xff]  ;;  %v10186_v61 = vld [vmem:[%s10056_s6 + $0xa9] sm:$0xff]  ;;  %v8732_v62 = vpack.c.bf16 %v285_v59, %v284_v58 }
  0x46   : > { %8687 = vmatpush3.bf16.msra.mxu0 %v8684_v12  ;;  %v6024_v63 = vld [vmem:[%s11733_s1 + $0x100] sm:$0xff]  ;;  %v6025_v0 = vld [vmem:[%s11733_s1 + $0x108] sm:$0xff]  ;;  %v10197_v1 = vld [vmem:[%s10056_s6 + $0xb1] sm:$0xff] }
  0x47   : > { %8689 = vmatprep.subr.bf16.mxu0 %v8688_v15  ;;  %v10200_v2 = vld [vmem:[%s10056_s6 + $0xc1] sm:$0xff]  ;;  %v8736_v3 = vpack.c.bf16 %v6025_v0, %v6024_v63  ;;  %v10205_v4 = vld [vmem:[%s10056_s6 + $0xc9] sm:$0xff]  ;;  %v10208_v5 = vld [vmem:[%s10056_s6 + $0xd9] sm:$0xff] }
  0x48   : > { %v10213_v6 = vld [vmem:[%s10056_s6 + $0xe1] sm:$0xff]  ;;  %v10216_v7 = vld [vmem:[%s10056_s6 + $0xf1] sm:$0xff]  ;;  %v10221_v8 = vld [vmem:[%s10056_s6 + $0xf9] sm:$0xff] }
  0x49   : > { %v10224_v9 = vld [vmem:[%s10056_s6 + $0x109] sm:$0xff]  ;;  %v10229_v10 = vld [vmem:[%s10056_s6 + $0x111] sm:$0xff]  ;;  %v10232_v11 = vld [vmem:[%s10056_s6 + $0x121] sm:$0xff] }
  0x4a   : > { %8691 = vmatpush3.bf16.msra.mxu0 %v8688_v15  ;;  %v10237_v12 = vld [vmem:[%s10056_s6 + $0x129] sm:$0xff]  ;;  %v10240_v13 = vld [vmem:[%s10056_s6 + $0x139] sm:$0xff]  ;;  %v10245_v14 = vld [vmem:[%s10056_s6 + $0x141] sm:$0xff] }
  0x4b   : > { %8693 = vmatprep.subr.bf16.mxu0 %v8692_v18  ;;  %11819 = vst [vmem:[#allocation9_spill] sm:$0xff] %v10237_v12  ;;  %11820 = vst [vmem:[#allocation10_spill] sm:$0xff] %v10240_v13  ;;  %v10248_v15 = vld [vmem:[%s10056_s6 + $0x151] sm:$0xff]  ;;  %v10253_v16 = vld [vmem:[%s10056_s6 + $0x159] sm:$0xff] }
  0x4c   : > { %11821 = vst [vmem:[#allocation11_spill] sm:$0xff] %v10245_v14  ;;  %11822 = vst [vmem:[#allocation12_spill] sm:$0xff] %v10248_v15  ;;  %v10256_v17 = vld [vmem:[%s10056_s6 + $0x169] sm:$0xff]  ;;  %v238_v19 = vld [vmem:[%s10056_s6] sm:$0xff] }
  0x4d   : > { %11823 = vst [vmem:[#allocation13_spill] sm:$0xff] %v10253_v16  ;;  %11824 = vst [vmem:[#allocation14_spill] sm:$0xff] %v10256_v17  ;;  %v6026_v20 = vld [vmem:[%s11733_s1 + $0x110] sm:$0xff]  ;;  %v239_v22 = vld [vmem:[%s10056_s6 + $0x8] sm:$0xff] }
  0x4e   : > { %8695 = vmatpush3.bf16.msra.mxu0 %v8692_v18  ;;  %v10261_v18 = vld [vmem:[%s10056_s6 + $0x171] sm:$0xff]  ;;  %v6028_v25 = vld [vmem:[%s11733_s1 + $0x120] sm:$0xff]  ;;  %v6029_v26 = vld [vmem:[%s11733_s1 + $0x128] sm:$0xff] }
  0x4f   : > { %8697 = vmatprep.subr.bf16.mxu0 %v8696_v21  ;;  %11825 = vst [vmem:[#allocation15_spill] sm:$0xff] %v10261_v18  ;;  %v10273_v23 = vld [vmem:[%s10056_s6 + $0x18] sm:$0xff]  ;;  %v10286_v28 = vld [vmem:[%s10056_s6 + $0x30] sm:$0xff]  ;;  %v8744_v29 = vpack.c.bf16 %v6029_v26, %v6028_v25  ;;  %v10300_v34 = vld [vmem:[%s10056_s6 + $0x48] sm:$0xff] }
  0x50   : > { %v10297_v33 = vld [vmem:[%s10056_s6 + $0x38] sm:$0xff]  ;;  %v6032_v38 = vld [vmem:[%s11733_s1 + $0x140] sm:$0xff]  ;;  %v6033_v39 = vld [vmem:[%s11733_s1 + $0x148] sm:$0xff] }
  0x51   : > { %v10314_v43 = vld [vmem:[%s10056_s6 + $0x60] sm:$0xff]  ;;  %v8752_v44 = vpack.c.bf16 %v6033_v39, %v6032_v38  ;;  %v6035_v48 = vld [vmem:[%s11733_s1 + $0x158] sm:$0xff]  ;;  %v10325_v49 = vld [vmem:[%s10056_s6 + $0x68] sm:$0xff] }
  0x52   : > { %8699 = vmatpush3.bf16.msra.mxu0 %v8696_v21  ;;  %v6027_v21 = vld [vmem:[%s11733_s1 + $0x118] sm:$0xff]  ;;  %v6036_v54 = vld [vmem:[%s11733_s1 + $0x160] sm:$0xff]  ;;  %v10342_v59 = vld [vmem:[%s10056_s6 + $0x90] sm:$0xff] }
  0x53   : > { %8701 = vmatprep.subr.bf16.mxu0 %v8700_v24  ;;  %v10339_v58 = vld [vmem:[%s10056_s6 + $0x80] sm:$0xff]  ;;  %v6038_v63 = vld [vmem:[%s11733_s1 + $0x170] sm:$0xff]  ;;  %v6039_v0 = vld [vmem:[%s11733_s1 + $0x178] sm:$0xff] }
  0x54   : > { %v10370_v25 = vld [vmem:[%s10056_s6 + $0xc0] sm:$0xff]  ;;  %v10391_v38 = vld [vmem:[%s10056_s6 + $0xf8] sm:$0xff]  ;;  %v10394_v39 = vld [vmem:[%s10056_s6 + $0x108] sm:$0xff] }
  0x56   : > { %8703 = vmatpush3.bf16.msra.mxu0 %v8700_v24  ;;  %v8740_v24 = vpack.c.bf16 %v6027_v21, %v6026_v20  ;;  %v8764_v20 = vpack.c.bf16 %v6039_v0, %v6038_v63  ;;  %v6072_v21 = vld [vmem:[%s11733_s1 + $0x180] sm:$0xff]  ;;  %v10426_v63 = vld [vmem:[%s10056_s6 + $0x168] sm:$0xff]  ;;  %v10431_v0 = vld [vmem:[%s10056_s6 + $0x170] sm:$0xff] }
  0x57   : > { %8705 = vmatprep.subr.bf16.mxu0 %v8704_v27 }
  0x59   : > { %7265 = vmatmul.mubr.f32.vlgmr.msra.gmra.mrb[0].mxu0 %v287_v30  ;;  %v6030_v30 = vld [vmem:[%s11733_s1 + $0x130] sm:$0xff] }
  0x5a   : > { %8707 = vmatpush3.bf16.msra.mxu0 %v8704_v27  ;;  %7267 = vmatprep.mubr.f32.mxu0 %v10103_v31  ;;  %v10283_v27 = vld [vmem:[%s10056_s6 + $0x20] sm:$0xff] }
  0x5b   : > { %8709 = vmatprep.subr.bf16.mxu0 %v8708_v32 }
  0x5d   : > { %7268 = vmatmul.mubr.f32.gmra.mrb[2].mxu0 %v10113_v35 }
  0x5e   : > { %7270 = vmatprep.mubr.f32.mxu0 %v10116_v36  ;;  %8711 = vmatpush3.bf16.msra.mxu0 %v8708_v32  ;;  %v6031_v32 = vld [vmem:[%s11733_s1 + $0x138] sm:$0xff] }
  0x5f   : > { %8713 = vmatprep.subr.bf16.mxu0 %v8712_v37 }
  0x61   : > { %7271 = vmatmul.mubr.f32.gmra.mrb[4].mxu0 %v10127_v40 }
  0x62   : > { %7273 = vmatprep.mubr.f32.mxu0 %v10130_v41  ;;  %8715 = vmatpush3.bf16.msra.mxu0 %v8712_v37  ;;  %v8748_v37 = vpack.c.bf16 %v6031_v32, %v6030_v30  ;;  %v10378_v30 = vld [vmem:[%s10056_s6 + $0xd8] sm:$0xff]  ;;  %v10383_v32 = vld [vmem:[%s10056_s6 + $0xe0] sm:$0xff] }
  0x63   : > { %8717 = vmatprep.subr.bf16.mxu0 %v8716_v42 }
  0x65   : > { %7274 = vmatmul.mubr.f32.gmra.mrb[6].mxu0 %v10141_v45 }
  0x66   : > { %7276 = vmatprep.mubr.f32.mxu0 %v10144_v46  ;;  %8719 = vmatpush3.bf16.msra.mxu0 %v8716_v42  ;;  %v10311_v42 = vld [vmem:[%s10056_s6 + $0x50] sm:$0xff] }
  0x67   : > { %8721 = vmatprep.subr.bf16.mxu0 %v8720_v47 }
  0x69   : > { %7277 = vmatmul.mubr.f32.gmra.mrb[8].mxu0 %v10155_v50 }
  0x6a   : > { %7279 = vmatprep.mubr.f32.mxu0 %v10158_v51  ;;  %8723 = vmatpush3.bf16.msra.mxu0 %v8720_v47  ;;  %v6034_v47 = vld [vmem:[%s11733_s1 + $0x150] sm:$0xff] }
  0x6b   : > { %8725 = vmatprep.subr.bf16.mxu0 %v8724_v52  ;;  %v8756_v53 = vpack.c.bf16 %v6035_v48, %v6034_v47  ;;  %v10402_v47 = vld [vmem:[%s10056_s6 + $0x120] sm:$0xff]  ;;  %v10407_v48 = vld [vmem:[%s10056_s6 + $0x128] sm:$0xff] }
  0x6d   : > { %7280 = vmatmul.mubr.f32.gmra.mrb[10].mxu0 %v10169_v55 }
  0x6e   : > { %7282 = vmatprep.mubr.f32.mxu0 %v10172_v56  ;;  %8727 = vmatpush3.bf16.msra.mxu0 %v8724_v52  ;;  %v10328_v52 = vld [vmem:[%s10056_s6 + $0x78] sm:$0xff] }
  0x6f   : > { %8729 = vmatprep.subr.bf16.mxu0 %v8728_v57 }
  0x71   : > { %7283 = vmatmul.mubr.f32.gmra.mrb[12].mxu0 %v10183_v60 }
  0x72   : > { %7285 = vmatprep.mubr.f32.mxu0 %v10186_v61  ;;  %8731 = vmatpush3.bf16.msra.mxu0 %v8728_v57  ;;  %v6037_v57 = vld [vmem:[%s11733_s1 + $0x168] sm:$0xff] }
  0x73   : > { %8733 = vmatprep.subr.bf16.mxu0 %v8732_v62 }
  0x75   : > { %7286 = vmatmul.mubr.f32.gmra.mrb[14].mxu0 %v10197_v1 }
  0x76   : > { %7288 = vmatprep.mubr.f32.mxu0 %v10200_v2  ;;  %8735 = vmatpush3.bf16.msra.mxu0 %v8732_v62  ;;  %v8760_v62 = vpack.c.bf16 %v6037_v57, %v6036_v54  ;;  %v10415_v54 = vld [vmem:[%s10056_s6 + $0x140] sm:$0xff]  ;;  %v10418_v57 = vld [vmem:[%s10056_s6 + $0x150] sm:$0xff] }
  0x77   : > { %8737 = vmatprep.subr.bf16.mxu0 %v8736_v3 }
  0x79   : > { %7289 = vmatmul.mubr.f32.gmra.mrb[16].mxu0 %v10205_v4 }
  0x7a   : > { %7291 = vmatprep.mubr.f32.mxu0 %v10208_v5 }
  0x7d   : > { %7292 = vmatmul.mubr.f32.gmra.mrb[18].mxu0 %v10213_v6 }
  0x7e   : > { %7294 = vmatprep.mubr.f32.mxu0 %v10216_v7 }
  0x81   : > { %7295 = vmatmul.mubr.f32.gmra.mrb[20].mxu0 %v10221_v8 }
  0x82   : > { %7297 = vmatprep.mubr.f32.mxu0 %v10224_v9 }
  0x85   : > { %7298 = vmatmul.mubr.f32.gmra.mrb[22].mxu0 %v10229_v10 }
  0x86   : > { %7300 = vmatprep.mubr.f32.mxu0 %v10232_v11 }
  0x89   : > { %7301 = vmatmul.mubr.f32.gmra.mrb[24].mxu0 %v10237_v12  ;;  %v6079_v12 = vld [vmem:[%s11733_s1 + $0x1b8] sm:$0xff] }
  0x8a   : > { %7303 = vmatprep.mubr.f32.mxu0 %v10240_v13  ;;  %v10453_v13 = vld [vmem:[%s10056_s6 + $0x22] sm:$0xff] }
  0x8b   : > { %11827 = vst [vmem:[#allocation17_spill] sm:$0xff] %v10453_v13 }
  0x8d   : > { %7304 = vmatmul.mubr.f32.gmra.mrb[26].mxu0 %v10245_v14  ;;  %v6077_v14 = vld [vmem:[%s11733_s1 + $0x1a8] sm:$0xff] }
  0x8e   : > { %7306 = vmatprep.mubr.f32.mxu0 %v10248_v15  ;;  %v6076_v15 = vld [vmem:[%s11733_s1 + $0x1a0] sm:$0xff] }
  0x91   : > { %7307 = vmatmul.mubr.f32.gmra.mrb[28].mxu0 %v10253_v16 }
  0x92   : > { %7309 = vmatprep.mubr.f32.mxu0 %v10256_v17  ;;  %v10443_v17 = vld [vmem:[%s10056_s6 + $0x1a] sm:$0xff] }
  0x93   : > { %11826 = vst [vmem:[#allocation16_spill] sm:$0xff] %v10443_v17 }
  0x95   : > { %7310 = vmatmul.mubr.f32.gmra.mrb[30].mxu0 %v10261_v18  ;;  %v786_v18 = vld [vmem:[%s10056_s6 + $0xa] sm:$0xff] }
  0x96   : > { %7344 = vmatprep.mubr.f32.mxu0 %v238_v19  ;;  %v10356_v19 = vld [vmem:[%s10056_s6 + $0xa8] sm:$0xff] }
  0x99   : > { %7345 = vmatmul.mubr.f32.vlgmr.msra.gmra.mrb[0].mxu0 %v239_v22  ;;  %v6073_v22 = vld [vmem:[%s11733_s1 + $0x188] sm:$0xff] }
  0x9a   : > { %8739 = vmatpush3.bf16.msra.mxu0 %v8736_v3  ;;  %7347 = vmatprep.mubr.f32.mxu0 %v10273_v23  ;;  %v10353_v3 = vld [vmem:[%s10056_s6 + $0x98] sm:$0xff]  ;;  %v8768_v26 = vpack.c.bf16 %v6073_v22, %v6072_v21  ;;  %v6074_v21 = vld [vmem:[%s11733_s1 + $0x190] sm:$0xff] }
  0x9b   : > { %8741 = vmatprep.subr.bf16.mxu0 %v8740_v24  ;;  %v6075_v22 = vld [vmem:[%s11733_s1 + $0x198] sm:$0xff] }
  0x9c   : > { %v8772_v16 = vpack.c.bf16 %v6075_v22, %v6074_v21  ;;  %v8776_v21 = vpack.c.bf16 %v6077_v14, %v6076_v15  ;;  %v6078_v22 = vld [vmem:[%s11733_s1 + $0x1b0] sm:$0xff]  ;;  %v6080_v15 = vld [vmem:[%s11733_s1 + $0x1c0] sm:$0xff] }
  0x9d   : > { %7348 = vmatmul.mubr.f32.gmra.mrb[2].mxu0 %v10283_v27  ;;  %v8780_v14 = vpack.c.bf16 %v6079_v12, %v6078_v22  ;;  %v6082_v22 = vld [vmem:[%s11733_s1 + $0x1d0] sm:$0xff] }
  0x9e   : > { %7350 = vmatprep.mubr.f32.mxu0 %v10286_v28  ;;  %8743 = vmatpush3.bf16.msra.mxu0 %v8740_v24  ;;  %v10367_v24 = vld [vmem:[%s10056_s6 + $0xb0] sm:$0xff] }
  0x9f   : > { %8745 = vmatprep.subr.bf16.mxu0 %v8744_v29 }
  0xa1   : > { %7351 = vmatmul.mubr.f32.gmra.mrb[4].mxu0 %v10297_v33 }
  0xa2   : > { %7353 = vmatprep.mubr.f32.mxu0 %v10300_v34  ;;  %8747 = vmatpush3.bf16.msra.mxu0 %v8744_v29  ;;  %v10375_v29 = vld [vmem:[%s10056_s6 + $0xc8] sm:$0xff] }
  0xa3   : > { %8749 = vmatprep.subr.bf16.mxu0 %v8748_v37 }
  0xa5   : > { %7354 = vmatmul.mubr.f32.gmra.mrb[6].mxu0 %v10311_v42 }
  0xa6   : > { %7356 = vmatprep.mubr.f32.mxu0 %v10314_v43  ;;  %8751 = vmatpush3.bf16.msra.mxu0 %v8748_v37  ;;  %v10386_v37 = vld [vmem:[%s10056_s6 + $0xf0] sm:$0xff] }
  0xa7   : > { %8753 = vmatprep.subr.bf16.mxu0 %v8752_v44 }
  0xa9   : > { %7357 = vmatmul.mubr.f32.gmra.mrb[8].mxu0 %v10325_v49 }
  0xaa   : > { %7359 = vmatprep.mubr.f32.mxu0 %v10328_v52  ;;  %8755 = vmatpush3.bf16.msra.mxu0 %v8752_v44  ;;  %v10399_v44 = vld [vmem:[%s10056_s6 + $0x110] sm:$0xff] }
  0xab   : > { %8757 = vmatprep.subr.bf16.mxu0 %v8756_v53 }
  0xad   : > { %7360 = vmatmul.mubr.f32.gmra.mrb[10].mxu0 %v10339_v58 }
  0xae   : > { %7362 = vmatprep.mubr.f32.mxu0 %v10342_v59  ;;  %8759 = vmatpush3.bf16.msra.mxu0 %v8756_v53  ;;  %v10410_v53 = vld [vmem:[%s10056_s6 + $0x138] sm:$0xff] }
  0xaf   : > { %8761 = vmatprep.subr.bf16.mxu0 %v8760_v62 }
  0xb1   : > { %7363 = vmatmul.mubr.f32.gmra.mrb[12].mxu0 %v10353_v3 }
  0xb2   : > { %7365 = vmatprep.mubr.f32.mxu0 %v10356_v19  ;;  %8763 = vmatpush3.bf16.msra.mxu0 %v8760_v62  ;;  %v10423_v62 = vld [vmem:[%s10056_s6 + $0x158] sm:$0xff] }
  0xb3   : > { %8765 = vmatprep.subr.bf16.mxu0 %v8764_v20 }
  0xb5   : > { %7366 = vmatmul.mubr.f32.gmra.mrb[14].mxu0 %v10367_v24 }
  0xb6   : > { %7368 = vmatprep.mubr.f32.mxu0 %v10370_v25  ;;  %8767 = vmatpush3.bf16.msra.mxu0 %v8764_v20  ;;  %v785_v20 = vld [vmem:[%s10056_s6 + $0x2] sm:$0xff] }
  0xb7   : > { %8769 = vmatprep.subr.bf16.mxu0 %v8768_v26 }
  0xb9   : > { %7369 = vmatmul.mubr.f32.gmra.mrb[16].mxu0 %v10375_v29 }
  0xba   : > { %7371 = vmatprep.mubr.f32.mxu0 %v10378_v30 }
  0xbd   : > { %7372 = vmatmul.mubr.f32.gmra.mrb[18].mxu0 %v10383_v32 }
  0xbe   : > { %7374 = vmatprep.mubr.f32.mxu0 %v10386_v37 }
  0xc1   : > { %7375 = vmatmul.mubr.f32.gmra.mrb[20].mxu0 %v10391_v38 }
  0xc2   : > { %7377 = vmatprep.mubr.f32.mxu0 %v10394_v39 }
  0xc5   : > { %7378 = vmatmul.mubr.f32.gmra.mrb[22].mxu0 %v10399_v44 }
  0xc6   : > { %7380 = vmatprep.mubr.f32.mxu0 %v10402_v47 }
  0xc9   : > { %7381 = vmatmul.mubr.f32.gmra.mrb[24].mxu0 %v10407_v48 }
  0xca   : > { %7383 = vmatprep.mubr.f32.mxu0 %v10410_v53 }
  0xcd   : > { %7384 = vmatmul.mubr.f32.gmra.mrb[26].mxu0 %v10415_v54 }
  0xce   : > { %7386 = vmatprep.mubr.f32.mxu0 %v10418_v57 }
  0xd1   : > { %7387 = vmatmul.mubr.f32.gmra.mrb[28].mxu0 %v10423_v62 }
  0xd2   : > { %7389 = vmatprep.mubr.f32.mxu0 %v10426_v63 }
  0xd5   : > { %7390 = vmatmul.mubr.f32.gmra.mrb[30].mxu0 %v10431_v0 }
  0xd6   : > { %7424 = vmatprep.mubr.f32.mxu0 %v785_v20  ;;  %v10456_v20 = vld [vmem:[%s10056_s6 + $0x32] sm:$0xff] }
  0xd7   : > { %11828 = vst [vmem:[#allocation18_spill] sm:$0xff] %v10456_v20 }
  0xd9   : > { %7425 = vmatmul.mubr.f32.vlgmr.msra.gmra.mrb[0].mxu0 %v786_v18  ;;  %v10467_v18 = vld [vmem:[%s10056_s6 + $0x3a] sm:$0xff] }
  0xda   : > { %8771 = vmatpush3.bf16.msra.mxu0 %v8768_v26  ;;  %7427 = vmatprep.mubr.f32.mxu0 %v10443_v17  ;;  %11829 = vst [vmem:[#allocation19_spill] sm:$0xff] %v10467_v18  ;;  %v10470_v26 = vld [vmem:[%s10056_s6 + $0x4a] sm:$0xff] }
  0xdb   : > { %8773 = vmatprep.subr.bf16.mxu0 %v8772_v16  ;;  %11830 = vst [vmem:[#allocation20_spill] sm:$0xff] %v10470_v26  ;;  %v6081_v17 = vld [vmem:[%s11733_s1 + $0x1c8] sm:$0xff] }
  0xdc   : > { %v8784_v12 = vpack.c.bf16 %v6081_v17, %v6080_v15  ;;  %v6084_v15 = vld [vmem:[%s11733_s1 + $0x1e0] sm:$0xff] }
  0xdd   : > { %7428 = vmatmul.mubr.f32.gmra.mrb[2].mxu0 %v10453_v13  ;;  %v6083_v13 = vld [vmem:[%s11733_s1 + $0x1d8] sm:$0xff] }
  0xde   : > { %7430 = vmatprep.mubr.f32.mxu0 %v10456_v20  ;;  %8775 = vmatpush3.bf16.msra.mxu0 %v8772_v16  ;;  %v10481_v20 = vld [vmem:[%s10056_s6 + $0x52] sm:$0xff]  ;;  %v10484_v16 = vld [vmem:[%s10056_s6 + $0x62] sm:$0xff]  ;;  %v8788_v17 = vpack.c.bf16 %v6083_v13, %v6082_v22 }
  0xdf   : > { %8777 = vmatprep.subr.bf16.mxu0 %v8776_v21  ;;  %11831 = vst [vmem:[#allocation21_spill] sm:$0xff] %v10481_v20  ;;  %11832 = vst [vmem:[#allocation22_spill] sm:$0xff] %v10484_v16  ;;  %v6086_v22 = vld [vmem:[%s11733_s1 + $0x1f0] sm:$0xff] }
  0xe1   : > { %7431 = vmatmul.mubr.f32.gmra.mrb[4].mxu0 %v10467_v18  ;;  %v6085_v18 = vld [vmem:[%s11733_s1 + $0x1e8] sm:$0xff] }
  0xe2   : > { %7433 = vmatprep.mubr.f32.mxu0 %v10470_v26  ;;  %8779 = vmatpush3.bf16.msra.mxu0 %v8776_v21  ;;  %v10495_v26 = vld [vmem:[%s10056_s6 + $0x6a] sm:$0xff]  ;;  %v10498_v21 = vld [vmem:[%s10056_s6 + $0x7a] sm:$0xff]  ;;  %v8792_v13 = vpack.c.bf16 %v6085_v18, %v6084_v15 }
  0xe3   : > { %8781 = vmatprep.subr.bf16.mxu0 %v8780_v14  ;;  %11833 = vst [vmem:[#allocation23_spill] sm:$0xff] %v10495_v26  ;;  %11834 = vst [vmem:[#allocation24_spill] sm:$0xff] %v10498_v21  ;;  %v6120_v15 = vld [vmem:[%s11733_s1 + $0x200] sm:$0xff] }
  0xe5   : > { %7434 = vmatmul.mubr.f32.gmra.mrb[6].mxu0 %v10481_v20  ;;  %v6087_v20 = vld [vmem:[%s11733_s1 + $0x1f8] sm:$0xff] }
  0xe6   : > { %7436 = vmatprep.mubr.f32.mxu0 %v10484_v16  ;;  %8783 = vmatpush3.bf16.msra.mxu0 %v8780_v14  ;;  %v10509_v16 = vld [vmem:[%s10056_s6 + $0x82] sm:$0xff]  ;;  %v10512_v14 = vld [vmem:[%s10056_s6 + $0x92] sm:$0xff]  ;;  %v8796_v18 = vpack.c.bf16 %v6087_v20, %v6086_v22  ;;  %v10545_v22 = vld [vmem:[%s10056_s6 + $0xca] sm:$0xff] }
  0xe7   : > { %8785 = vmatprep.subr.bf16.mxu0 %v8784_v12  ;;  %11835 = vst [vmem:[#allocation25_spill] sm:$0xff] %v10512_v14  ;;  %11838 = vst [vmem:[#allocation28_spill] sm:$0xff] %v10545_v22 }
  0xe9   : > { %7437 = vmatmul.mubr.f32.gmra.mrb[8].mxu0 %v10495_v26  ;;  %v6121_v26 = vld [vmem:[%s11733_s1 + $0x208] sm:$0xff] }
  0xea   : > { %7439 = vmatprep.mubr.f32.mxu0 %v10498_v21  ;;  %8787 = vmatpush3.bf16.msra.mxu0 %v8784_v12  ;;  %v10523_v21 = vld [vmem:[%s10056_s6 + $0x9a] sm:$0xff]  ;;  %v10526_v12 = vld [vmem:[%s10056_s6 + $0xaa] sm:$0xff]  ;;  %v8800_v20 = vpack.c.bf16 %v6121_v26, %v6120_v15  ;;  %v10556_v26 = vld [vmem:[%s10056_s6 + $0xf2] sm:$0xff] }
  0xeb   : > { %8789 = vmatprep.subr.bf16.mxu0 %v8788_v17  ;;  %11836 = vst [vmem:[#allocation26_spill] sm:$0xff] %v10523_v21  ;;  %11841 = vst [vmem:[#allocation31_spill] sm:$0xff] %v10556_v26  ;;  %v10564_v15 = vld [vmem:[%s10056_s6 + $0x10a] sm:$0xff] }
  0xec   : > { %11843 = vst [vmem:[#allocation33_spill] sm:$0xff] %v10564_v15 }
  0xed   : > { %7440 = vmatmul.mubr.f32.gmra.mrb[10].mxu0 %v10509_v16 }
  0xee   : > { %7442 = vmatprep.mubr.f32.mxu0 %v10512_v14  ;;  %8791 = vmatpush3.bf16.msra.mxu0 %v8788_v17  ;;  %v10537_v17 = vld [vmem:[%s10056_s6 + $0xb2] sm:$0xff]  ;;  %v10540_v14 = vld [vmem:[%s10056_s6 + $0xc2] sm:$0xff] }
  0xef   : > { %8793 = vmatprep.subr.bf16.mxu0 %v8792_v13  ;;  %11837 = vst [vmem:[#allocation27_spill] sm:$0xff] %v10540_v14 }
  0xf1   : > { %7443 = vmatmul.mubr.f32.gmra.mrb[12].mxu0 %v10523_v21  ;;  %v10548_v21 = vld [vmem:[%s10056_s6 + $0xda] sm:$0xff] }
  0xf2   : > { %7445 = vmatprep.mubr.f32.mxu0 %v10526_v12  ;;  %8795 = vmatpush3.bf16.msra.mxu0 %v8792_v13  ;;  %11839 = vst [vmem:[#allocation29_spill] sm:$0xff] %v10548_v21  ;;  %v10553_v13 = vld [vmem:[%s10056_s6 + $0xe2] sm:$0xff] }
  0xf3   : > { %8797 = vmatprep.subr.bf16.mxu0 %v8796_v18  ;;  %11840 = vst [vmem:[#allocation30_spill] sm:$0xff] %v10553_v13 }
  0xf5   : > { %7446 = vmatmul.mubr.f32.gmra.mrb[14].mxu0 %v10537_v17 }
  0xf6   : > { %7448 = vmatprep.mubr.f32.mxu0 %v10540_v14  ;;  %8799 = vmatpush3.bf16.msra.mxu0 %v8796_v18  ;;  %v10561_v18 = vld [vmem:[%s10056_s6 + $0xfa] sm:$0xff] }
  0xf7   : > { %8801 = vmatprep.subr.bf16.mxu0 %v8800_v20  ;;  %11842 = vst [vmem:[#allocation32_spill] sm:$0xff] %v10561_v18  ;;  %v10593_v14 = vld [vmem:[%s10056_s6 + $0x15a] sm:$0xff] }
  0xf8   : > { %11850 = vst [vmem:[#allocation40_spill] sm:$0xff] %v10593_v14 }
  0xf9   : > { %7449 = vmatmul.mubr.f32.gmra.mrb[16].mxu0 %v10545_v22  ;;  %v10572_v22 = vld [vmem:[%s10056_s6 + $0x122] sm:$0xff] }
  0xfa   : > { %7451 = vmatprep.mubr.f32.mxu0 %v10548_v21  ;;  %v10569_v21 = vld [vmem:[%s10056_s6 + $0x112] sm:$0xff]  ;;  %11845 = vst [vmem:[#allocation35_spill] sm:$0xff] %v10572_v22 }
  0xfb   : > { %11844 = vst [vmem:[#allocation34_spill] sm:$0xff] %v10569_v21 }
  0xfd   : > { %7452 = vmatmul.mubr.f32.gmra.mrb[18].mxu0 %v10553_v13  ;;  %v10580_v13 = vld [vmem:[%s10056_s6 + $0x13a] sm:$0xff] }
  0xfe   : > { %7454 = vmatprep.mubr.f32.mxu0 %v10556_v26  ;;  %v10577_v26 = vld [vmem:[%s10056_s6 + $0x12a] sm:$0xff]  ;;  %11847 = vst [vmem:[#allocation37_spill] sm:$0xff] %v10580_v13 }
  0xff   : > { %11846 = vst [vmem:[#allocation36_spill] sm:$0xff] %v10577_v26 }
 0x101   : > { %7455 = vmatmul.mubr.f32.gmra.mrb[20].mxu0 %v10561_v18  ;;  %v10585_v18 = vld [vmem:[%s10056_s6 + $0x142] sm:$0xff] }
 0x102   : > { %7457 = vmatprep.mubr.f32.mxu0 %v10564_v15  ;;  %11848 = vst [vmem:[#allocation38_spill] sm:$0xff] %v10585_v18  ;;  %v10588_v15 = vld [vmem:[%s10056_s6 + $0x152] sm:$0xff] }
 0x103   : > { %11849 = vst [vmem:[#allocation39_spill] sm:$0xff] %v10588_v15 }
 0x105   : > { %7458 = vmatmul.mubr.f32.gmra.mrb[22].mxu0 %v10569_v21  ;;  %v10596_v21 = vld [vmem:[%s10056_s6 + $0x16a] sm:$0xff] }
 0x106   : > { %7460 = vmatprep.mubr.f32.mxu0 %v10572_v22  ;;  %11851 = vst [vmem:[#allocation41_spill] sm:$0xff] %v10596_v21  ;;  %v10601_v22 = vld [vmem:[%s10056_s6 + $0x172] sm:$0xff] }
 0x109   : > { %7461 = vmatmul.mubr.f32.gmra.mrb[24].mxu0 %v10577_v26 }
 0x10a   : > { %7463 = vmatprep.mubr.f32.mxu0 %v10580_v13  ;;  %v6122_v13 = vld [vmem:[%s11733_s1 + $0x210] sm:$0xff] }
 0x10d   : > { %7464 = vmatmul.mubr.f32.gmra.mrb[26].mxu0 %v10585_v18  ;;  %v6123_v18 = vld [vmem:[%s11733_s1 + $0x218] sm:$0xff] }
 0x10e   : > { %7466 = vmatprep.mubr.f32.mxu0 %v10588_v15  ;;  %v8804_v15 = vpack.c.bf16 %v6123_v18, %v6122_v13  ;;  %v6127_v13 = vld [vmem:[%s11733_s1 + $0x238] sm:$0xff]  ;;  %v6130_v18 = vld [vmem:[%s11733_s1 + $0x250] sm:$0xff] }
 0x111   : > { %7467 = vmatmul.mubr.f32.gmra.mrb[28].mxu0 %v10593_v14  ;;  %v6124_v14 = vld [vmem:[%s11733_s1 + $0x220] sm:$0xff] }
 0x112   : > { %7469 = vmatprep.mubr.f32.mxu0 %v10596_v21  ;;  %v6125_v21 = vld [vmem:[%s11733_s1 + $0x228] sm:$0xff] }
 0x113   : > { %v8808_v26 = vpack.c.bf16 %v6125_v21, %v6124_v14  ;;  %v6129_v21 = vld [vmem:[%s11733_s1 + $0x248] sm:$0xff] }
 0x115   : > { %7470 = vmatmul.mubr.f32.gmra.mrb[30].mxu0 %v10601_v22 }
 0x116   : > { %7504 = vmatprep.mubr.f32.mxu0 %v10273_v23  ;;  %v6126_v23 = vld [vmem:[%s11733_s1 + $0x230] sm:$0xff] }
 0x119   : > { %7505 = vmatmul.mubr.f32.vlgmr.msra.gmra.mrb[0].mxu0 %v10283_v27  ;;  %v8812_v27 = vpack.c.bf16 %v6127_v13, %v6126_v23  ;;  %v6133_v13 = vld [vmem:[%s11733_s1 + $0x268] sm:$0xff] }
 0x11a   : > { %8803 = vmatpush3.bf16.msra.mxu0 %v8800_v20  ;;  %7507 = vmatprep.mubr.f32.mxu0 %v10286_v28  ;;  %v6128_v20 = vld [vmem:[%s11733_s1 + $0x240] sm:$0xff] }
 0x11b   : > { %8805 = vmatprep.subr.bf16.mxu0 %v8804_v15  ;;  %v8816_v14 = vpack.c.bf16 %v6129_v21, %v6128_v20  ;;  %v6135_v21 = vld [vmem:[%s11733_s1 + $0x278] sm:$0xff] }
 0x11d   : > { %7508 = vmatmul.mubr.f32.gmra.mrb[2].mxu0 %v10297_v33 }
 0x11e   : > { %7510 = vmatprep.mubr.f32.mxu0 %v10300_v34  ;;  %8807 = vmatpush3.bf16.msra.mxu0 %v8804_v15  ;;  %v6131_v15 = vld [vmem:[%s11733_s1 + $0x258] sm:$0xff] }
 0x11f   : > { %8809 = vmatprep.subr.bf16.mxu0 %v8808_v26  ;;  %v8820_v23 = vpack.c.bf16 %v6131_v15, %v6130_v18  ;;  %v6169_v15 = vld [vmem:[%s11733_s1 + $0x288] sm:$0xff] }
 0x121   : > { %7511 = vmatmul.mubr.f32.gmra.mrb[4].mxu0 %v10311_v42 }
 0x122   : > { %7513 = vmatprep.mubr.f32.mxu0 %v10314_v43  ;;  %8811 = vmatpush3.bf16.msra.mxu0 %v8808_v26  ;;  %v6132_v26 = vld [vmem:[%s11733_s1 + $0x260] sm:$0xff] }
 0x123   : > { %8813 = vmatprep.subr.bf16.mxu0 %v8812_v27  ;;  %v8824_v20 = vpack.c.bf16 %v6133_v13, %v6132_v26  ;;  %v10687_v13 = vld [vmem:[%s10056_s6 + $0x188] sm:$0xff] }
 0x125   : > { %7514 = vmatmul.mubr.f32.gmra.mrb[6].mxu0 %v10325_v49 }
 0x126   : > { %7516 = vmatprep.mubr.f32.mxu0 %v10328_v52  ;;  %8815 = vmatpush3.bf16.msra.mxu0 %v8812_v27  ;;  %v6134_v27 = vld [vmem:[%s11733_s1 + $0x270] sm:$0xff] }
 0x127   : > { %8817 = vmatprep.subr.bf16.mxu0 %v8816_v14  ;;  %v8828_v18 = vpack.c.bf16 %v6135_v21, %v6134_v27  ;;  %v6171_v27 = vld [vmem:[%s11733_s1 + $0x298] sm:$0xff] }
 0x129   : > { %7517 = vmatmul.mubr.f32.gmra.mrb[8].mxu0 %v10339_v58 }
 0x12a   : > { %7519 = vmatprep.mubr.f32.mxu0 %v10342_v59  ;;  %8819 = vmatpush3.bf16.msra.mxu0 %v8816_v14  ;;  %v6168_v14 = vld [vmem:[%s11733_s1 + $0x280] sm:$0xff] }
 0x12b   : > { %8821 = vmatprep.subr.bf16.mxu0 %v8820_v23  ;;  %v8832_v26 = vpack.c.bf16 %v6169_v15, %v6168_v14  ;;  %v6173_v14 = vld [vmem:[%s11733_s1 + $0x2a8] sm:$0xff] }
 0x12d   : > { %7520 = vmatmul.mubr.f32.gmra.mrb[10].mxu0 %v10353_v3 }
 0x12e   : > { %7522 = vmatprep.mubr.f32.mxu0 %v10356_v19  ;;  %8823 = vmatpush3.bf16.msra.mxu0 %v8820_v23  ;;  %v10682_v23 = vld [vmem:[%s10056_s6 + $0x180] sm:$0xff] }
 0x12f   : > { %8825 = vmatprep.subr.bf16.mxu0 %v8824_v20 }
 0x131   : > { %7523 = vmatmul.mubr.f32.gmra.mrb[12].mxu0 %v10367_v24 }
 0x132   : > { %7525 = vmatprep.mubr.f32.mxu0 %v10370_v25  ;;  %8827 = vmatpush3.bf16.msra.mxu0 %v8824_v20  ;;  %v6170_v20 = vld [vmem:[%s11733_s1 + $0x290] sm:$0xff] }
 0x133   : > { %8829 = vmatprep.subr.bf16.mxu0 %v8828_v18  ;;  %v8836_v21 = vpack.c.bf16 %v6171_v27, %v6170_v20  ;;  %v6175_v20 = vld [vmem:[%s11733_s1 + $0x2b8] sm:$0xff] }
 0x134   : > { %v6179_v27 = vld [vmem:[%s11733_s1 + $0x2d8] sm:$0xff] }
 0x135   : > { %7526 = vmatmul.mubr.f32.gmra.mrb[14].mxu0 %v10375_v29 }
 0x136   : > { %7528 = vmatprep.mubr.f32.mxu0 %v10378_v30  ;;  %8831 = vmatpush3.bf16.msra.mxu0 %v8828_v18  ;;  %v6172_v18 = vld [vmem:[%s11733_s1 + $0x2a0] sm:$0xff] }
 0x137   : > { %8833 = vmatprep.subr.bf16.mxu0 %v8832_v26  ;;  %v8840_v15 = vpack.c.bf16 %v6173_v14, %v6172_v18  ;;  %v6183_v18 = vld [vmem:[%s11733_s1 + $0x2f8] sm:$0xff]  ;;  %v6217_v14 = vld [vmem:[%s11733_s1 + $0x308] sm:$0xff] }
 0x139   : > { %7529 = vmatmul.mubr.f32.gmra.mrb[16].mxu0 %v10383_v32 }
 0x13a   : > { %7531 = vmatprep.mubr.f32.mxu0 %v10386_v37 }
 0x13d   : > { %7532 = vmatmul.mubr.f32.gmra.mrb[18].mxu0 %v10391_v38 }
 0x13e   : > { %7534 = vmatprep.mubr.f32.mxu0 %v10394_v39 }
 0x141   : > { %7535 = vmatmul.mubr.f32.gmra.mrb[20].mxu0 %v10399_v44 }
 0x142   : > { %7537 = vmatprep.mubr.f32.mxu0 %v10402_v47 }
 0x145   : > { %7538 = vmatmul.mubr.f32.gmra.mrb[22].mxu0 %v10407_v48 }
 0x146   : > { %7540 = vmatprep.mubr.f32.mxu0 %v10410_v53 }
 0x149   : > { %7541 = vmatmul.mubr.f32.gmra.mrb[24].mxu0 %v10415_v54 }
 0x14a   : > { %7543 = vmatprep.mubr.f32.mxu0 %v10418_v57 }
 0x14d   : > { %7544 = vmatmul.mubr.f32.gmra.mrb[26].mxu0 %v10423_v62 }
 0x14e   : > { %7546 = vmatprep.mubr.f32.mxu0 %v10426_v63 }
 0x151   : > { %7547 = vmatmul.mubr.f32.gmra.mrb[28].mxu0 %v10431_v0 }
 0x152   : > { %7549 = vmatprep.mubr.f32.mxu0 %v10682_v23 }
 0x155   : > { %7550 = vmatmul.mubr.f32.gmra.mrb[30].mxu0 %v10687_v13 }
 0x156   : > { %7584 = vmatprep.mubr.f32.mxu0 %v10103_v31  ;;  %v6174_v31 = vld [vmem:[%s11733_s1 + $0x2b0] sm:$0xff] }
 0x159   : > { %7585 = vmatmul.mubr.f32.vlgmr.msra.gmra.mrb[0].mxu0 %v10113_v35  ;;  %v8844_v35 = vpack.c.bf16 %v6175_v20, %v6174_v31  ;;  %v6220_v20 = vld [vmem:[%s11733_s1 + $0x320] sm:$0xff] }
 0x15a   : > { %8835 = vmatpush3.bf16.msra.mxu0 %v8832_v26  ;;  %7587 = vmatprep.mubr.f32.mxu0 %v10116_v36  ;;  %v6176_v36 = vld [vmem:[%s11733_s1 + $0x2c0] sm:$0xff]  ;;  %v6177_v26 = vld [vmem:[%s11733_s1 + $0x2c8] sm:$0xff] }
 0x15b   : > { %8837 = vmatprep.subr.bf16.mxu0 %v8836_v21 }
 0x15d   : > { %7588 = vmatmul.mubr.f32.gmra.mrb[2].mxu0 %v10127_v40  ;;  %v8848_v40 = vpack.c.bf16 %v6177_v26, %v6176_v36  ;;  %v11860_v36 = vld [vmem:[#allocation17_spill] sm:$0xff]  ;;  %v11861_v26 = vld [vmem:[#allocation18_spill] sm:$0xff] }
 0x15e   : > { %7590 = vmatprep.mubr.f32.mxu0 %v10130_v41  ;;  %8839 = vmatpush3.bf16.msra.mxu0 %v8836_v21  ;;  %v6178_v41 = vld [vmem:[%s11733_s1 + $0x2d0] sm:$0xff]  ;;  %v6181_v21 = vld [vmem:[%s11733_s1 + $0x2e8] sm:$0xff] }
 0x15f   : > { %8841 = vmatprep.subr.bf16.mxu0 %v8840_v15 }
 0x161   : > { %7591 = vmatmul.mubr.f32.gmra.mrb[4].mxu0 %v10141_v45  ;;  %v8852_v45 = vpack.c.bf16 %v6179_v27, %v6178_v41  ;;  %v6222_v41 = vld [vmem:[%s11733_s1 + $0x330] sm:$0xff]  ;;  %v6223_v27 = vld [vmem:[%s11733_s1 + $0x338] sm:$0xff] }
 0x162   : > { %7593 = vmatprep.mubr.f32.mxu0 %v10144_v46  ;;  %8843 = vmatpush3.bf16.msra.mxu0 %v8840_v15  ;;  %v6180_v46 = vld [vmem:[%s11733_s1 + $0x2e0] sm:$0xff]  ;;  %v11859_v15 = vld [vmem:[#allocation16_spill] sm:$0xff] }
 0x163   : > { %8845 = vmatprep.subr.bf16.mxu0 %v8844_v35 }
 0x165   : > { %7594 = vmatmul.mubr.f32.gmra.mrb[6].mxu0 %v10155_v50  ;;  %v8856_v50 = vpack.c.bf16 %v6181_v21, %v6180_v46  ;;  %v11863_v46 = vld [vmem:[#allocation20_spill] sm:$0xff]  ;;  %v8876_v21 = vpack.c.bf16 %v6223_v27, %v6222_v41  ;;  %v11874_v41 = vld [vmem:[#allocation31_spill] sm:$0xff] }
 0x166   : > { %7596 = vmatprep.mubr.f32.mxu0 %v10158_v51  ;;  %8847 = vmatpush3.bf16.msra.mxu0 %v8844_v35  ;;  %v6182_v51 = vld [vmem:[%s11733_s1 + $0x2f0] sm:$0xff]  ;;  %v6221_v35 = vld [vmem:[%s11733_s1 + $0x328] sm:$0xff] }
 0x167   : > { %8849 = vmatprep.subr.bf16.mxu0 %v8848_v40  ;;  %v11875_v27 = vld [vmem:[#allocation32_spill] sm:$0xff] }
 0x169   : > { %7597 = vmatmul.mubr.f32.gmra.mrb[8].mxu0 %v10169_v55  ;;  %v8860_v55 = vpack.c.bf16 %v6183_v18, %v6182_v51  ;;  %v6225_v51 = vld [vmem:[%s11733_s1 + $0x348] sm:$0xff]  ;;  %v11864_v18 = vld [vmem:[#allocation21_spill] sm:$0xff] }
 0x16a   : > { %7599 = vmatprep.mubr.f32.mxu0 %v10172_v56  ;;  %8851 = vmatpush3.bf16.msra.mxu0 %v8848_v40  ;;  %v6216_v56 = vld [vmem:[%s11733_s1 + $0x300] sm:$0xff]  ;;  %v8872_v40 = vpack.c.bf16 %v6221_v35, %v6220_v20  ;;  %v6265_v20 = vld [vmem:[%s11733_s1 + $0x388] sm:$0xff] }
 0x16b   : > { %8853 = vmatprep.subr.bf16.mxu0 %v8852_v45  ;;  %v11870_v35 = vld [vmem:[#allocation27_spill] sm:$0xff] }
 0x16d   : > { %7600 = vmatmul.mubr.f32.gmra.mrb[10].mxu0 %v10183_v60  ;;  %v8864_v60 = vpack.c.bf16 %v6217_v14, %v6216_v56  ;;  %v6226_v14 = vld [vmem:[%s11733_s1 + $0x350] sm:$0xff] }
 0x16e   : > { %7602 = vmatprep.mubr.f32.mxu0 %v10186_v61  ;;  %8855 = vmatpush3.bf16.msra.mxu0 %v8852_v45  ;;  %v11852_v61 = vld [vmem:[#allocation9_spill] sm:$0xff]  ;;  %v11862_v45 = vld [vmem:[#allocation19_spill] sm:$0xff] }
 0x16f   : > { %8857 = vmatprep.subr.bf16.mxu0 %v8856_v50 }
 0x171   : > { %7603 = vmatmul.mubr.f32.gmra.mrb[12].mxu0 %v10197_v1  ;;  %v11853_v1 = vld [vmem:[#allocation10_spill] sm:$0xff] }
 0x172   : > { %7605 = vmatprep.mubr.f32.mxu0 %v10200_v2  ;;  %8859 = vmatpush3.bf16.msra.mxu0 %v8856_v50  ;;  %v11854_v2 = vld [vmem:[#allocation11_spill] sm:$0xff] }
 0x173   : > { %8861 = vmatprep.subr.bf16.mxu0 %v8860_v55  ;;  %v6224_v50 = vld [vmem:[%s11733_s1 + $0x340] sm:$0xff] }
 0x174   : > { %v8880_v56 = vpack.c.bf16 %v6225_v51, %v6224_v50  ;;  %v11880_v50 = vld [vmem:[#allocation37_spill] sm:$0xff]  ;;  %v11881_v51 = vld [vmem:[#allocation38_spill] sm:$0xff] }
 0x175   : > { %7606 = vmatmul.mubr.f32.gmra.mrb[14].mxu0 %v10205_v4  ;;  %v11855_v4 = vld [vmem:[#allocation12_spill] sm:$0xff] }
 0x176   : > { %7608 = vmatprep.mubr.f32.mxu0 %v10208_v5  ;;  %8863 = vmatpush3.bf16.msra.mxu0 %v8860_v55  ;;  %v11856_v5 = vld [vmem:[#allocation13_spill] sm:$0xff]  ;;  %v11865_v55 = vld [vmem:[#allocation22_spill] sm:$0xff] }
 0x177   : > { %8865 = vmatprep.subr.bf16.mxu0 %v8864_v60 }
 0x179   : > { %7609 = vmatmul.mubr.f32.gmra.mrb[16].mxu0 %v10213_v6  ;;  %v11857_v6 = vld [vmem:[#allocation14_spill] sm:$0xff] }
 0x17a   : > { %7611 = vmatprep.mubr.f32.mxu0 %v10216_v7  ;;  %v10768_v7 = vld [vmem:[%s10056_s6 + $0x181] sm:$0xff] }
 0x17d   : > { %7612 = vmatmul.mubr.f32.gmra.mrb[18].mxu0 %v10221_v8  ;;  %v11858_v8 = vld [vmem:[#allocation15_spill] sm:$0xff] }
 0x17e   : > { %7614 = vmatprep.mubr.f32.mxu0 %v10224_v9  ;;  %v10773_v9 = vld [vmem:[%s10056_s6 + $0x189] sm:$0xff] }
 0x181   : > { %7615 = vmatmul.mubr.f32.gmra.mrb[20].mxu0 %v10229_v10  ;;  %v6218_v10 = vld [vmem:[%s11733_s1 + $0x310] sm:$0xff] }
 0x182   : > { %7617 = vmatprep.mubr.f32.mxu0 %v10232_v11  ;;  %v6219_v11 = vld [vmem:[%s11733_s1 + $0x318] sm:$0xff] }
 0x183   : > { %v8868_v31 = vpack.c.bf16 %v6219_v11, %v6218_v10  ;;  %v6230_v10 = vld [vmem:[%s11733_s1 + $0x370] sm:$0xff]  ;;  %v6231_v11 = vld [vmem:[%s11733_s1 + $0x378] sm:$0xff] }
 0x185   : > { %7618 = vmatmul.mubr.f32.gmra.mrb[22].mxu0 %v11852_v61  ;;  %v11866_v61 = vld [vmem:[#allocation23_spill] sm:$0xff] }
 0x186   : > { %7620 = vmatprep.mubr.f32.mxu0 %v11853_v1  ;;  %v11867_v1 = vld [vmem:[#allocation24_spill] sm:$0xff] }
 0x189   : > { %7621 = vmatmul.mubr.f32.gmra.mrb[24].mxu0 %v11854_v2 }
 0x18a   : > { %7623 = vmatprep.mubr.f32.mxu0 %v11855_v4  ;;  %v6228_v4 = vld [vmem:[%s11733_s1 + $0x360] sm:$0xff] }
 0x18d   : > { %7624 = vmatmul.mubr.f32.gmra.mrb[26].mxu0 %v11856_v5  ;;  %v6229_v5 = vld [vmem:[%s11733_s1 + $0x368] sm:$0xff] }
 0x18e   : > { %7626 = vmatprep.mubr.f32.mxu0 %v11857_v6  ;;  %v11868_v6 = vld [vmem:[#allocation25_spill] sm:$0xff] }
 0x191   : > { %7627 = vmatmul.mubr.f32.gmra.mrb[28].mxu0 %v11858_v8  ;;  %v8888_v8 = vpack.c.bf16 %v6229_v5, %v6228_v4  ;;  %v6269_v4 = vld [vmem:[%s11733_s1 + $0x3a8] sm:$0xff] }
 0x192   : > { %7629 = vmatprep.mubr.f32.mxu0 %v10768_v7 }
 0x195   : > { %7630 = vmatmul.mubr.f32.gmra.mrb[30].mxu0 %v10773_v9 }
 0x196   : > { %7664 = vmatprep.mubr.f32.mxu0 %v11859_v15  ;;  %v11869_v15 = vld [vmem:[#allocation26_spill] sm:$0xff] }
 0x199   : > { %7665 = vmatmul.mubr.f32.vlgmr.msra.gmra.mrb[0].mxu0 %v11860_v36 }
 0x19a   : > { %8867 = vmatpush3.bf16.msra.mxu0 %v8864_v60  ;;  %7667 = vmatprep.mubr.f32.mxu0 %v11861_v26  ;;  %v6227_v60 = vld [vmem:[%s11733_s1 + $0x358] sm:$0xff]  ;;  %v11871_v26 = vld [vmem:[#allocation28_spill] sm:$0xff] }
 0x19b   : > { %8869 = vmatprep.subr.bf16.mxu0 %v8868_v31  ;;  %v8884_v2 = vpack.c.bf16 %v6227_v60, %v6226_v14  ;;  %v10854_v14 = vld [vmem:[%s10056_s6 + $0x182] sm:$0xff]  ;;  %v10859_v60 = vld [vmem:[%s10056_s6 + $0x18a] sm:$0xff] }
 0x19d   : > { %7668 = vmatmul.mubr.f32.gmra.mrb[2].mxu0 %v11862_v45  ;;  %v11877_v45 = vld [vmem:[#allocation34_spill] sm:$0xff] }
 0x19e   : > { %7670 = vmatprep.mubr.f32.mxu0 %v11863_v46  ;;  %8871 = vmatpush3.bf16.msra.mxu0 %v8868_v31  ;;  %v6264_v31 = vld [vmem:[%s11733_s1 + $0x380] sm:$0xff] }
 0x19f   : > { %8873 = vmatprep.subr.bf16.mxu0 %v8872_v40  ;;  %v8896_v36 = vpack.c.bf16 %v6265_v20, %v6264_v31  ;;  %v11878_v46 = vld [vmem:[#allocation35_spill] sm:$0xff]  ;;  %v6235_v31 = vld [vmem:[%s10056_s6 + $0x51] sm:$0xff] }
 0x1a0   : > { %v6236_v20 = vld [vmem:[%s10056_s6 + $0x61] sm:$0xff] }
 0x1a1   : > { %7671 = vmatmul.mubr.f32.gmra.mrb[4].mxu0 %v11864_v18  ;;  %v11882_v18 = vld [vmem:[#allocation39_spill] sm:$0xff] }
 0x1a2   : > { %7673 = vmatprep.mubr.f32.mxu0 %v11865_v55  ;;  %8875 = vmatpush3.bf16.msra.mxu0 %v8872_v40  ;;  %v11873_v40 = vld [vmem:[#allocation30_spill] sm:$0xff]  ;;  %v11883_v55 = vld [vmem:[#allocation40_spill] sm:$0xff] }
 0x1a3   : > { %8877 = vmatprep.subr.bf16.mxu0 %v8876_v21 }
 0x1a5   : > { %7674 = vmatmul.mubr.f32.gmra.mrb[6].mxu0 %v11866_v61  ;;  %v6266_v61 = vld [vmem:[%s11733_s1 + $0x390] sm:$0xff] }
 0x1a6   : > { %7676 = vmatprep.mubr.f32.mxu0 %v11867_v1  ;;  %8879 = vmatpush3.bf16.msra.mxu0 %v8876_v21  ;;  %v11879_v21 = vld [vmem:[#allocation36_spill] sm:$0xff]  ;;  %v6267_v1 = vld [vmem:[%s11733_s1 + $0x398] sm:$0xff] }
 0x1a7   : > { %8881 = vmatprep.subr.bf16.mxu0 %v8880_v56 }
 0x1a9   : > { %7677 = vmatmul.mubr.f32.gmra.mrb[8].mxu0 %v10509_v16  ;;  %v8892_v16 = vpack.c.bf16 %v6231_v11, %v6230_v10  ;;  %v6275_v10 = vld [vmem:[%s11733_s1 + $0x3d8] sm:$0xff]  ;;  %v6277_v11 = vld [vmem:[%s11733_s1 + $0x3e8] sm:$0xff] }
 0x1aa   : > { %7679 = vmatprep.mubr.f32.mxu0 %v11868_v6  ;;  %8883 = vmatpush3.bf16.msra.mxu0 %v8880_v56  ;;  %v11884_v56 = vld [vmem:[#allocation41_spill] sm:$0xff]  ;;  %v6271_v6 = vld [vmem:[%s11733_s1 + $0x3b8] sm:$0xff] }
 0x1ab   : > { %8885 = vmatprep.subr.bf16.mxu0 %v8884_v2 }
 0x1ad   : > { %7680 = vmatmul.mubr.f32.gmra.mrb[10].mxu0 %v11869_v15  ;;  %v6279_v15 = vld [vmem:[%s11733_s1 + $0x3f8] sm:$0xff] }
 0x1ae   : > { %7682 = vmatprep.mubr.f32.mxu0 %v10526_v12  ;;  %8887 = vmatpush3.bf16.msra.mxu0 %v8884_v2  ;;  %v11872_v12 = vld [vmem:[#allocation29_spill] sm:$0xff]  ;;  %v8900_v2 = vpack.c.bf16 %v6267_v1, %v6266_v61 }
 0x1af   : > { %8889 = vmatprep.subr.bf16.mxu0 %v8888_v8  ;;  %v6322_v1 = vld [vmem:[%s11733_s1 + $0x450] sm:$0xff] }
 0x1b1   : > { %7683 = vmatmul.mubr.f32.gmra.mrb[12].mxu0 %v10537_v17  ;;  %v11876_v17 = vld [vmem:[#allocation33_spill] sm:$0xff] }
 0x1b2   : > { %7685 = vmatprep.mubr.f32.mxu0 %v11870_v35  ;;  %8891 = vmatpush3.bf16.msra.mxu0 %v8888_v8  ;;  %v6273_v8 = vld [vmem:[%s11733_s1 + $0x3c8] sm:$0xff] }
 0x1b3   : > { %8893 = vmatprep.subr.bf16.mxu0 %v8892_v16 }
 0x1b5   : > { %7686 = vmatmul.mubr.f32.gmra.mrb[14].mxu0 %v11871_v26 }
 0x1b6   : > { %7688 = vmatprep.mubr.f32.mxu0 %v11872_v12  ;;  %8895 = vmatpush3.bf16.msra.mxu0 %v8892_v16  ;;  %v6313_v16 = vld [vmem:[%s11733_s1 + $0x408] sm:$0xff]  ;;  %v6319_v12 = vld [vmem:[%s11733_s1 + $0x438] sm:$0xff] }
 0x1b7   : > { %8897 = vmatprep.subr.bf16.mxu0 %v8896_v36 }
 0x1b9   : > { %7689 = vmatmul.mubr.f32.gmra.mrb[16].mxu0 %v11873_v40  ;;  %v3174_v40 = vld [vmem:[#allocation3 + $0xb0] sm:$0xff] }
 0x1ba   : > { %7691 = vmatprep.mubr.f32.mxu0 %v11874_v41  ;;  %v3175_v41 = vld [vmem:[#allocation3 + $0xb8] sm:$0xff] }
 0x1bd   : > { %7692 = vmatmul.mubr.f32.gmra.mrb[18].mxu0 %v11875_v27  ;;  %v6237_v27 = vld [vmem:[%s10056_s6 + $0x69] sm:$0xff] }
 0x1be   : > { %7694 = vmatprep.mubr.f32.mxu0 %v11876_v17  ;;  %v6238_v17 = vld [vmem:[%s10056_s6 + $0x79] sm:$0xff] }
 0x1c1   : > { %7695 = vmatmul.mubr.f32.gmra.mrb[20].mxu0 %v11877_v45 }
 0x1c2   : > { %7697 = vmatprep.mubr.f32.mxu0 %v11878_v46  ;;  %v6320_v46 = vld [vmem:[%s11733_s1 + $0x440] sm:$0xff] }
 0x1c5   : > { %7698 = vmatmul.mubr.f32.gmra.mrb[22].mxu0 %v11879_v21  ;;  %v8972_v21 = vpack.c.bf16 %v3175_v41, %v3174_v40  ;;  %v6295_v40 = vld [vmem:[%s10056_s6 + $0xe2] sm:$0xff]  ;;  %v6296_v41 = vld [vmem:[%s10056_s6 + $0xf2] sm:$0xff] }
 0x1c6   : > { %7700 = vmatprep.mubr.f32.mxu0 %v11880_v50  ;;  %v6321_v50 = vld [vmem:[%s11733_s1 + $0x448] sm:$0xff] }
 0x1c7   : > { %v8944_v61 = vpack.c.bf16 %v6321_v50, %v6320_v46  ;;  %v6300_v46 = vld [vmem:[%s10056_s6 + $0x122] sm:$0xff]  ;;  %v6302_v50 = vld [vmem:[%s10056_s6 + $0x13a] sm:$0xff] }
 0x1c9   : > { %7701 = vmatmul.mubr.f32.gmra.mrb[24].mxu0 %v11881_v51  ;;  %v3176_v51 = vld [vmem:[#allocation3 + $0xc0] sm:$0xff] }
 0x1ca   : > { %7703 = vmatprep.mubr.f32.mxu0 %v11882_v18  ;;  %v3177_v18 = vld [vmem:[#allocation3 + $0xc8] sm:$0xff] }
 0x1cd   : > { %7704 = vmatmul.mubr.f32.gmra.mrb[26].mxu0 %v11883_v55  ;;  %v6239_v55 = vld [vmem:[%s10056_s6 + $0x81] sm:$0xff] }
 0x1ce   : > { %7706 = vmatprep.mubr.f32.mxu0 %v11884_v56  ;;  %v6240_v56 = vld [vmem:[%s10056_s6 + $0x91] sm:$0xff] }
 0x1d1   : > { %7707 = vmatmul.mubr.f32.gmra.mrb[28].mxu0 %v10601_v22  ;;  %v6268_v22 = vld [vmem:[%s11733_s1 + $0x3a0] sm:$0xff] }
 0x1d2   : > { %7709 = vmatprep.mubr.f32.mxu0 %v10854_v14  ;;  %v8904_v5 = vpack.c.bf16 %v6269_v4, %v6268_v22  ;;  %v6323_v22 = vld [vmem:[%s11733_s1 + $0x458] sm:$0xff]  ;;  %v3178_v4 = vld [vmem:[#allocation3 + $0xd0] sm:$0xff] }
 0x1d5   : > { %7710 = vmatmul.mubr.f32.gmra.mrb[30].mxu0 %v10859_v60 }
 0x1d6   : > { %7744 = vmatprep.mubr.f32.mxu0 %v10286_v28  ;;  %v6270_v28 = vld [vmem:[%s11733_s1 + $0x3b0] sm:$0xff] }
 0x1d9   : > { %7745 = vmatmul.mubr.f32.vlgmr.msra.gmra.mrb[0].mxu0 %v10297_v33  ;;  %v8908_v33 = vpack.c.bf16 %v6271_v6, %v6270_v28  ;;  %v6241_v28 = vld [vmem:[%s10056_s6 + $0x99] sm:$0xff]  ;;  %v6242_v6 = vld [vmem:[%s10056_s6 + $0xa9] sm:$0xff] }
 0x1da   : > { %8899 = vmatpush3.bf16.msra.mxu0 %v8896_v36  ;;  %7747 = vmatprep.mubr.f32.mxu0 %v10300_v34  ;;  %v6272_v34 = vld [vmem:[%s11733_s1 + $0x3c0] sm:$0xff]  ;;  %v6318_v36 = vld [vmem:[%s11733_s1 + $0x430] sm:$0xff] }
 0x1db   : > { %8901 = vmatprep.subr.bf16.mxu0 %v8900_v2  ;;  %v8940_v45 = vpack.c.bf16 %v6319_v12, %v6318_v36  ;;  %v6292_v36 = vld [vmem:[%s10056_s6 + $0xc2] sm:$0xff]  ;;  %v6294_v12 = vld [vmem:[%s10056_s6 + $0xda] sm:$0xff] }
 0x1dd   : > { %7748 = vmatmul.mubr.f32.gmra.mrb[2].mxu0 %v10311_v42  ;;  %v8912_v42 = vpack.c.bf16 %v6273_v8, %v6272_v34  ;;  %v6324_v8 = vld [vmem:[%s11733_s1 + $0x460] sm:$0xff] }
 0x1de   : > { %7750 = vmatprep.mubr.f32.mxu0 %v10314_v43  ;;  %8903 = vmatpush3.bf16.msra.mxu0 %v8900_v2  ;;  %v6274_v43 = vld [vmem:[%s11733_s1 + $0x3d0] sm:$0xff]  ;;  %v8976_v2 = vpack.c.bf16 %v3177_v18, %v3176_v51  ;;  %v6303_v51 = vld [vmem:[%s10056_s6 + $0x142] sm:$0xff] }
 0x1df   : > { %8905 = vmatprep.subr.bf16.mxu0 %v8904_v5  ;;  %v6304_v18 = vld [vmem:[%s10056_s6 + $0x152] sm:$0xff] }
 0x1e1   : > { %7751 = vmatmul.mubr.f32.gmra.mrb[4].mxu0 %v10325_v49  ;;  %v8916_v49 = vpack.c.bf16 %v6275_v10, %v6274_v43  ;;  %v6243_v43 = vld [vmem:[%s10056_s6 + $0xb1] sm:$0xff]  ;;  %v6244_v10 = vld [vmem:[%s10056_s6 + $0xc1] sm:$0xff] }
 0x1e2   : > { %7753 = vmatprep.mubr.f32.mxu0 %v10328_v52  ;;  %8907 = vmatpush3.bf16.msra.mxu0 %v8904_v5  ;;  %v6276_v52 = vld [vmem:[%s11733_s1 + $0x3e0] sm:$0xff]  ;;  %v3179_v5 = vld [vmem:[#allocation3 + $0xd8] sm:$0xff] }
 0x1e3   : > { %8909 = vmatprep.subr.bf16.mxu0 %v8908_v33  ;;  %v8980_v34 = vpack.c.bf16 %v3179_v5, %v3178_v4  ;;  %v3181_v4 = vld [vmem:[#allocation3 + $0xe8] sm:$0xff] }
 0x1e5   : > { %7754 = vmatmul.mubr.f32.gmra.mrb[6].mxu0 %v10339_v58  ;;  %v8920_v58 = vpack.c.bf16 %v6277_v11, %v6276_v52  ;;  %v6326_v52 = vld [vmem:[%s11733_s1 + $0x470] sm:$0xff]  ;;  %v6327_v11 = vld [vmem:[%s11733_s1 + $0x478] sm:$0xff] }
 0x1e6   : > { %7756 = vmatprep.mubr.f32.mxu0 %v10342_v59  ;;  %8911 = vmatpush3.bf16.msra.mxu0 %v8908_v33  ;;  %v6278_v59 = vld [vmem:[%s11733_s1 + $0x3f0] sm:$0xff]  ;;  %v8948_v33 = vpack.c.bf16 %v6323_v22, %v6322_v1  ;;  %v6310_v1 = vld [vmem:[%s10056_s6 + $0x19a] sm:$0xff] }
 0x1e7   : > { %8913 = vmatprep.subr.bf16.mxu0 %v8912_v42  ;;  %v3180_v22 = vld [vmem:[#allocation3 + $0xe0] sm:$0xff] }
 0x1e8   : > { %v8984_v5 = vpack.c.bf16 %v3181_v4, %v3180_v22 }
 0x1e9   : > { %7757 = vmatmul.mubr.f32.gmra.mrb[8].mxu0 %v10353_v3  ;;  %v8924_v3 = vpack.c.bf16 %v6279_v15, %v6278_v59  ;;  %v6246_v59 = vld [vmem:[%s10056_s6 + $0xd9] sm:$0xff]  ;;  %v8956_v15 = vpack.c.bf16 %v6327_v11, %v6326_v52  ;;  %v3123_v11 = vld [vmem:[#allocation3 + $0x20] sm:$0xff] }
 0x1ea   : > { %7759 = vmatprep.mubr.f32.mxu0 %v10356_v19  ;;  %8915 = vmatpush3.bf16.msra.mxu0 %v8912_v42  ;;  %v6312_v19 = vld [vmem:[%s11733_s1 + $0x400] sm:$0xff]  ;;  %v6325_v42 = vld [vmem:[%s11733_s1 + $0x468] sm:$0xff] }
 0x1eb   : > { %8917 = vmatprep.subr.bf16.mxu0 %v8916_v49 }
 0x1ed   : > { %7760 = vmatmul.mubr.f32.gmra.mrb[10].mxu0 %v10367_v24  ;;  %v8928_v24 = vpack.c.bf16 %v6313_v16, %v6312_v19  ;;  %v6248_v19 = vld [vmem:[%s10056_s6 + $0xf1] sm:$0xff]  ;;  %v6249_v16 = vld [vmem:[%s10056_s6 + $0xf9] sm:$0xff] }
 0x1ee   : > { %7762 = vmatprep.mubr.f32.mxu0 %v10370_v25  ;;  %8919 = vmatpush3.bf16.msra.mxu0 %v8916_v49  ;;  %v6214_v25 = vld [vmem:[%s10056_s6 + $0x198] sm:$0xff]  ;;  %v8952_v49 = vpack.c.bf16 %v6325_v42, %v6324_v8  ;;  %v3119_v8 = vld [vmem:[#allocation3] sm:$0xff] }
 0x1ef   : > { %8921 = vmatprep.subr.bf16.mxu0 %v8920_v58  ;;  %v3120_v42 = vld [vmem:[#allocation3 + $0x8] sm:$0xff] }
 0x1f1   : > { %7763 = vmatmul.mubr.f32.gmra.mrb[12].mxu0 %v10375_v29  ;;  %v6215_v29 = vld [vmem:[%s10056_s6 + $0x1a0] sm:$0xff] }
 0x1f2   : > { %7765 = vmatprep.mubr.f32.mxu0 %v10378_v30  ;;  %8923 = vmatpush3.bf16.msra.mxu0 %v8920_v58  ;;  %v6232_v30 = vld [vmem:[%s10056_s6 + $0x31] sm:$0xff]  ;;  %v6245_v58 = vld [vmem:[%s10056_s6 + $0xc9] sm:$0xff] }
 0x1f3   : > { %8925 = vmatprep.subr.bf16.mxu0 %v8924_v3 }
 0x1f5   : > { %7766 = vmatmul.mubr.f32.gmra.mrb[14].mxu0 %v10383_v32  ;;  %v6314_v32 = vld [vmem:[%s11733_s1 + $0x410] sm:$0xff] }
 0x1f6   : > { %7768 = vmatprep.mubr.f32.mxu0 %v10386_v37  ;;  %8927 = vmatpush3.bf16.msra.mxu0 %v8924_v3  ;;  %v6315_v37 = vld [vmem:[%s11733_s1 + $0x418] sm:$0xff]  ;;  %v6247_v3 = vld [vmem:[%s10056_s6 + $0xe1] sm:$0xff] }
 0x1f7   : > { %8929 = vmatprep.subr.bf16.mxu0 %v8928_v24 }
 0x1f9   : > { %7769 = vmatmul.mubr.f32.gmra.mrb[16].mxu0 %v10391_v38  ;;  %v3168_v38 = vld [vmem:[#allocation3 + $0x80] sm:$0xff] }
 0x1fa   : > { %7771 = vmatprep.mubr.f32.mxu0 %v10394_v39  ;;  %v3169_v39 = vld [vmem:[#allocation3 + $0x88] sm:$0xff] }
 0x1fd   : > { %7772 = vmatmul.mubr.f32.gmra.mrb[18].mxu0 %v10399_v44  ;;  %v3170_v44 = vld [vmem:[#allocation3 + $0x90] sm:$0xff] }
 0x1fe   : > { %7774 = vmatprep.mubr.f32.mxu0 %v10402_v47  ;;  %v6233_v47 = vld [vmem:[%s10056_s6 + $0x39] sm:$0xff] }
 0x201   : > { %7775 = vmatmul.mubr.f32.gmra.mrb[20].mxu0 %v10407_v48  ;;  %v8960_v48 = vpack.c.bf16 %v3169_v39, %v3168_v38  ;;  %v6256_v38 = vld [vmem:[%s10056_s6 + $0x151] sm:$0xff]  ;;  %v6257_v39 = vld [vmem:[%s10056_s6 + $0x159] sm:$0xff] }
 0x202   : > { %7777 = vmatprep.mubr.f32.mxu0 %v10410_v53  ;;  %v3171_v53 = vld [vmem:[#allocation3 + $0x98] sm:$0xff] }
 0x203   : > { %8961 = vmatprep.subr.bf16.mxu1 %v8960_v48 }
 0x204   : > { %8963 = vmatpush3.bf16.msra.mxu1 %v8960_v48  ;;  %v6262_v48 = vld [vmem:[%s10056_s6 + $0x199] sm:$0xff] }
 0x205   : > { %7778 = vmatmul.mubr.f32.gmra.mrb[22].mxu0 %v10415_v54  ;;  %v6234_v54 = vld [vmem:[%s10056_s6 + $0x49] sm:$0xff] }
 0x206   : > { %7780 = vmatprep.mubr.f32.mxu0 %v10418_v57  ;;  %v8932_v57 = vpack.c.bf16 %v6315_v37, %v6314_v32  ;;  %v6254_v32 = vld [vmem:[%s10056_s6 + $0x139] sm:$0xff]  ;;  %v6255_v37 = vld [vmem:[%s10056_s6 + $0x141] sm:$0xff] }
 0x209   : > { %7781 = vmatmul.mubr.f32.gmra.mrb[24].mxu0 %v10423_v62  ;;  %v6316_v62 = vld [vmem:[%s11733_s1 + $0x420] sm:$0xff] }
 0x20a   : > { %7783 = vmatprep.mubr.f32.mxu0 %v10426_v63  ;;  %v8964_v63 = vpack.c.bf16 %v3171_v53, %v3170_v44  ;;  %v6258_v44 = vld [vmem:[%s10056_s6 + $0x169] sm:$0xff]  ;;  %v6263_v53 = vld [vmem:[%s10056_s6 + $0x1a1] sm:$0xff] }
 0x20c   : > { %8965 = vmatprep.subr.bf16.mxu1 %v8964_v63 }
 0x20d   : > { %7784 = vmatmul.mubr.f32.gmra.mrb[26].mxu0 %v10431_v0  ;;  %v6317_v0 = vld [vmem:[%s11733_s1 + $0x428] sm:$0xff]  ;;  %8967 = vmatpush3.bf16.msra.mxu1 %v8964_v63  ;;  %v6283_v63 = vld [vmem:[%s10056_s6 + $0x52] sm:$0xff] }
 0x20e   : > { %7786 = vmatprep.mubr.f32.mxu0 %v10682_v23  ;;  %v3172_v23 = vld [vmem:[#allocation3 + $0xa0] sm:$0xff]  ;;  %v8936_v35 = vpack.c.bf16 %v6317_v0, %v6316_v62  ;;  %v6286_v0 = vld [vmem:[%s10056_s6 + $0x7a] sm:$0xff] }
 0x20f   : > { %v6282_v62 = vld [vmem:[%s10056_s6 + $0x4a] sm:$0xff] }
 0x211   : > { %7787 = vmatmul.mubr.f32.gmra.mrb[28].mxu0 %v10687_v13  ;;  %v3173_v13 = vld [vmem:[#allocation3 + $0xa8] sm:$0xff] }
 0x212   : > { %7789 = vmatprep.mubr.f32.mxu0 %v6214_v25  ;;  %v8968_v26 = vpack.c.bf16 %v3173_v13, %v3172_v23  ;;  %v6251_v25 = vld [vmem:[%s10056_s6 + $0x111] sm:$0xff]  ;;  %v6287_v23 = vld [vmem:[%s10056_s6 + $0x82] sm:$0xff] }
 0x213   : > { %v6288_v13 = vld [vmem:[%s10056_s6 + $0x92] sm:$0xff] }
 0x214   : > { %8969 = vmatprep.subr.bf16.mxu1 %v8968_v26 }
 0x215   : > { %7790 = vmatmul.mubr.f32.gmra.mrb[30].mxu0 %v6215_v29  ;;  %8971 = vmatpush3.bf16.msra.mxu1 %v8968_v26  ;;  %v6252_v29 = vld [vmem:[%s10056_s6 + $0x121] sm:$0xff]  ;;  %v6293_v26 = vld [vmem:[%s10056_s6 + $0xca] sm:$0xff] }
 0x216   : > { %7824 = vmatprep.mubr.f32.mxu0 %v6232_v30  ;;  %8973 = vmatprep.subr.bf16.mxu1 %v8972_v21  ;;  %v6253_v30 = vld [vmem:[%s10056_s6 + $0x129] sm:$0xff] }
 0x219   : > { %7825 = vmatmul.mubr.f32.vlgmr.msra.gmra.mrb[0].mxu0 %v6233_v47  ;;  %8975 = vmatpush3.bf16.msra.mxu1 %v8972_v21  ;;  %v6259_v47 = vld [vmem:[%s10056_s6 + $0x171] sm:$0xff] }
 0x21a   : > { %8931 = vmatpush3.bf16.msra.mxu0 %v8928_v24  ;;  %7827 = vmatprep.mubr.f32.mxu0 %v6234_v54  ;;  %v6250_v24 = vld [vmem:[%s10056_s6 + $0x109] sm:$0xff]  ;;  %v6280_v54 = vld [vmem:[%s10056_s6 + $0x32] sm:$0xff] }
 0x21b   : > { %8933 = vmatprep.subr.bf16.mxu0 %v8932_v57  ;;  %8977 = vmatprep.subr.bf16.mxu1 %v8976_v2  ;;  %v6301_v21 = vld [vmem:[%s10056_s6 + $0x12a] sm:$0xff] }
 0x21d   : > { %7828 = vmatmul.mubr.f32.gmra.mrb[2].mxu0 %v6235_v31  ;;  %8979 = vmatpush3.bf16.msra.mxu1 %v8976_v2  ;;  %v6289_v31 = vld [vmem:[%s10056_s6 + $0x9a] sm:$0xff]  ;;  %v6311_v2 = vld [vmem:[%s10056_s6 + $0x1a2] sm:$0xff] }
 0x21e   : > { %7830 = vmatprep.mubr.f32.mxu0 %v6236_v20  ;;  %8935 = vmatpush3.bf16.msra.mxu0 %v8932_v57  ;;  %v6281_v57 = vld [vmem:[%s10056_s6 + $0x3a] sm:$0xff]  ;;  %v6290_v20 = vld [vmem:[%s10056_s6 + $0xaa] sm:$0xff] }
 0x21f   : > { %8937 = vmatprep.subr.bf16.mxu0 %v8936_v35  ;;  %8981 = vmatprep.subr.bf16.mxu1 %v8980_v34 }
 0x221   : > { %7831 = vmatmul.mubr.f32.gmra.mrb[4].mxu0 %v6237_v27  ;;  %8983 = vmatpush3.bf16.msra.mxu1 %v8980_v34  ;;  %v6297_v27 = vld [vmem:[%s10056_s6 + $0xfa] sm:$0xff] }
 0x222   : > { %7833 = vmatprep.mubr.f32.mxu0 %v6238_v17  ;;  %8939 = vmatpush3.bf16.msra.mxu0 %v8936_v35  ;;  %v6291_v35 = vld [vmem:[%s10056_s6 + $0xb2] sm:$0xff]  ;;  %v6298_v17 = vld [vmem:[%s10056_s6 + $0x10a] sm:$0xff] }
 0x223   : > { %8941 = vmatprep.subr.bf16.mxu0 %v8940_v45  ;;  %8985 = vmatprep.subr.bf16.mxu1 %v8984_v5 }
 0x225   : > { %7834 = vmatmul.mubr.f32.gmra.mrb[6].mxu0 %v6239_v55  ;;  %v6305_v55 = vld [vmem:[%s10056_s6 + $0x15a] sm:$0xff]  ;;  %8987 = vmatpush3.bf16.msra.mxu1 %v8984_v5 }
 0x226   : > { %7836 = vmatprep.mubr.f32.mxu0 %v6240_v56  ;;  %8943 = vmatpush3.bf16.msra.mxu0 %v8940_v45  ;;  %v6299_v45 = vld [vmem:[%s10056_s6 + $0x112] sm:$0xff]  ;;  %v6306_v56 = vld [vmem:[%s10056_s6 + $0x16a] sm:$0xff] }
 0x227   : > { %8945 = vmatprep.subr.bf16.mxu0 %v8944_v61 }
 0x229   : > { %7837 = vmatmul.mubr.f32.gmra.mrb[8].mxu0 %v6241_v28  ;;  %v9916_v28 = vmov 0.0  }
 0x22a   : > { %7839 = vmatprep.mubr.f32.mxu0 %v6242_v6  ;;  %8947 = vmatpush3.bf16.msra.mxu0 %v8944_v61  ;;  %v6307_v61 = vld [vmem:[%s10056_s6 + $0x172] sm:$0xff]  ;;  %3004 = vst [vmem:[#allocation2 + $0x20] sm:$0xff] %v9916_v28  ;;  %3005 = vst [vmem:[#allocation2 + $0x28] sm:$0x3] %v9916_v28 }
 0x22b   : > { %8949 = vmatprep.subr.bf16.mxu0 %v8948_v33  ;;  %3000 = vst [vmem:[#allocation2] sm:$0xff] %v9916_v28  ;;  %3001 = vst [vmem:[#allocation2 + $0x8] sm:$0xff] %v9916_v28 }
 0x22c   : > { %3002 = vst [vmem:[#allocation2 + $0x10] sm:$0x3] %v9916_v28  ;;  %3003 = vst [vmem:[#allocation2 + $0x18] sm:$0xff] %v9916_v28 }
 0x22d   : > { %7840 = vmatmul.mubr.f32.gmra.mrb[10].mxu0 %v6243_v43  ;;  %3006 = vst [vmem:[#allocation2 + $0x30] sm:$0xff] %v9916_v28  ;;  %3007 = vst [vmem:[#allocation2 + $0x38] sm:$0xff] %v9916_v28  ;;  %v8992_v43 = vpack.c.bf16 %v3120_v42, %v3119_v8 }
 0x22e   : > { %7842 = vmatprep.mubr.f32.mxu0 %v6244_v10  ;;  %8951 = vmatpush3.bf16.msra.mxu0 %v8948_v33  ;;  %3008 = vst [vmem:[#allocation2 + $0x40] sm:$0x3] %v9916_v28  ;;  %3009 = vst [vmem:[#allocation2 + $0x48] sm:$0xff] %v9916_v28  ;;  %v3121_v10 = vld [vmem:[#allocation3 + $0x10] sm:$0xff] }
 0x22f   : > { %8953 = vmatprep.subr.bf16.mxu0 %v8952_v49  ;;  %3010 = vst [vmem:[#allocation2 + $0x50] sm:$0xff] %v9916_v28  ;;  %3011 = vst [vmem:[#allocation2 + $0x58] sm:$0x3] %v9916_v28 }
 0x230   : > { %3012 = vst [vmem:[#allocation2 + $0x60] sm:$0xff] %v9916_v28  ;;  %3013 = vst [vmem:[#allocation2 + $0x68] sm:$0xff] %v9916_v28 }
 0x231   : > { %7843 = vmatmul.mubr.f32.gmra.mrb[12].mxu0 %v6245_v58  ;;  %3014 = vst [vmem:[#allocation2 + $0x70] sm:$0x3] %v9916_v28  ;;  %3015 = vst [vmem:[#allocation2 + $0x78] sm:$0xff] %v9916_v28  ;;  %v3124_v58 = vld [vmem:[#allocation3 + $0x28] sm:$0xff] }
 0x232   : > { %7845 = vmatprep.mubr.f32.mxu0 %v6246_v59  ;;  %8955 = vmatpush3.bf16.msra.mxu0 %v8952_v49  ;;  %3016 = vst [vmem:[#allocation2 + $0x80] sm:$0xff] %v9916_v28  ;;  %3017 = vst [vmem:[#allocation2 + $0x88] sm:$0x3] %v9916_v28  ;;  %v3135_v33 = vld [vmem:[#allocation2 + $0x1] sm:$0xff]  ;;  %v9000_v59 = vpack.c.bf16 %v3124_v58, %v3123_v11 }
 0x233   : > { %8957 = vmatprep.subr.bf16.mxu0 %v8956_v15  ;;  %3018 = vst [vmem:[#allocation2 + $0x90] sm:$0xff] %v9916_v28  ;;  %3019 = vst [vmem:[#allocation2 + $0x98] sm:$0xff] %v9916_v28  ;;  %7984 = vmatprep.mubr.f32.mxu1 %v3135_v33  ;;  %v3136_v34 = vld [vmem:[#allocation2 + $0x9] sm:$0xff] }
 0x234   : > { %3020 = vst [vmem:[#allocation2 + $0xa0] sm:$0x3] %v9916_v28  ;;  %3021 = vst [vmem:[#allocation2 + $0xa8] sm:$0xff] %v9916_v28  ;;  %v3122_v49 = vld [vmem:[#allocation3 + $0x18] sm:$0xff] }
 0x235   : > { %7846 = vmatmul.mubr.f32.gmra.mrb[14].mxu0 %v6247_v3  ;;  %3022 = vst [vmem:[#allocation2 + $0xb0] sm:$0xff] %v9916_v28  ;;  %3023 = vst [vmem:[#allocation2 + $0xb8] sm:$0x3] %v9916_v28  ;;  %v8996_v52 = vpack.c.bf16 %v3122_v49, %v3121_v10  ;;  %v3126_v3 = vld [vmem:[#allocation3 + $0x38] sm:$0xff] }
 0x236   : > { %7848 = vmatprep.mubr.f32.mxu0 %v6248_v19  ;;  %8959 = vmatpush3.bf16.msra.mxu0 %v8956_v15  ;;  %3024 = vst [vmem:[#allocation2 + $0xc0] sm:$0xff] %v9916_v28  ;;  %3025 = vst [vmem:[#allocation2 + $0xc8] sm:$0xff] %v9916_v28  ;;  %v3125_v15 = vld [vmem:[#allocation3 + $0x30] sm:$0xff] }
 0x237   : > { %3026 = vst [vmem:[#allocation2 + $0xd0] sm:$0x3] %v9916_v28  ;;  %3027 = vst [vmem:[#allocation2 + $0xd8] sm:$0xff] %v9916_v28  ;;  %v9004_v19 = vpack.c.bf16 %v3126_v3, %v3125_v15 }
 0x238   : > { %3028 = vst [vmem:[#allocation2 + $0xe0] sm:$0xff] %v9916_v28  ;;  %3029 = vst [vmem:[#allocation2 + $0xe8] sm:$0x3] %v9916_v28 }
 0x239   : > { %7849 = vmatmul.mubr.f32.gmra.mrb[16].mxu0 %v6249_v16  ;;  %3030 = vst [vmem:[#allocation2 + $0xf0] sm:$0xff] %v9916_v28  ;;  %3031 = vst [vmem:[#allocation2 + $0xf8] sm:$0xff] %v9916_v28  ;;  %v3127_v16 = vld [vmem:[#allocation3 + $0x40] sm:$0xff] }
 0x23a   : > { %7851 = vmatprep.mubr.f32.mxu0 %v6250_v24  ;;  %3032 = vst [vmem:[#allocation2 + $0x100] sm:$0x3] %v9916_v28  ;;  %3033 = vst [vmem:[#allocation2 + $0x108] sm:$0xff] %v9916_v28  ;;  %v3128_v24 = vld [vmem:[#allocation3 + $0x48] sm:$0xff] }
 0x23b   : > { %3034 = vst [vmem:[#allocation2 + $0x110] sm:$0xff] %v9916_v28  ;;  %3035 = vst [vmem:[#allocation2 + $0x118] sm:$0x3] %v9916_v28 }
 0x23c   : > { %3036 = vst [vmem:[#allocation2 + $0x120] sm:$0xff] %v9916_v28  ;;  %3037 = vst [vmem:[#allocation2 + $0x128] sm:$0xff] %v9916_v28 }
 0x23d   : > { %7852 = vmatmul.mubr.f32.gmra.mrb[18].mxu0 %v6251_v25  ;;  %3038 = vst [vmem:[#allocation2 + $0x130] sm:$0x3] %v9916_v28  ;;  %3039 = vst [vmem:[#allocation2 + $0x138] sm:$0xff] %v9916_v28  ;;  %v9008_v25 = vpack.c.bf16 %v3128_v24, %v3127_v16 }
 0x23e   : > { %7854 = vmatprep.mubr.f32.mxu0 %v6252_v29  ;;  %3040 = vst [vmem:[#allocation2 + $0x140] sm:$0xff] %v9916_v28  ;;  %3041 = vst [vmem:[#allocation2 + $0x148] sm:$0x3] %v9916_v28  ;;  %v3129_v29 = vld [vmem:[#allocation3 + $0x50] sm:$0xff] }
 0x23f   : > { %3042 = vst [vmem:[#allocation2 + $0x150] sm:$0xff] %v9916_v28  ;;  %3043 = vst [vmem:[#allocation2 + $0x158] sm:$0xff] %v9916_v28 }
 0x240   : > { %3044 = vst [vmem:[#allocation2 + $0x160] sm:$0x3] %v9916_v28  ;;  %3045 = vst [vmem:[#allocation2 + $0x168] sm:$0xff] %v9916_v28 }
 0x241   : > { %7855 = vmatmul.mubr.f32.gmra.mrb[20].mxu0 %v6253_v30  ;;  %3046 = vst [vmem:[#allocation2 + $0x170] sm:$0xff] %v9916_v28  ;;  %3047 = vst [vmem:[#allocation2 + $0x178] sm:$0x3] %v9916_v28  ;;  %v3130_v30 = vld [vmem:[#allocation3 + $0x58] sm:$0xff] }
 0x242   : > { %7857 = vmatprep.mubr.f32.mxu0 %v6254_v32  ;;  %3048 = vst [vmem:[#allocation2 + $0x180] sm:$0xff] %v9916_v28  ;;  %3049 = vst [vmem:[#allocation2 + $0x188] sm:$0xff] %v9916_v28  ;;  %v9012_v32 = vpack.c.bf16 %v3130_v30, %v3129_v29 }
 0x243   : > { %3050 = vst [vmem:[#allocation2 + $0x190] sm:$0x3] %v9916_v28  ;;  %3051 = vst [vmem:[#allocation2 + $0x198] sm:$0xff] %v9916_v28 }
 0x244   : > { %3052 = vst [vmem:[#allocation2 + $0x1a0] sm:$0xff] %v9916_v28  ;;  %3053 = vst [vmem:[#allocation2 + $0x1a8] sm:$0x3] %v9916_v28 }
 0x245   : > { %7858 = vmatmul.mubr.f32.gmra.mrb[22].mxu0 %v6255_v37  ;;  %v3131_v37 = vld [vmem:[#allocation3 + $0x60] sm:$0xff] }
 0x246   : > { %7860 = vmatprep.mubr.f32.mxu0 %v6256_v38  ;;  %v3132_v38 = vld [vmem:[#allocation3 + $0x68] sm:$0xff] }
 0x249   : > { %7861 = vmatmul.mubr.f32.gmra.mrb[24].mxu0 %v6257_v39  ;;  %v9016_v39 = vpack.c.bf16 %v3132_v38, %v3131_v37 }
 0x24a   : > { %7863 = vmatprep.mubr.f32.mxu0 %v6258_v44  ;;  %v3133_v44 = vld [vmem:[#allocation3 + $0x70] sm:$0xff] }
 0x24d   : > { %7864 = vmatmul.mubr.f32.gmra.mrb[26].mxu0 %v6259_v47  ;;  %v3134_v47 = vld [vmem:[#allocation3 + $0x78] sm:$0xff] }
 0x24e   : > { %7866 = vmatprep.mubr.f32.mxu0 %v10768_v7  ;;  %v6284_v7 = vld [vmem:[%s10056_s6 + $0x62] sm:$0xff] }
 0x251   : > { %7867 = vmatmul.mubr.f32.gmra.mrb[28].mxu0 %v10773_v9  ;;  %v6285_v9 = vld [vmem:[%s10056_s6 + $0x6a] sm:$0xff] }
 0x252   : > { %7869 = vmatprep.mubr.f32.mxu0 %v6262_v48  ;;  %v9020_v48 = vpack.c.bf16 %v3134_v47, %v3133_v44 }
 0x255   : > { %7870 = vmatmul.mubr.f32.gmra.mrb[30].mxu0 %v6263_v53  ;;  %v3667_v53 = vld [vmem:[#allocation3 + $0x100] sm:$0xff] }
 0x256   : > { %7904 = vmatprep.mubr.f32.mxu0 %v6280_v54  ;;  %v3668_v54 = vld [vmem:[#allocation3 + $0x108] sm:$0xff] }
 0x259   : > { %7905 = vmatmul.mubr.f32.vlgmr.msra.gmra.mrb[0].mxu0 %v6281_v57  ;;  %v11102_v57 = vpack.c.bf16 %v3668_v54, %v3667_v53 }
 0x25a   : > { %7907 = vmatprep.mubr.f32.mxu0 %v6282_v62  ;;  %v11108_v62 = vld [vmem:[%s11734_s2] ss:$0 sm:$0xff] }
 0x25d   : > { %7908 = vmatmul.mubr.f32.gmra.mrb[2].mxu0 %v6283_v63 }
 0x25e   : > { %7910 = vmatprep.mubr.f32.mxu0 %v6284_v7 }
 0x261   : > { %7911 = vmatmul.mubr.f32.gmra.mrb[4].mxu0 %v6285_v9 }
 0x262   : > { %7913 = vmatprep.mubr.f32.mxu0 %v6286_v0 }
 0x265   : > { %7914 = vmatmul.mubr.f32.gmra.mrb[6].mxu0 %v6287_v23 }
 0x266   : > { %7916 = vmatprep.mubr.f32.mxu0 %v6288_v13 }
 0x269   : > { %7917 = vmatmul.mubr.f32.gmra.mrb[8].mxu0 %v6289_v31 }
 0x26a   : > { %7919 = vmatprep.mubr.f32.mxu0 %v6290_v20 }
 0x26d   : > { %7920 = vmatmul.mubr.f32.gmra.mrb[10].mxu0 %v6291_v35 }
 0x26e   : > { %7922 = vmatprep.mubr.f32.mxu0 %v6292_v36 }
 0x271   : > { %7923 = vmatmul.mubr.f32.gmra.mrb[12].mxu0 %v6293_v26 }
 0x272   : > { %7925 = vmatprep.mubr.f32.mxu0 %v6294_v12 }
 0x275   : > { %7926 = vmatmul.mubr.f32.gmra.mrb[14].mxu0 %v6295_v40 }
 0x276   : > { %7928 = vmatprep.mubr.f32.mxu0 %v6296_v41 }
 0x279   : > { %7929 = vmatmul.mubr.f32.gmra.mrb[16].mxu0 %v6297_v27 }
 0x27a   : > { %7931 = vmatprep.mubr.f32.mxu0 %v6298_v17 }
 0x27d   : > { %7932 = vmatmul.mubr.f32.gmra.mrb[18].mxu0 %v6299_v45 }
 0x27e   : > { %7934 = vmatprep.mubr.f32.mxu0 %v6300_v46 }
 0x281   : > { %7935 = vmatmul.mubr.f32.gmra.mrb[20].mxu0 %v6301_v21 }
 0x282   : > { %7937 = vmatprep.mubr.f32.mxu0 %v6302_v50 }
 0x285   : > { %7938 = vmatmul.mubr.f32.gmra.mrb[22].mxu0 %v6303_v51 }
 0x286   : > { %7940 = vmatprep.mubr.f32.mxu0 %v6304_v18 }
 0x289   : > { %7941 = vmatmul.mubr.f32.gmra.mrb[24].mxu0 %v6305_v55 }
 0x28a   : > { %7943 = vmatprep.mubr.f32.mxu0 %v6306_v56 }
 0x28d   : > { %7944 = vmatmul.mubr.f32.gmra.mrb[26].mxu0 %v6307_v61 }
 0x28e   : > { %7946 = vmatprep.mubr.f32.mxu0 %v10854_v14  ;;  %v3182_v14 = vld [vmem:[#allocation3 + $0xf0] sm:$0xff] }
 0x291   : > { %7947 = vmatmul.mubr.f32.gmra.mrb[28].mxu0 %v10859_v60  ;;  %v3183_v60 = vld [vmem:[#allocation3 + $0xf8] sm:$0xff] }
 0x292   : > { %7949 = vmatprep.mubr.f32.mxu0 %v6310_v1  ;;  %v8988_v6 = vpack.c.bf16 %v3183_v60, %v3182_v14 }
 0x294   : > { %8989 = vmatprep.subr.bf16.mxu1 %v8988_v6 }
 0x295   : > { %7950 = vmatmul.mubr.f32.gmra.mrb[30].mxu0 %v6311_v2  ;;  %8991 = vmatpush3.bf16.msra.mxu1 %v8988_v6 }
 0x296   : > { %8993 = vmatprep.subr.bf16.mxu1 %v8992_v43 }
 0x298   : > { %7985 = vmatmul.mubr.f32.vlgmr.msra.gmra.mrb[0].mxu1 %v3136_v34 }
 0x299   : > { %8995 = vmatpush3.bf16.msra.mxu1 %v8992_v43 }
 0x29a   : > { %8997 = vmatprep.subr.bf16.mxu1 %v8996_v52 }
 0x29d   : > { %8999 = vmatpush3.bf16.msra.mxu1 %v8996_v52 }
 0x29e   : > { %9001 = vmatprep.subr.bf16.mxu1 %v9000_v59 }
 0x2a1   : > { %9003 = vmatpush3.bf16.msra.mxu1 %v9000_v59 }
 0x2a2   : > { %9005 = vmatprep.subr.bf16.mxu1 %v9004_v19 }
 0x2a5   : > { %9007 = vmatpush3.bf16.msra.mxu1 %v9004_v19 }
 0x2a6   : > { %9009 = vmatprep.subr.bf16.mxu1 %v9008_v25 }
 0x2a9   : > { %9011 = vmatpush3.bf16.msra.mxu1 %v9008_v25 }
 0x2aa   : > { %9013 = vmatprep.subr.bf16.mxu1 %v9012_v32 }
 0x2ad   : > { %9015 = vmatpush3.bf16.msra.mxu1 %v9012_v32 }
 0x2ae   : > { %9017 = vmatprep.subr.bf16.mxu1 %v9016_v39 }
 0x2b1   : > { %9019 = vmatpush3.bf16.msra.mxu1 %v9016_v39 }
 0x2b2   : > { %9021 = vmatprep.subr.bf16.mxu1 %v9020_v48 }
 0x2b5   : > { %9023 = vmatpush3.bf16.msra.mxu1 %v9020_v48 }
 0x2b6   : > { %9025 = vmatprep.subr.bf16.mxu1 %v11102_v57 }
 0x32c   : > { %v7906_v63 = vpop.f32.mrb[0].mxu0 }
 0x32d   : > { %v2937_v7 = vadd.f32 %v7906_v63, %v11108_v62  ;;  %v2738_v9 = vpop.f32.mrb[1].mxu0 }
 0x32e   : > { %v2936_v0 = vadd.f32 %v11108_v62, %v2738_v9 }
 0x32f   : > { %v2969_v23 = vmax.f32 %v2937_v7, 0.0 }
 0x330   : > { %v2968_v13 = vmax.f32 %v2936_v0, 0.0  ;;  %v7909_v31 = vpop.f32.mrb[2].mxu0 }
 0x331   : > { %3056 = vst [vmem:[#allocation2 + $0x21] sm:$0xff] %v2969_v23  ;;  %v2939_v20 = vadd.f32 %v7909_v31, %v11108_v62  ;;  %v2748_v35 = vpop.f32.mrb[3].mxu0 }
 0x332   : > { %3055 = vst [vmem:[#allocation2 + $0x19] sm:$0xff] %v2968_v13  ;;  %v2938_v36 = vadd.f32 %v11108_v62, %v2748_v35  ;;  %7987 = vmatprep.mubr.f32.mxu1 %v2968_v13 }
 0x333   : > { %v2971_v26 = vmax.f32 %v2939_v20, 0.0  ;;  %7988 = vmatmul.mubr.f32.gmra.mrb[2].mxu1 %v2969_v23 }
 0x334   : > { %v2970_v12 = vmax.f32 %v2938_v36, 0.0  ;;  %v7912_v40 = vpop.f32.mrb[4].mxu0 }
 0x335   : > { %3058 = vst [vmem:[#allocation2 + $0x39] sm:$0xff] %v2971_v26  ;;  %v2941_v41 = vadd.f32 %v7912_v40, %v11108_v62  ;;  %v2758_v27 = vpop.f32.mrb[5].mxu0 }
 0x336   : > { %3057 = vst [vmem:[#allocation2 + $0x31] sm:$0xff] %v2970_v12  ;;  %v2940_v17 = vadd.f32 %v11108_v62, %v2758_v27  ;;  %7990 = vmatprep.mubr.f32.mxu1 %v2970_v12 }
 0x337   : > { %v2973_v45 = vmax.f32 %v2941_v41, 0.0  ;;  %7991 = vmatmul.mubr.f32.gmra.mrb[4].mxu1 %v2971_v26 }
 0x338   : > { %v2972_v46 = vmax.f32 %v2940_v17, 0.0  ;;  %v7915_v21 = vpop.f32.mrb[6].mxu0 }
 0x339   : > { %3060 = vst [vmem:[#allocation2 + $0x51] sm:$0xff] %v2973_v45  ;;  %v2943_v50 = vadd.f32 %v7915_v21, %v11108_v62  ;;  %v2768_v51 = vpop.f32.mrb[7].mxu0 }
 0x33a   : > { %3059 = vst [vmem:[#allocation2 + $0x49] sm:$0xff] %v2972_v46  ;;  %v2942_v18 = vadd.f32 %v11108_v62, %v2768_v51  ;;  %7993 = vmatprep.mubr.f32.mxu1 %v2972_v46 }
 0x33b   : > { %v2975_v55 = vmax.f32 %v2943_v50, 0.0  ;;  %7994 = vmatmul.mubr.f32.gmra.mrb[6].mxu1 %v2973_v45 }
 0x33c   : > { %v2974_v56 = vmax.f32 %v2942_v18, 0.0  ;;  %v7918_v61 = vpop.f32.mrb[8].mxu0 }
 0x33d   : > { %3062 = vst [vmem:[#allocation2 + $0x69] sm:$0xff] %v2975_v55  ;;  %v2945_v1 = vadd.f32 %v7918_v61, %v11108_v62  ;;  %v2778_v2 = vpop.f32.mrb[9].mxu0 }
 0x33e   : > { %3061 = vst [vmem:[#allocation2 + $0x61] sm:$0xff] %v2974_v56  ;;  %v2944_v22 = vadd.f32 %v11108_v62, %v2778_v2  ;;  %7996 = vmatprep.mubr.f32.mxu1 %v2974_v56 }
 0x33f   : > { %v2977_v4 = vmax.f32 %v2945_v1, 0.0  ;;  %7997 = vmatmul.mubr.f32.gmra.mrb[8].mxu1 %v2975_v55 }
 0x340   : > { %v2976_v5 = vmax.f32 %v2944_v22, 0.0  ;;  %v7921_v14 = vpop.f32.mrb[10].mxu0 }
 0x341   : > { %3064 = vst [vmem:[#allocation2 + $0x81] sm:$0xff] %v2977_v4  ;;  %v2947_v60 = vadd.f32 %v7921_v14, %v11108_v62  ;;  %v2788_v6 = vpop.f32.mrb[11].mxu0 }
 0x342   : > { %3063 = vst [vmem:[#allocation2 + $0x79] sm:$0xff] %v2976_v5  ;;  %v2946_v33 = vadd.f32 %v11108_v62, %v2788_v6  ;;  %7999 = vmatprep.mubr.f32.mxu1 %v2976_v5 }
 0x343   : > { %v2979_v34 = vmax.f32 %v2947_v60, 0.0  ;;  %8000 = vmatmul.mubr.f32.gmra.mrb[10].mxu1 %v2977_v4 }
 0x344   : > { %v11122_v8 = vmax.f32 %v2946_v33, 0.0  ;;  %v7924_v42 = vpop.f32.mrb[12].mxu0  ;;  %v3669_v33 = vld [vmem:[#allocation3 + $0x110] sm:$0xff] }
 0x345   : > { %3066 = vst [vmem:[#allocation2 + $0x99] sm:$0xff] %v2979_v34  ;;  %v2949_v43 = vadd.f32 %v7924_v42, %v11108_v62  ;;  %v2798_v10 = vpop.f32.mrb[13].mxu0 }
 0x346   : > { %3065 = vst [vmem:[#allocation2 + $0x91] sm:$0xff] %v11122_v8  ;;  %v2948_v49 = vadd.f32 %v11108_v62, %v2798_v10  ;;  %8002 = vmatprep.mubr.f32.mxu1 %v11122_v8 }
 0x347   : > { %v11128_v52 = vmax.f32 %v2949_v43, 0.0  ;;  %8003 = vmatmul.mubr.f32.gmra.mrb[12].mxu1 %v2979_v34  ;;  %v3670_v34 = vld [vmem:[#allocation3 + $0x118] sm:$0xff] }
 0x348   : > { %v11130_v11 = vmax.f32 %v2948_v49, 0.0  ;;  %v7927_v58 = vpop.f32.mrb[14].mxu0  ;;  %v9028_v10 = vpack.c.bf16 %v3670_v34, %v3669_v33  ;;  %v3672_v49 = vld [vmem:[#allocation3 + $0x128] sm:$0xff] }
 0x349   : > { %3068 = vst [vmem:[#allocation2 + $0xb1] sm:$0xff] %v11128_v52  ;;  %v2951_v59 = vadd.f32 %v7927_v58, %v11108_v62  ;;  %v2808_v15 = vpop.f32.mrb[15].mxu0  ;;  %v11230_v58 = vld [vmem:[#allocation2 + $0x18] sm:$0xff] }
 0x34a   : > { %3067 = vst [vmem:[#allocation2 + $0xa9] sm:$0xff] %v11130_v11  ;;  %v2950_v3 = vadd.f32 %v11108_v62, %v2808_v15  ;;  %8005 = vmatprep.mubr.f32.mxu1 %v11130_v11  ;;  %v11234_v15 = vld [vmem:[#allocation2 + $0x20] sm:$0xff] }
 0x34b   : > { %v11137_v19 = vmax.f32 %v2951_v59, 0.0  ;;  %8006 = vmatmul.mubr.f32.gmra.mrb[14].mxu1 %v11128_v52 }
 0x34c   : > { %v11140_v16 = vmax.f32 %v2950_v3, 0.0  ;;  %v7930_v24 = vpop.f32.mrb[16].mxu0  ;;  %v3673_v3 = vld [vmem:[#allocation3 + $0x130] sm:$0xff] }
 0x34d   : > { %3070 = vst [vmem:[#allocation2 + $0xc9] sm:$0xff] %v11137_v19  ;;  %v2953_v25 = vadd.f32 %v7930_v24, %v11108_v62  ;;  %v2818_v29 = vpop.f32.mrb[17].mxu0  ;;  %v3674_v24 = vld [vmem:[#allocation3 + $0x138] sm:$0xff] }
 0x34e   : > { %3069 = vst [vmem:[#allocation2 + $0xc1] sm:$0xff] %v11140_v16  ;;  %v2952_v30 = vadd.f32 %v11108_v62, %v2818_v29  ;;  %8008 = vmatprep.mubr.f32.mxu1 %v11140_v16  ;;  %v11240_v29 = vld [vmem:[#allocation2 + $0x38] sm:$0xff] }
 0x34f   : > { %v11147_v32 = vmax.f32 %v2953_v25, 0.0  ;;  %8009 = vmatmul.mubr.f32.gmra.mrb[16].mxu1 %v11137_v19  ;;  %v11237_v25 = vld [vmem:[#allocation2 + $0x30] sm:$0xff] }
 0x350   : > { %v11150_v37 = vmax.f32 %v2952_v30, 0.0  ;;  %v7933_v38 = vpop.f32.mrb[18].mxu0  ;;  %v3675_v30 = vld [vmem:[#allocation3 + $0x140] sm:$0xff] }
 0x351   : > { %3072 = vst [vmem:[#allocation2 + $0xe1] sm:$0xff] %v11147_v32  ;;  %v2955_v39 = vadd.f32 %v7933_v38, %v11108_v62  ;;  %v2828_v44 = vpop.f32.mrb[19].mxu0  ;;  %v3676_v38 = vld [vmem:[#allocation3 + $0x148] sm:$0xff] }
 0x352   : > { %3071 = vst [vmem:[#allocation2 + $0xd9] sm:$0xff] %v11150_v37  ;;  %v2954_v47 = vadd.f32 %v11108_v62, %v2828_v44  ;;  %8011 = vmatprep.mubr.f32.mxu1 %v11150_v37  ;;  %v11246_v44 = vld [vmem:[#allocation2 + $0x50] sm:$0xff] }
 0x353   : > { %v11157_v48 = vmax.f32 %v2955_v39, 0.0  ;;  %8012 = vmatmul.mubr.f32.gmra.mrb[18].mxu1 %v11147_v32  ;;  %v9040_v39 = vpack.c.bf16 %v3676_v38, %v3675_v30 }
 0x354   : > { %v11160_v53 = vmax.f32 %v2954_v47, 0.0  ;;  %v7936_v54 = vpop.f32.mrb[20].mxu0  ;;  %v3677_v47 = vld [vmem:[#allocation3 + $0x150] sm:$0xff] }
 0x355   : > { %3074 = vst [vmem:[#allocation2 + $0xf9] sm:$0xff] %v11157_v48  ;;  %v2957_v63 = vadd.f32 %v7936_v54, %v11108_v62  ;;  %v2838_v7 = vpop.f32.mrb[21].mxu0  ;;  %v3678_v54 = vld [vmem:[#allocation3 + $0x158] sm:$0xff] }
 0x356   : > { %3073 = vst [vmem:[#allocation2 + $0xf1] sm:$0xff] %v11160_v53  ;;  %v2956_v9 = vadd.f32 %v11108_v62, %v2838_v7  ;;  %8014 = vmatprep.mubr.f32.mxu1 %v11160_v53  ;;  %v9044_v7 = vpack.c.bf16 %v3678_v54, %v3677_v47  ;;  %v3634_v47 = vld [vmem:[#allocation2 + $0x2] sm:$0xff] }
 0x357   : > { %v11167_v0 = vmax.f32 %v2957_v63, 0.0  ;;  %8015 = vmatmul.mubr.f32.gmra.mrb[20].mxu1 %v11157_v48  ;;  %v11249_v63 = vld [vmem:[#allocation2 + $0x60] sm:$0xff] }
 0x358   : > { %v11170_v23 = vmax.f32 %v2956_v9, 0.0  ;;  %v7939_v13 = vpop.f32.mrb[22].mxu0  ;;  %v11252_v9 = vld [vmem:[#allocation2 + $0x68] sm:$0xff] }
 0x359   : > { %3076 = vst [vmem:[#allocation2 + $0x111] sm:$0xff] %v11167_v0  ;;  %v2959_v31 = vadd.f32 %v7939_v13, %v11108_v62  ;;  %v2848_v20 = vpop.f32.mrb[23].mxu0  ;;  %v3679_v13 = vld [vmem:[#allocation3 + $0x160] sm:$0xff]  ;;  %v11282_v33 = vld [vmem:[#allocation2 + $0xe0] sm:$0xff] }
 0x35a   : > { %3075 = vst [vmem:[#allocation2 + $0x109] sm:$0xff] %v11170_v23  ;;  %v2958_v35 = vadd.f32 %v11108_v62, %v2848_v20  ;;  %8017 = vmatprep.mubr.f32.mxu1 %v11170_v23  ;;  %v11255_v20 = vld [vmem:[#allocation2 + $0x78] sm:$0xff] }
 0x35b   : > { %v11177_v36 = vmax.f32 %v2959_v31, 0.0  ;;  %8018 = vmatmul.mubr.f32.gmra.mrb[22].mxu1 %v11167_v0  ;;  %v3680_v31 = vld [vmem:[#allocation3 + $0x168] sm:$0xff] }
 0x35c   : > { %v11180_v26 = vmax.f32 %v2958_v35, 0.0  ;;  %v7942_v12 = vpop.f32.mrb[24].mxu0  ;;  %v9048_v35 = vpack.c.bf16 %v3680_v31, %v3679_v13  ;;  %v3976_v13 = vld [vmem:[#allocation3 + $0x198] sm:$0xff] }
 0x35d   : > { %3078 = vst [vmem:[#allocation2 + $0x129] sm:$0xff] %v11177_v36  ;;  %v2961_v40 = vadd.f32 %v7942_v12, %v11108_v62  ;;  %v2858_v41 = vpop.f32.mrb[25].mxu0  ;;  %v11258_v12 = vld [vmem:[#allocation2 + $0x80] sm:$0xff]  ;;  %v11285_v34 = vld [vmem:[#allocation2 + $0xf0] sm:$0xff] }
 0x35e   : > { %3077 = vst [vmem:[#allocation2 + $0x121] sm:$0xff] %v11180_v26  ;;  %v2960_v27 = vadd.f32 %v11108_v62, %v2858_v41  ;;  %8020 = vmatprep.mubr.f32.mxu1 %v11180_v26  ;;  %v3682_v41 = vld [vmem:[#allocation3 + $0x178] sm:$0xff] }
 0x35f   : > { %v11187_v17 = vmax.f32 %v2961_v40, 0.0  ;;  %8021 = vmatmul.mubr.f32.gmra.mrb[24].mxu1 %v11177_v36  ;;  %v3681_v40 = vld [vmem:[#allocation3 + $0x170] sm:$0xff]  ;;  %v3635_v31 = vld [vmem:[#allocation2 + $0xa] sm:$0xff] }
 0x360   : > { %v11190_v45 = vmax.f32 %v2960_v27, 0.0  ;;  %v7945_v46 = vpop.f32.mrb[26].mxu0  ;;  %v11261_v27 = vld [vmem:[#allocation2 + $0x90] sm:$0xff] }
 0x361   : > { %3080 = vst [vmem:[#allocation2 + $0x141] sm:$0xff] %v11187_v17  ;;  %v2963_v21 = vadd.f32 %v7945_v46, %v11108_v62  ;;  %v2868_v50 = vpop.f32.mrb[27].mxu0  ;;  %v9052_v46 = vpack.c.bf16 %v3682_v41, %v3681_v40  ;;  %v3977_v40 = vld [vmem:[#allocation3 + $0x1a0] sm:$0xff]  ;;  %v3978_v41 = vld [vmem:[#allocation3 + $0x1a8] sm:$0xff] }
 0x362   : > { %3079 = vst [vmem:[#allocation2 + $0x139] sm:$0xff] %v11190_v45  ;;  %v2962_v51 = vadd.f32 %v11108_v62, %v2868_v50  ;;  %8023 = vmatprep.mubr.f32.mxu1 %v11190_v45  ;;  %v3973_v50 = vld [vmem:[#allocation3 + $0x180] sm:$0xff] }
 0x363   : > { %v11197_v18 = vmax.f32 %v2963_v21, 0.0  ;;  %8024 = vmatmul.mubr.f32.gmra.mrb[26].mxu1 %v11187_v17  ;;  %v11264_v21 = vld [vmem:[#allocation2 + $0x98] sm:$0xff] }
 0x364   : > { %v11200_v55 = vmax.f32 %v2962_v51, 0.0  ;;  %v7948_v56 = vpop.f32.mrb[28].mxu0  ;;  %v3974_v51 = vld [vmem:[#allocation3 + $0x188] sm:$0xff] }
 0x365   : > { %3082 = vst [vmem:[#allocation2 + $0x159] sm:$0xff] %v11197_v18  ;;  %v2965_v61 = vadd.f32 %v7948_v56, %v11108_v62  ;;  %v2878_v1 = vpop.f32.mrb[29].mxu0  ;;  %v11267_v56 = vld [vmem:[#allocation2 + $0xa8] sm:$0xff] }
 0x366   : > { %3081 = vst [vmem:[#allocation2 + $0x151] sm:$0xff] %v11200_v55  ;;  %v2964_v2 = vadd.f32 %v11108_v62, %v2878_v1  ;;  %8026 = vmatprep.mubr.f32.mxu1 %v11200_v55  ;;  %v11270_v1 = vld [vmem:[#allocation2 + $0xb0] sm:$0xff] }
 0x367   : > { %v11207_v22 = vmax.f32 %v2965_v61, 0.0  ;;  %8027 = vmatmul.mubr.f32.gmra.mrb[28].mxu1 %v11197_v18  ;;  %v9056_v61 = vpack.c.bf16 %v3974_v51, %v3973_v50  ;;  %v9064_v50 = vpack.c.bf16 %v3978_v41, %v3977_v40  ;;  %v11324_v51 = vld [vmem:[#allocation2 + $0x22] sm:$0xff]  ;;  %v11336_v41 = vld [vmem:[#allocation2 + $0x52] sm:$0xff] }
 0x368   : > { %v11210_v4 = vmax.f32 %v2964_v2, 0.0  ;;  %v7951_v5 = vpop.f32.mrb[30].mxu0  ;;  %v11273_v2 = vld [vmem:[#allocation2 + $0xc0] sm:$0xff]  ;;  %11888 = vst [vmem:[#allocation12_spill] sm:$0xff] %v11324_v51  ;;  %11892 = vst [vmem:[#allocation16_spill] sm:$0xff] %v11336_v41 }
 0x369   : > { %3084 = vst [vmem:[#allocation2 + $0x171] sm:$0xff] %v11207_v22  ;;  %v11214_v14 = vadd.f32 %v7951_v5, %v11108_v62  ;;  %v2888_v60 = vpop.f32.mrb[31].mxu0  ;;  %v11276_v5 = vld [vmem:[#allocation2 + $0xc8] sm:$0xff] }
 0x36a   : > { %3083 = vst [vmem:[#allocation2 + $0x169] sm:$0xff] %v11210_v4  ;;  %v11218_v6 = vadd.f32 %v11108_v62, %v2888_v60  ;;  %8029 = vmatprep.mubr.f32.mxu1 %v11210_v4  ;;  %v3671_v62 = vld [vmem:[#allocation3 + $0x120] sm:$0xff]  ;;  %v11279_v60 = vld [vmem:[#allocation2 + $0xd8] sm:$0xff] }
 0x36b   : > { %11885 = vst [vmem:[#allocation9_spill] sm:$0xff] %v11214_v14  ;;  %v11774_v42 = vmax.f32 %v11214_v14, 0.0  ;;  %8030 = vmatmul.mubr.f32.gmra.mrb[30].mxu1 %v11207_v22  ;;  %v9032_v59 = vpack.c.bf16 %v3672_v49, %v3671_v62  ;;  %v11291_v62 = vld [vmem:[#allocation2 + $0x108] sm:$0xff]  ;;  %v11294_v49 = vld [vmem:[#allocation2 + $0x110] sm:$0xff] }
 0x36c   : > { %v11775_v43 = vmax.f32 %v11218_v6, 0.0  ;;  %8064 = vmatprep.mubr.f32.mxu1 %v9916_v28  ;;  %v11327_v14 = vld [vmem:[#allocation2 + $0x32] sm:$0xff] }
 0x36d   : > { %3086 = vst [vmem:[#allocation2 + $0x189] sm:$0xff] %v11774_v42  ;;  %v11309_v30 = vld [vmem:[#allocation2 + $0x150] sm:$0xff]  ;;  %v11312_v38 = vld [vmem:[#allocation2 + $0x158] sm:$0xff]  ;;  %v3979_v42 = vld [vmem:[#allocation3 + $0x1b0] sm:$0xff] }
 0x36e   : > { %3085 = vst [vmem:[#allocation2 + $0x181] sm:$0xff] %v11775_v43  ;;  %v3980_v43 = vld [vmem:[#allocation3 + $0x1b8] sm:$0xff]  ;;  %11889 = vst [vmem:[#allocation13_spill] sm:$0xff] %v11327_v14 }
 0x36f   : > { %8065 = vmatmul.mubr.f32.vlgmr.msra.gmra.mrb[0].mxu1 %v9916_v28  ;;  %v9036_v28 = vpack.c.bf16 %v3674_v24, %v3673_v3  ;;  %v11300_v3 = vld [vmem:[#allocation2 + $0x128] sm:$0xff]  ;;  %v11303_v24 = vld [vmem:[#allocation2 + $0x138] sm:$0xff] }
 0x370   : > { %8067 = vmatprep.mubr.f32.mxu1 %v11230_v58  ;;  %9027 = vmatpush3.bf16.msra.mxu1 %v11102_v57  ;;  %v11243_v57 = vld [vmem:[#allocation2 + $0x48] sm:$0xff] }
 0x371   : > { %9029 = vmatprep.subr.bf16.mxu1 %v9028_v10  ;;  %v11318_v54 = vld [vmem:[#allocation2 + $0x170] sm:$0xff] }
 0x372   : > { %11887 = vst [vmem:[#allocation11_spill] sm:$0xff] %v11318_v54 }
 0x373   : > { %8068 = vmatmul.mubr.f32.gmra.mrb[2].mxu1 %v11234_v15 }
 0x374   : > { %8070 = vmatprep.mubr.f32.mxu1 %v11237_v25  ;;  %9031 = vmatpush3.bf16.msra.mxu1 %v9028_v10  ;;  %v11288_v10 = vld [vmem:[#allocation2 + $0xf8] sm:$0xff] }
 0x375   : > { %9033 = vmatprep.subr.bf16.mxu1 %v9032_v59 }
 0x377   : > { %8071 = vmatmul.mubr.f32.gmra.mrb[4].mxu1 %v11240_v29 }
 0x378   : > { %8073 = vmatprep.mubr.f32.mxu1 %v11243_v57  ;;  %9035 = vmatpush3.bf16.msra.mxu1 %v9032_v59  ;;  %v11297_v59 = vld [vmem:[#allocation2 + $0x120] sm:$0xff] }
 0x379   : > { %9037 = vmatprep.subr.bf16.mxu1 %v9036_v28 }
 0x37b   : > { %8074 = vmatmul.mubr.f32.gmra.mrb[6].mxu1 %v11246_v44 }
 0x37c   : > { %8076 = vmatprep.mubr.f32.mxu1 %v11249_v63  ;;  %9039 = vmatpush3.bf16.msra.mxu1 %v9036_v28  ;;  %v11306_v28 = vld [vmem:[#allocation2 + $0x140] sm:$0xff] }
 0x37d   : > { %9041 = vmatprep.subr.bf16.mxu1 %v9040_v39 }
 0x37f   : > { %8077 = vmatmul.mubr.f32.gmra.mrb[8].mxu1 %v11252_v9 }
 0x380   : > { %8079 = vmatprep.mubr.f32.mxu1 %v11255_v20  ;;  %9043 = vmatpush3.bf16.msra.mxu1 %v9040_v39  ;;  %v11315_v39 = vld [vmem:[#allocation2 + $0x168] sm:$0xff] }
 0x381   : > { %9045 = vmatprep.subr.bf16.mxu1 %v9044_v7  ;;  %11886 = vst [vmem:[#allocation10_spill] sm:$0xff] %v11315_v39 }
 0x383   : > { %8080 = vmatmul.mubr.f32.gmra.mrb[10].mxu1 %v11258_v12 }
 0x384   : > { %8082 = vmatprep.mubr.f32.mxu1 %v11261_v27  ;;  %9047 = vmatpush3.bf16.msra.mxu1 %v9044_v7  ;;  %v3975_v7 = vld [vmem:[#allocation3 + $0x190] sm:$0xff] }
 0x385   : > { %9049 = vmatprep.subr.bf16.mxu1 %v9048_v35 }
 0x387   : > { %8083 = vmatmul.mubr.f32.gmra.mrb[12].mxu1 %v11264_v21 }
 0x388   : > { %8085 = vmatprep.mubr.f32.mxu1 %v11267_v56  ;;  %9051 = vmatpush3.bf16.msra.mxu1 %v9048_v35  ;;  %v9060_v35 = vpack.c.bf16 %v3976_v13, %v3975_v7  ;;  %v11330_v7 = vld [vmem:[#allocation2 + $0x3a] sm:$0xff]  ;;  %v3981_v13 = vld [vmem:[#allocation3 + $0x1c0] sm:$0xff] }
 0x389   : > { %9053 = vmatprep.subr.bf16.mxu1 %v9052_v46  ;;  %11890 = vst [vmem:[#allocation14_spill] sm:$0xff] %v11330_v7 }
 0x38b   : > { %8086 = vmatmul.mubr.f32.gmra.mrb[14].mxu1 %v11270_v1 }
 0x38c   : > { %8088 = vmatprep.mubr.f32.mxu1 %v11273_v2  ;;  %9055 = vmatpush3.bf16.msra.mxu1 %v9052_v46  ;;  %v11321_v46 = vld [vmem:[#allocation2 + $0x1a] sm:$0xff] }
 0x38d   : > { %9057 = vmatprep.subr.bf16.mxu1 %v9056_v61 }
 0x38f   : > { %8089 = vmatmul.mubr.f32.gmra.mrb[16].mxu1 %v11276_v5 }
 0x390   : > { %8091 = vmatprep.mubr.f32.mxu1 %v11279_v60 }
 0x393   : > { %8092 = vmatmul.mubr.f32.gmra.mrb[18].mxu1 %v11282_v33 }
 0x394   : > { %8094 = vmatprep.mubr.f32.mxu1 %v11285_v34 }
 0x397   : > { %8095 = vmatmul.mubr.f32.gmra.mrb[20].mxu1 %v11288_v10 }
 0x398   : > { %8097 = vmatprep.mubr.f32.mxu1 %v11291_v62 }
 0x39b   : > { %8098 = vmatmul.mubr.f32.gmra.mrb[22].mxu1 %v11294_v49 }
 0x39c   : > { %8100 = vmatprep.mubr.f32.mxu1 %v11297_v59 }
 0x39f   : > { %8101 = vmatmul.mubr.f32.gmra.mrb[24].mxu1 %v11300_v3 }
 0x3a0   : > { %8103 = vmatprep.mubr.f32.mxu1 %v11303_v24 }
 0x3a3   : > { %8104 = vmatmul.mubr.f32.gmra.mrb[26].mxu1 %v11306_v28 }
 0x3a4   : > { %8106 = vmatprep.mubr.f32.mxu1 %v11309_v30 }
 0x3a7   : > { %8107 = vmatmul.mubr.f32.gmra.mrb[28].mxu1 %v11312_v38 }
 0x3a8   : > { %8109 = vmatprep.mubr.f32.mxu1 %v11315_v39 }
 0x3ab   : > { %8110 = vmatmul.mubr.f32.gmra.mrb[30].mxu1 %v11318_v54 }
 0x3ac   : > { %8144 = vmatprep.mubr.f32.mxu1 %v3634_v47  ;;  %v9068_v47 = vpack.c.bf16 %v3980_v43, %v3979_v42  ;;  %v11339_v42 = vld [vmem:[#allocation2 + $0x62] sm:$0xff] }
 0x3ad   : > { %11893 = vst [vmem:[#allocation17_spill] sm:$0xff] %v11339_v42 }
 0x3af   : > { %8145 = vmatmul.mubr.f32.vlgmr.msra.gmra.mrb[0].mxu1 %v3635_v31  ;;  %v3982_v31 = vld [vmem:[#allocation3 + $0x1c8] sm:$0xff] }
 0x3b0   : > { %8147 = vmatprep.mubr.f32.mxu1 %v11321_v46  ;;  %9059 = vmatpush3.bf16.msra.mxu1 %v9056_v61  ;;  %v11333_v61 = vld [vmem:[#allocation2 + $0x4a] sm:$0xff]  ;;  %v9072_v40 = vpack.c.bf16 %v3982_v31, %v3981_v13  ;;  %v11348_v31 = vld [vmem:[#allocation2 + $0x82] sm:$0xff] }
 0x3b1   : > { %9061 = vmatprep.subr.bf16.mxu1 %v9060_v35  ;;  %11891 = vst [vmem:[#allocation15_spill] sm:$0xff] %v11333_v61 }
 0x3b3   : > { %8148 = vmatmul.mubr.f32.gmra.mrb[2].mxu1 %v11324_v51  ;;  %v3983_v51 = vld [vmem:[#allocation3 + $0x1d0] sm:$0xff] }
 0x3b4   : > { %8150 = vmatprep.mubr.f32.mxu1 %v11327_v14  ;;  %9063 = vmatpush3.bf16.msra.mxu1 %v9060_v35  ;;  %v3984_v14 = vld [vmem:[#allocation3 + $0x1d8] sm:$0xff] }
 0x3b5   : > { %9065 = vmatprep.subr.bf16.mxu1 %v9064_v50  ;;  %v9076_v43 = vpack.c.bf16 %v3984_v14, %v3983_v51  ;;  %v11342_v35 = vld [vmem:[#allocation2 + $0x6a] sm:$0xff]  ;;  %v11351_v14 = vld [vmem:[#allocation2 + $0x92] sm:$0xff] }
 0x3b6   : > { %11894 = vst [vmem:[#allocation18_spill] sm:$0xff] %v11342_v35 }
 0x3b7   : > { %8151 = vmatmul.mubr.f32.gmra.mrb[4].mxu1 %v11330_v7  ;;  %v3985_v7 = vld [vmem:[#allocation3 + $0x1e0] sm:$0xff] }
 0x3b8   : > { %8153 = vmatprep.mubr.f32.mxu1 %v11333_v61  ;;  %9067 = vmatpush3.bf16.msra.mxu1 %v9064_v50  ;;  %v3986_v61 = vld [vmem:[#allocation3 + $0x1e8] sm:$0xff] }
 0x3b9   : > { %9069 = vmatprep.subr.bf16.mxu1 %v9068_v47  ;;  %v11345_v50 = vld [vmem:[#allocation2 + $0x7a] sm:$0xff]  ;;  %v9080_v13 = vpack.c.bf16 %v3986_v61, %v3985_v7  ;;  %v11357_v7 = vld [vmem:[#allocation2 + $0xaa] sm:$0xff] }
 0x3ba   : > { %11895 = vst [vmem:[#allocation19_spill] sm:$0xff] %v11345_v50  ;;  %11896 = vst [vmem:[#allocation20_spill] sm:$0xff] %v11357_v7 }
 0x3bb   : > { %8154 = vmatmul.mubr.f32.gmra.mrb[6].mxu1 %v11336_v41  ;;  %v3987_v41 = vld [vmem:[#allocation3 + $0x1f0] sm:$0xff] }
 0x3bc   : > { %8156 = vmatprep.mubr.f32.mxu1 %v11339_v42  ;;  %9071 = vmatpush3.bf16.msra.mxu1 %v9068_v47  ;;  %v3988_v42 = vld [vmem:[#allocation3 + $0x1f8] sm:$0xff]  ;;  %v11354_v47 = vld [vmem:[#allocation2 + $0x9a] sm:$0xff] }
 0x3bd   : > { %9073 = vmatprep.subr.bf16.mxu1 %v9072_v40  ;;  %v9084_v51 = vpack.c.bf16 %v3988_v42, %v3987_v41  ;;  %v11366_v41 = vld [vmem:[#allocation2 + $0xca] sm:$0xff]  ;;  %v11369_v42 = vld [vmem:[#allocation2 + $0xda] sm:$0xff] }
 0x3be   : > { %11899 = vst [vmem:[#allocation23_spill] sm:$0xff] %v11366_v41  ;;  %11900 = vst [vmem:[#allocation24_spill] sm:$0xff] %v11369_v42 }
 0x3bf   : > { %8157 = vmatmul.mubr.f32.gmra.mrb[8].mxu1 %v11342_v35  ;;  %v4279_v35 = vld [vmem:[#allocation3 + $0x200] sm:$0xff] }
 0x3c0   : > { %8159 = vmatprep.mubr.f32.mxu1 %v11345_v50  ;;  %9075 = vmatpush3.bf16.msra.mxu1 %v9072_v40  ;;  %v4280_v50 = vld [vmem:[#allocation3 + $0x208] sm:$0xff] }
 0x3c1   : > { %9077 = vmatprep.subr.bf16.mxu1 %v9076_v43  ;;  %v9088_v61 = vpack.c.bf16 %v4280_v50, %v4279_v35  ;;  %v11360_v40 = vld [vmem:[#allocation2 + $0xb2] sm:$0xff]  ;;  %v11378_v50 = vld [vmem:[#allocation2 + $0xfa] sm:$0xff] }
 0x3c2   : > { %11897 = vst [vmem:[#allocation21_spill] sm:$0xff] %v11360_v40  ;;  %v11375_v35 = vld [vmem:[#allocation2 + $0xf2] sm:$0xff]  ;;  %11903 = vst [vmem:[#allocation27_spill] sm:$0xff] %v11378_v50 }
 0x3c3   : > { %8160 = vmatmul.mubr.f32.gmra.mrb[10].mxu1 %v11348_v31  ;;  %11902 = vst [vmem:[#allocation26_spill] sm:$0xff] %v11375_v35 }
 0x3c4   : > { %8162 = vmatprep.mubr.f32.mxu1 %v11351_v14  ;;  %9079 = vmatpush3.bf16.msra.mxu1 %v9076_v43  ;;  %v11363_v43 = vld [vmem:[#allocation2 + $0xc2] sm:$0xff] }
 0x3c5   : > { %9081 = vmatprep.subr.bf16.mxu1 %v9080_v13  ;;  %11898 = vst [vmem:[#allocation22_spill] sm:$0xff] %v11363_v43 }
 0x3c7   : > { %8163 = vmatmul.mubr.f32.gmra.mrb[12].mxu1 %v11354_v47 }
 0x3c8   : > { %8165 = vmatprep.mubr.f32.mxu1 %v11357_v7  ;;  %9083 = vmatpush3.bf16.msra.mxu1 %v9080_v13  ;;  %v11372_v13 = vld [vmem:[#allocation2 + $0xe2] sm:$0xff]  ;;  %v4284_v7 = vld [vmem:[#allocation3 + $0x228] sm:$0xff] }
 0x3c9   : > { %9085 = vmatprep.subr.bf16.mxu1 %v9084_v51  ;;  %11901 = vst [vmem:[#allocation25_spill] sm:$0xff] %v11372_v13 }
 0x3cb   : > { %8166 = vmatmul.mubr.f32.gmra.mrb[14].mxu1 %v11360_v40  ;;  %v4283_v40 = vld [vmem:[#allocation3 + $0x220] sm:$0xff] }
 0x3cc   : > { %8168 = vmatprep.mubr.f32.mxu1 %v11363_v43  ;;  %9087 = vmatpush3.bf16.msra.mxu1 %v9084_v51  ;;  %v11381_v51 = vld [vmem:[#allocation2 + $0x10a] sm:$0xff]  ;;  %v4281_v43 = vld [vmem:[#allocation3 + $0x210] sm:$0xff] }
 0x3cd   : > { %9089 = vmatprep.subr.bf16.mxu1 %v9088_v61  ;;  %11904 = vst [vmem:[#allocation28_spill] sm:$0xff] %v11381_v51 }
 0x3cf   : > { %8169 = vmatmul.mubr.f32.gmra.mrb[16].mxu1 %v11366_v41  ;;  %v11384_v41 = vld [vmem:[#allocation2 + $0x112] sm:$0xff] }
 0x3d0   : > { %8171 = vmatprep.mubr.f32.mxu1 %v11369_v42  ;;  %11905 = vst [vmem:[#allocation29_spill] sm:$0xff] %v11384_v41  ;;  %v11387_v42 = vld [vmem:[#allocation2 + $0x122] sm:$0xff] }
 0x3d1   : > { %11906 = vst [vmem:[#allocation30_spill] sm:$0xff] %v11387_v42 }
 0x3d3   : > { %8172 = vmatmul.mubr.f32.gmra.mrb[18].mxu1 %v11372_v13  ;;  %v11390_v13 = vld [vmem:[#allocation2 + $0x12a] sm:$0xff] }
 0x3d4   : > { %8174 = vmatprep.mubr.f32.mxu1 %v11375_v35  ;;  %11907 = vst [vmem:[#allocation31_spill] sm:$0xff] %v11390_v13  ;;  %v11393_v35 = vld [vmem:[#allocation2 + $0x13a] sm:$0xff] }
 0x3d5   : > { %11908 = vst [vmem:[#allocation32_spill] sm:$0xff] %v11393_v35 }
 0x3d7   : > { %8175 = vmatmul.mubr.f32.gmra.mrb[20].mxu1 %v11378_v50  ;;  %v11396_v50 = vld [vmem:[#allocation2 + $0x142] sm:$0xff] }
 0x3d8   : > { %8177 = vmatprep.mubr.f32.mxu1 %v11381_v51  ;;  %11909 = vst [vmem:[#allocation33_spill] sm:$0xff] %v11396_v50  ;;  %v11399_v51 = vld [vmem:[#allocation2 + $0x152] sm:$0xff] }
 0x3d9   : > { %11910 = vst [vmem:[#allocation34_spill] sm:$0xff] %v11399_v51 }
 0x3db   : > { %8178 = vmatmul.mubr.f32.gmra.mrb[22].mxu1 %v11384_v41  ;;  %v11402_v41 = vld [vmem:[#allocation2 + $0x15a] sm:$0xff] }
 0x3dc   : > { %8180 = vmatprep.mubr.f32.mxu1 %v11387_v42  ;;  %11911 = vst [vmem:[#allocation35_spill] sm:$0xff] %v11402_v41  ;;  %v11405_v42 = vld [vmem:[#allocation2 + $0x16a] sm:$0xff] }
 0x3dd   : > { %11912 = vst [vmem:[#allocation36_spill] sm:$0xff] %v11405_v42 }
 0x3df   : > { %8181 = vmatmul.mubr.f32.gmra.mrb[24].mxu1 %v11390_v13  ;;  %v11408_v13 = vld [vmem:[#allocation2 + $0x172] sm:$0xff] }
 0x3e0   : > { %8183 = vmatprep.mubr.f32.mxu1 %v11393_v35  ;;  %11913 = vst [vmem:[#allocation37_spill] sm:$0xff] %v11408_v13  ;;  %v4282_v35 = vld [vmem:[#allocation3 + $0x218] sm:$0xff] }
 0x3e3   : > { %8184 = vmatmul.mubr.f32.gmra.mrb[26].mxu1 %v11396_v50  ;;  %v9092_v50 = vpack.c.bf16 %v4282_v35, %v4281_v43  ;;  %v4288_v43 = vld [vmem:[#allocation3 + $0x248] sm:$0xff]  ;;  %v4291_v35 = vld [vmem:[#allocation3 + $0x260] sm:$0xff] }
 0x3e4   : > { %8186 = vmatprep.mubr.f32.mxu1 %v11399_v51  ;;  %v4285_v51 = vld [vmem:[#allocation3 + $0x230] sm:$0xff] }
 0x3e7   : > { %8187 = vmatmul.mubr.f32.gmra.mrb[28].mxu1 %v11402_v41  ;;  %v9096_v41 = vpack.c.bf16 %v4284_v7, %v4283_v40  ;;  %v4290_v7 = vld [vmem:[#allocation3 + $0x258] sm:$0xff] }
 0x3e8   : > { %8189 = vmatprep.mubr.f32.mxu1 %v11405_v42  ;;  %v4286_v42 = vld [vmem:[#allocation3 + $0x238] sm:$0xff] }
 0x3eb   : > { %8190 = vmatmul.mubr.f32.gmra.mrb[30].mxu1 %v11408_v13  ;;  %v9100_v13 = vpack.c.bf16 %v4286_v42, %v4285_v51  ;;  %v4292_v42 = vld [vmem:[#allocation3 + $0x268] sm:$0xff]  ;;  %v4294_v51 = vld [vmem:[#allocation3 + $0x278] sm:$0xff] }
 0x3ec   : > { %8224 = vmatprep.mubr.f32.mxu1 %v11230_v58  ;;  %v4287_v58 = vld [vmem:[#allocation3 + $0x240] sm:$0xff] }
 0x3ef   : > { %8225 = vmatmul.mubr.f32.vlgmr.msra.gmra.mrb[0].mxu1 %v11234_v15  ;;  %v9104_v15 = vpack.c.bf16 %v4288_v43, %v4287_v58  ;;  %v4585_v58 = vld [vmem:[#allocation3 + $0x280] sm:$0xff]  ;;  %v4586_v43 = vld [vmem:[#allocation3 + $0x288] sm:$0xff] }
 0x3f0   : > { %8227 = vmatprep.mubr.f32.mxu1 %v11237_v25  ;;  %9091 = vmatpush3.bf16.msra.mxu1 %v9088_v61  ;;  %v4289_v61 = vld [vmem:[#allocation3 + $0x250] sm:$0xff] }
 0x3f1   : > { %9093 = vmatprep.subr.bf16.mxu1 %v9092_v50  ;;  %v9108_v40 = vpack.c.bf16 %v4290_v7, %v4289_v61  ;;  %v11441_v61 = vld [vmem:[#allocation2 + $0x180] sm:$0xff]  ;;  %v11444_v7 = vld [vmem:[#allocation2 + $0x188] sm:$0xff] }
 0x3f2   : > { %11914 = vst [vmem:[#allocation38_spill] sm:$0xff] %v11441_v61  ;;  %11915 = vst [vmem:[#allocation39_spill] sm:$0xff] %v11444_v7 }
 0x3f3   : > { %8228 = vmatmul.mubr.f32.gmra.mrb[2].mxu1 %v11240_v29 }
 0x3f4   : > { %8230 = vmatprep.mubr.f32.mxu1 %v11243_v57  ;;  %9095 = vmatpush3.bf16.msra.mxu1 %v9092_v50  ;;  %v4293_v50 = vld [vmem:[#allocation3 + $0x270] sm:$0xff] }
 0x3f5   : > { %9097 = vmatprep.subr.bf16.mxu1 %v9096_v41 }
 0x3f7   : > { %8231 = vmatmul.mubr.f32.gmra.mrb[4].mxu1 %v11246_v44 }
 0x3f8   : > { %8233 = vmatprep.mubr.f32.mxu1 %v11249_v63  ;;  %9099 = vmatpush3.bf16.msra.mxu1 %v9096_v41  ;;  %v9112_v41 = vpack.c.bf16 %v4292_v42, %v4291_v35  ;;  %v4588_v35 = vld [vmem:[#allocation3 + $0x298] sm:$0xff]  ;;  %v4246_v42 = vld [vmem:[#allocation2 + $0x19] sm:$0xff] }
 0x3f9   : > { %9101 = vmatprep.subr.bf16.mxu1 %v9100_v13 }
 0x3fb   : > { %8234 = vmatmul.mubr.f32.gmra.mrb[6].mxu1 %v11252_v9 }
 0x3fc   : > { %8236 = vmatprep.mubr.f32.mxu1 %v11255_v20  ;;  %9103 = vmatpush3.bf16.msra.mxu1 %v9100_v13  ;;  %v9116_v13 = vpack.c.bf16 %v4294_v51, %v4293_v50  ;;  %v4247_v50 = vld [vmem:[#allocation2 + $0x21] sm:$0xff]  ;;  %v4589_v51 = vld [vmem:[#allocation3 + $0x2a0] sm:$0xff] }
 0x3fd   : > { %9105 = vmatprep.subr.bf16.mxu1 %v9104_v15 }
 0x3ff   : > { %8237 = vmatmul.mubr.f32.gmra.mrb[8].mxu1 %v11258_v12 }
 0x400   : > { %8239 = vmatprep.mubr.f32.mxu1 %v11261_v27  ;;  %9107 = vmatpush3.bf16.msra.mxu1 %v9104_v15  ;;  %v9120_v15 = vpack.c.bf16 %v4586_v43, %v4585_v58  ;;  %v11447_v58 = vld [vmem:[#allocation2 + $0x31] sm:$0xff] }
 0x401   : > { %9109 = vmatprep.subr.bf16.mxu1 %v9108_v40 }
 0x403   : > { %8240 = vmatmul.mubr.f32.gmra.mrb[10].mxu1 %v11264_v21 }
 0x404   : > { %8242 = vmatprep.mubr.f32.mxu1 %v11267_v56  ;;  %9111 = vmatpush3.bf16.msra.mxu1 %v9108_v40  ;;  %v4587_v40 = vld [vmem:[#allocation3 + $0x290] sm:$0xff] }
 0x405   : > { %9113 = vmatprep.subr.bf16.mxu1 %v9112_v41 }
 0x407   : > { %8243 = vmatmul.mubr.f32.gmra.mrb[12].mxu1 %v11270_v1 }
 0x408   : > { %8245 = vmatprep.mubr.f32.mxu1 %v11273_v2  ;;  %9115 = vmatpush3.bf16.msra.mxu1 %v9112_v41  ;;  %v9124_v41 = vpack.c.bf16 %v4588_v35, %v4587_v40  ;;  %v11456_v35 = vld [vmem:[#allocation2 + $0x51] sm:$0xff] }
 0x409   : > { %9117 = vmatprep.subr.bf16.mxu1 %v9116_v13  ;;  %11918 = vst [vmem:[#allocation42_spill] sm:$0xff] %v11456_v35 }
 0x40b   : > { %8246 = vmatmul.mubr.f32.gmra.mrb[14].mxu1 %v11276_v5 }
 0x40c   : > { %8248 = vmatprep.mubr.f32.mxu1 %v11279_v60  ;;  %9119 = vmatpush3.bf16.msra.mxu1 %v9116_v13  ;;  %v4590_v13 = vld [vmem:[#allocation3 + $0x2a8] sm:$0xff] }
 0x40d   : > { %9121 = vmatprep.subr.bf16.mxu1 %v9120_v15  ;;  %v9128_v43 = vpack.c.bf16 %v4590_v13, %v4589_v51  ;;  %v11462_v13 = vld [vmem:[#allocation2 + $0x69] sm:$0xff] }
 0x40e   : > { %11920 = vst [vmem:[#allocation44_spill] sm:$0xff] %v11462_v13 }
 0x40f   : > { %8249 = vmatmul.mubr.f32.gmra.mrb[16].mxu1 %v11282_v33 }
 0x410   : > { %8251 = vmatprep.mubr.f32.mxu1 %v11285_v34 }
 0x413   : > { %8252 = vmatmul.mubr.f32.gmra.mrb[18].mxu1 %v11288_v10 }
 0x414   : > { %8254 = vmatprep.mubr.f32.mxu1 %v11291_v62 }
 0x417   : > { %8255 = vmatmul.mubr.f32.gmra.mrb[20].mxu1 %v11294_v49 }
 0x418   : > { %8257 = vmatprep.mubr.f32.mxu1 %v11297_v59 }
 0x41b   : > { %8258 = vmatmul.mubr.f32.gmra.mrb[22].mxu1 %v11300_v3 }
 0x41c   : > { %8260 = vmatprep.mubr.f32.mxu1 %v11303_v24 }
 0x41f   : > { %8261 = vmatmul.mubr.f32.gmra.mrb[24].mxu1 %v11306_v28 }
 0x420   : > { %8263 = vmatprep.mubr.f32.mxu1 %v11309_v30 }
 0x423   : > { %8264 = vmatmul.mubr.f32.gmra.mrb[26].mxu1 %v11312_v38 }
 0x424   : > { %8266 = vmatprep.mubr.f32.mxu1 %v11315_v39  ;;  %v4592_v39 = vld [vmem:[#allocation3 + $0x2b8] sm:$0xff] }
 0x427   : > { %8267 = vmatmul.mubr.f32.gmra.mrb[28].mxu1 %v11318_v54  ;;  %v4591_v54 = vld [vmem:[#allocation3 + $0x2b0] sm:$0xff] }
 0x428   : > { %8269 = vmatprep.mubr.f32.mxu1 %v11441_v61  ;;  %v11450_v61 = vld [vmem:[#allocation2 + $0x39] sm:$0xff]  ;;  %v9132_v40 = vpack.c.bf16 %v4592_v39, %v4591_v54 }
 0x429   : > { %11916 = vst [vmem:[#allocation40_spill] sm:$0xff] %v11450_v61  ;;  %v11465_v39 = vld [vmem:[#allocation2 + $0x79] sm:$0xff] }
 0x42b   : > { %8270 = vmatmul.mubr.f32.gmra.mrb[30].mxu1 %v11444_v7  ;;  %v11453_v7 = vld [vmem:[#allocation2 + $0x49] sm:$0xff] }
 0x42c   : > { %8304 = vmatprep.mubr.f32.mxu1 %v4246_v42  ;;  %11917 = vst [vmem:[#allocation41_spill] sm:$0xff] %v11453_v7  ;;  %v4593_v42 = vld [vmem:[#allocation3 + $0x2c0] sm:$0xff] }
 0x42f   : > { %8305 = vmatmul.mubr.f32.vlgmr.msra.gmra.mrb[0].mxu1 %v4247_v50  ;;  %v4594_v50 = vld [vmem:[#allocation3 + $0x2c8] sm:$0xff] }
 0x430   : > { %8307 = vmatprep.mubr.f32.mxu1 %v11447_v58  ;;  %9123 = vmatpush3.bf16.msra.mxu1 %v9120_v15  ;;  %v11459_v15 = vld [vmem:[#allocation2 + $0x61] sm:$0xff]  ;;  %v9136_v51 = vpack.c.bf16 %v4594_v50, %v4593_v42  ;;  %v11472_v42 = vld [vmem:[#allocation2 + $0x99] sm:$0xff] }
 0x431   : > { %9125 = vmatprep.subr.bf16.mxu1 %v9124_v41  ;;  %11919 = vst [vmem:[#allocation43_spill] sm:$0xff] %v11459_v15  ;;  %v4599_v50 = vld [vmem:[#allocation3 + $0x2f0] sm:$0xff] }
 0x433   : > { %8308 = vmatmul.mubr.f32.gmra.mrb[2].mxu1 %v11450_v61  ;;  %v4595_v61 = vld [vmem:[#allocation3 + $0x2d0] sm:$0xff] }
 0x434   : > { %8310 = vmatprep.mubr.f32.mxu1 %v11453_v7  ;;  %9127 = vmatpush3.bf16.msra.mxu1 %v9124_v41  ;;  %v4596_v7 = vld [vmem:[#allocation3 + $0x2d8] sm:$0xff] }
 0x435   : > { %9129 = vmatprep.subr.bf16.mxu1 %v9128_v43  ;;  %v9140_v54 = vpack.c.bf16 %v4596_v7, %v4595_v61  ;;  %v11468_v41 = vld [vmem:[#allocation2 + $0x81] sm:$0xff]  ;;  %v4892_v7 = vld [vmem:[#allocation3 + $0x300] sm:$0xff] }
 0x437   : > { %8311 = vmatmul.mubr.f32.gmra.mrb[4].mxu1 %v11456_v35  ;;  %v4597_v35 = vld [vmem:[#allocation3 + $0x2e0] sm:$0xff] }
 0x438   : > { %8313 = vmatprep.mubr.f32.mxu1 %v11459_v15  ;;  %9131 = vmatpush3.bf16.msra.mxu1 %v9128_v43  ;;  %v4598_v15 = vld [vmem:[#allocation3 + $0x2e8] sm:$0xff] }
 0x439   : > { %9133 = vmatprep.subr.bf16.mxu1 %v9132_v40  ;;  %v9144_v43 = vpack.c.bf16 %v4598_v15, %v4597_v35  ;;  %v4902_v15 = vld [vmem:[#allocation3 + $0x350] sm:$0xff] }
 0x43b   : > { %8314 = vmatmul.mubr.f32.gmra.mrb[6].mxu1 %v11462_v13  ;;  %v4600_v13 = vld [vmem:[#allocation3 + $0x2f8] sm:$0xff] }
 0x43c   : > { %8316 = vmatprep.mubr.f32.mxu1 %v11465_v39  ;;  %9135 = vmatpush3.bf16.msra.mxu1 %v9132_v40  ;;  %v9148_v61 = vpack.c.bf16 %v4600_v13, %v4599_v50  ;;  %v4893_v40 = vld [vmem:[#allocation3 + $0x308] sm:$0xff]  ;;  %v4904_v50 = vld [vmem:[#allocation3 + $0x360] sm:$0xff] }
 0x43d   : > { %9137 = vmatprep.subr.bf16.mxu1 %v9136_v51  ;;  %v11930_v13 = vld [vmem:[#allocation18_spill] sm:$0xff] }
 0x43f   : > { %8317 = vmatmul.mubr.f32.gmra.mrb[8].mxu1 %v11468_v41 }
 0x440   : > { %8319 = vmatprep.mubr.f32.mxu1 %v11122_v8  ;;  %9139 = vmatpush3.bf16.msra.mxu1 %v9136_v51  ;;  %v9152_v8 = vpack.c.bf16 %v4893_v40, %v4892_v7  ;;  %v4903_v51 = vld [vmem:[#allocation3 + $0x358] sm:$0xff]  ;;  %v4906_v40 = vld [vmem:[#allocation3 + $0x370] sm:$0xff] }
 0x441   : > { %9141 = vmatprep.subr.bf16.mxu1 %v9140_v54 }
 0x443   : > { %8320 = vmatmul.mubr.f32.gmra.mrb[10].mxu1 %v11472_v42 }
 0x444   : > { %8322 = vmatprep.mubr.f32.mxu1 %v11130_v11  ;;  %9143 = vmatpush3.bf16.msra.mxu1 %v9140_v54  ;;  %v4894_v11 = vld [vmem:[#allocation3 + $0x310] sm:$0xff] }
 0x445   : > { %9145 = vmatprep.subr.bf16.mxu1 %v9144_v43  ;;  %v11931_v54 = vld [vmem:[#allocation19_spill] sm:$0xff] }
 0x447   : > { %8323 = vmatmul.mubr.f32.gmra.mrb[12].mxu1 %v11128_v52  ;;  %v11921_v52 = vmax.f32 %v11218_v6, 0.0  ;;  %v11928_v6 = vld [vmem:[#allocation16_spill] sm:$0xff] }
 0x448   : > { %8325 = vmatprep.mubr.f32.mxu1 %v11140_v16  ;;  %9147 = vmatpush3.bf16.msra.mxu1 %v9144_v43  ;;  %v11922_v16 = vld [vmem:[#allocation9_spill] sm:$0xff]  ;;  %v9172_v43 = vpack.c.bf16 %v4903_v51, %v4902_v15  ;;  %v5200_v15 = vld [vmem:[#allocation3 + $0x390] sm:$0xff]  ;;  %v5201_v51 = vld [vmem:[#allocation3 + $0x398] sm:$0xff] }
 0x449   : > { %9149 = vmatprep.subr.bf16.mxu1 %v9148_v61 }
 0x44b   : > { %8326 = vmatmul.mubr.f32.gmra.mrb[14].mxu1 %v11137_v19  ;;  %v4895_v19 = vld [vmem:[#allocation3 + $0x318] sm:$0xff] }
 0x44c   : > { %8328 = vmatprep.mubr.f32.mxu1 %v11150_v37  ;;  %9151 = vmatpush3.bf16.msra.mxu1 %v9148_v61  ;;  %v9156_v37 = vpack.c.bf16 %v4895_v19, %v4894_v11  ;;  %v4905_v61 = vld [vmem:[#allocation3 + $0x368] sm:$0xff]  ;;  %v5198_v19 = vld [vmem:[#allocation3 + $0x380] sm:$0xff] }
 0x44d   : > { %9153 = vmatprep.subr.bf16.mxu1 %v9152_v8  ;;  %v9176_v7 = vpack.c.bf16 %v4905_v61, %v4904_v50  ;;  %v5204_v61 = vld [vmem:[#allocation3 + $0x3b0] sm:$0xff] }
 0x44f   : > { %8329 = vmatmul.mubr.f32.gmra.mrb[16].mxu1 %v11147_v32  ;;  %v11923_v32 = vmax.f32 %v11922_v16, 0.0  ;;  %v5199_v16 = vld [vmem:[#allocation3 + $0x388] sm:$0xff] }
 0x450   : > { %8331 = vmatprep.mubr.f32.mxu1 %v11160_v53  ;;  %v4897_v53 = vld [vmem:[#allocation3 + $0x328] sm:$0xff] }
 0x453   : > { %8332 = vmatmul.mubr.f32.gmra.mrb[18].mxu1 %v11157_v48  ;;  %v4896_v48 = vld [vmem:[#allocation3 + $0x320] sm:$0xff] }
 0x454   : > { %8334 = vmatprep.mubr.f32.mxu1 %v11170_v23  ;;  %v11925_v23 = vld [vmem:[#allocation13_spill] sm:$0xff] }
 0x457   : > { %8335 = vmatmul.mubr.f32.gmra.mrb[20].mxu1 %v11167_v0  ;;  %v11924_v0 = vld [vmem:[#allocation12_spill] sm:$0xff] }
 0x458   : > { %8337 = vmatprep.mubr.f32.mxu1 %v11180_v26  ;;  %v4898_v26 = vld [vmem:[#allocation3 + $0x330] sm:$0xff] }
 0x45b   : > { %8338 = vmatmul.mubr.f32.gmra.mrb[22].mxu1 %v11177_v36  ;;  %v9160_v36 = vpack.c.bf16 %v4897_v53, %v4896_v48  ;;  %v11936_v48 = vld [vmem:[#allocation24_spill] sm:$0xff]  ;;  %v11938_v53 = vld [vmem:[#allocation26_spill] sm:$0xff] }
 0x45c   : > { %8340 = vmatprep.mubr.f32.mxu1 %v11190_v45  ;;  %v11926_v45 = vld [vmem:[#allocation14_spill] sm:$0xff] }
 0x45f   : > { %8341 = vmatmul.mubr.f32.gmra.mrb[24].mxu1 %v11187_v17  ;;  %v4899_v17 = vld [vmem:[#allocation3 + $0x338] sm:$0xff] }
 0x460   : > { %8343 = vmatprep.mubr.f32.mxu1 %v11200_v55  ;;  %v9164_v55 = vpack.c.bf16 %v4899_v17, %v4898_v26  ;;  %v11942_v26 = vld [vmem:[#allocation30_spill] sm:$0xff]  ;;  %v11943_v17 = vld [vmem:[#allocation31_spill] sm:$0xff] }
 0x463   : > { %8344 = vmatmul.mubr.f32.gmra.mrb[26].mxu1 %v11197_v18  ;;  %v11927_v18 = vld [vmem:[#allocation15_spill] sm:$0xff] }
 0x464   : > { %8346 = vmatprep.mubr.f32.mxu1 %v11210_v4  ;;  %v4901_v4 = vld [vmem:[#allocation3 + $0x348] sm:$0xff] }
 0x467   : > { %8347 = vmatmul.mubr.f32.gmra.mrb[28].mxu1 %v11207_v22  ;;  %v4900_v22 = vld [vmem:[#allocation3 + $0x340] sm:$0xff] }
 0x468   : > { %8349 = vmatprep.mubr.f32.mxu1 %v11921_v52  ;;  %v9168_v35 = vpack.c.bf16 %v4901_v4, %v4900_v22  ;;  %v11932_v52 = vld [vmem:[#allocation20_spill] sm:$0xff]  ;;  %v11947_v22 = vld [vmem:[#allocation35_spill] sm:$0xff] }
 0x469   : > { %v11948_v4 = vld [vmem:[#allocation36_spill] sm:$0xff] }
 0x46b   : > { %8350 = vmatmul.mubr.f32.gmra.mrb[30].mxu1 %v11923_v32  ;;  %v11933_v32 = vld [vmem:[#allocation21_spill] sm:$0xff] }
 0x46c   : > { %8384 = vmatprep.mubr.f32.mxu1 %v11321_v46  ;;  %v11929_v46 = vld [vmem:[#allocation17_spill] sm:$0xff] }
 0x46f   : > { %8385 = vmatmul.mubr.f32.vlgmr.msra.gmra.mrb[0].mxu1 %v11924_v0  ;;  %v11939_v0 = vld [vmem:[#allocation27_spill] sm:$0xff] }
 0x470   : > { %8387 = vmatprep.mubr.f32.mxu1 %v11925_v23  ;;  %9155 = vmatpush3.bf16.msra.mxu1 %v9152_v8  ;;  %v4907_v8 = vld [vmem:[#allocation3 + $0x378] sm:$0xff] }
 0x471   : > { %9157 = vmatprep.subr.bf16.mxu1 %v9156_v37  ;;  %v9180_v11 = vpack.c.bf16 %v4907_v8, %v4906_v40  ;;  %v11940_v23 = vld [vmem:[#allocation28_spill] sm:$0xff]  ;;  %v5207_v8 = vld [vmem:[#allocation3 + $0x3c8] sm:$0xff] }
 0x473   : > { %8388 = vmatmul.mubr.f32.gmra.mrb[2].mxu1 %v11926_v45  ;;  %v11944_v45 = vld [vmem:[#allocation32_spill] sm:$0xff] }
 0x474   : > { %8390 = vmatprep.mubr.f32.mxu1 %v11927_v18  ;;  %9159 = vmatpush3.bf16.msra.mxu1 %v9156_v37  ;;  %v11934_v37 = vld [vmem:[#allocation22_spill] sm:$0xff]  ;;  %v11945_v18 = vld [vmem:[#allocation33_spill] sm:$0xff] }
 0x475   : > { %9161 = vmatprep.subr.bf16.mxu1 %v9160_v36 }
 0x477   : > { %8391 = vmatmul.mubr.f32.gmra.mrb[4].mxu1 %v11928_v6  ;;  %v11949_v6 = vld [vmem:[#allocation37_spill] sm:$0xff] }
 0x478   : > { %8393 = vmatprep.mubr.f32.mxu1 %v11929_v46  ;;  %9163 = vmatpush3.bf16.msra.mxu1 %v9160_v36  ;;  %v11941_v36 = vld [vmem:[#allocation29_spill] sm:$0xff]  ;;  %v11527_v46 = vld [vmem:[#allocation2 + $0x182] sm:$0xff] }
 0x479   : > { %9165 = vmatprep.subr.bf16.mxu1 %v9164_v55 }
 0x47b   : > { %8394 = vmatmul.mubr.f32.gmra.mrb[6].mxu1 %v11930_v13  ;;  %v9188_v13 = vpack.c.bf16 %v5201_v51, %v5200_v15  ;;  %v5181_v15 = vld [vmem:[#allocation2 + $0xf1] sm:$0xff]  ;;  %v5182_v51 = vld [vmem:[#allocation2 + $0xf9] sm:$0xff] }
 0x47c   : > { %8396 = vmatprep.mubr.f32.mxu1 %v11931_v54  ;;  %9167 = vmatpush3.bf16.msra.mxu1 %v9164_v55  ;;  %v11946_v55 = vld [vmem:[#allocation34_spill] sm:$0xff]  ;;  %v5202_v54 = vld [vmem:[#allocation3 + $0x3a0] sm:$0xff] }
 0x47d   : > { %9169 = vmatprep.subr.bf16.mxu1 %v9168_v35 }
 0x47f   : > { %8397 = vmatmul.mubr.f32.gmra.mrb[8].mxu1 %v11348_v31  ;;  %v9184_v31 = vpack.c.bf16 %v5199_v16, %v5198_v19  ;;  %v5213_v19 = vld [vmem:[#allocation3 + $0x3f8] sm:$0xff]  ;;  %v5505_v16 = vld [vmem:[#allocation3 + $0x408] sm:$0xff] }
 0x480   : > { %8399 = vmatprep.mubr.f32.mxu1 %v11351_v14  ;;  %9171 = vmatpush3.bf16.msra.mxu1 %v9168_v35  ;;  %v11935_v14 = vld [vmem:[#allocation23_spill] sm:$0xff]  ;;  %v11530_v35 = vld [vmem:[#allocation2 + $0x18a] sm:$0xff] }
 0x481   : > { %9173 = vmatprep.subr.bf16.mxu1 %v9172_v43 }
 0x483   : > { %8400 = vmatmul.mubr.f32.gmra.mrb[10].mxu1 %v11354_v47  ;;  %v11937_v47 = vld [vmem:[#allocation25_spill] sm:$0xff] }
 0x484   : > { %8402 = vmatprep.mubr.f32.mxu1 %v11932_v52  ;;  %9175 = vmatpush3.bf16.msra.mxu1 %v9172_v43  ;;  %v5203_v43 = vld [vmem:[#allocation3 + $0x3a8] sm:$0xff]  ;;  %v5209_v52 = vld [vmem:[#allocation3 + $0x3d8] sm:$0xff] }
 0x485   : > { %9177 = vmatprep.subr.bf16.mxu1 %v9176_v7  ;;  %v9192_v50 = vpack.c.bf16 %v5203_v43, %v5202_v54  ;;  %v5184_v54 = vld [vmem:[#allocation2 + $0x111] sm:$0xff]  ;;  %v5185_v43 = vld [vmem:[#allocation2 + $0x121] sm:$0xff] }
 0x487   : > { %8403 = vmatmul.mubr.f32.gmra.mrb[12].mxu1 %v11933_v32  ;;  %v11957_v32 = vld [vmem:[#allocation43_spill] sm:$0xff] }
 0x488   : > { %8405 = vmatprep.mubr.f32.mxu1 %v11934_v37  ;;  %9179 = vmatpush3.bf16.msra.mxu1 %v9176_v7  ;;  %v5205_v7 = vld [vmem:[#allocation3 + $0x3b8] sm:$0xff] }
 0x489   : > { %9181 = vmatprep.subr.bf16.mxu1 %v9180_v11  ;;  %v9196_v40 = vpack.c.bf16 %v5205_v7, %v5204_v61  ;;  %v5187_v61 = vld [vmem:[#allocation2 + $0x139] sm:$0xff]  ;;  %v5188_v7 = vld [vmem:[#allocation2 + $0x141] sm:$0xff] }
 0x48b   : > { %8406 = vmatmul.mubr.f32.gmra.mrb[14].mxu1 %v11935_v14  ;;  %v11958_v14 = vld [vmem:[#allocation44_spill] sm:$0xff] }
 0x48c   : > { %8408 = vmatprep.mubr.f32.mxu1 %v11936_v48  ;;  %9183 = vmatpush3.bf16.msra.mxu1 %v9180_v11  ;;  %v5211_v11 = vld [vmem:[#allocation3 + $0x3e8] sm:$0xff] }
 0x48d   : > { %9185 = vmatprep.subr.bf16.mxu1 %v9184_v31 }
 0x48f   : > { %8409 = vmatmul.mubr.f32.gmra.mrb[16].mxu1 %v11937_v47  ;;  %v5514_v47 = vld [vmem:[#allocation3 + $0x450] sm:$0xff] }
 0x490   : > { %8411 = vmatprep.mubr.f32.mxu1 %v11938_v53  ;;  %v5515_v53 = vld [vmem:[#allocation3 + $0x458] sm:$0xff] }
 0x493   : > { %8412 = vmatmul.mubr.f32.gmra.mrb[18].mxu1 %v11939_v0  ;;  %v5173_v0 = vld [vmem:[#allocation2 + $0x91] sm:$0xff] }
 0x494   : > { %8414 = vmatprep.mubr.f32.mxu1 %v11940_v23  ;;  %v9236_v23 = vpack.c.bf16 %v5515_v53, %v5514_v47  ;;  %v11578_v47 = vld [vmem:[%s11736_s4] ss:$0 sm:$0xff] }
 0x497   : > { %8415 = vmatmul.mubr.f32.gmra.mrb[20].mxu1 %v11941_v36  ;;  %v5516_v36 = vld [vmem:[#allocation3 + $0x460] sm:$0xff] }
 0x498   : > { %8417 = vmatprep.mubr.f32.mxu1 %v11942_v26  ;;  %v5517_v26 = vld [vmem:[#allocation3 + $0x468] sm:$0xff] }
 0x49b   : > { %8418 = vmatmul.mubr.f32.gmra.mrb[22].mxu1 %v11943_v17  ;;  %v5175_v17 = vld [vmem:[#allocation2 + $0xa9] sm:$0xff] }
 0x49c   : > { %8420 = vmatprep.mubr.f32.mxu1 %v11944_v45  ;;  %v5176_v45 = vld [vmem:[#allocation2 + $0xb1] sm:$0xff] }
 0x49f   : > { %8421 = vmatmul.mubr.f32.gmra.mrb[24].mxu1 %v11945_v18  ;;  %v5518_v18 = vld [vmem:[#allocation3 + $0x470] sm:$0xff] }
 0x4a0   : > { %8423 = vmatprep.mubr.f32.mxu1 %v11946_v55  ;;  %v5519_v55 = vld [vmem:[#allocation3 + $0x478] sm:$0xff] }
 0x4a3   : > { %8424 = vmatmul.mubr.f32.gmra.mrb[26].mxu1 %v11947_v22  ;;  %v5177_v22 = vld [vmem:[#allocation2 + $0xc1] sm:$0xff] }
 0x4a4   : > { %8426 = vmatprep.mubr.f32.mxu1 %v11948_v4  ;;  %v5178_v4 = vld [vmem:[#allocation2 + $0xc9] sm:$0xff] }
 0x4a7   : > { %8427 = vmatmul.mubr.f32.gmra.mrb[28].mxu1 %v11949_v6  ;;  %v5179_v6 = vld [vmem:[#allocation2 + $0xd9] sm:$0xff] }
 0x4a8   : > { %8429 = vmatprep.mubr.f32.mxu1 %v11527_v46 }
 0x4ab   : > { %8430 = vmatmul.mubr.f32.gmra.mrb[30].mxu1 %v11530_v35 }
 0x4ac   : > { %8464 = vmatprep.mubr.f32.mxu1 %v11237_v25  ;;  %v5206_v25 = vld [vmem:[#allocation3 + $0x3c0] sm:$0xff] }
 0x4af   : > { %8465 = vmatmul.mubr.f32.vlgmr.msra.gmra.mrb[0].mxu1 %v11240_v29  ;;  %v9200_v29 = vpack.c.bf16 %v5207_v8, %v5206_v25  ;;  %v5190_v25 = vld [vmem:[#allocation2 + $0x159] sm:$0xff]  ;;  %v5191_v8 = vld [vmem:[#allocation2 + $0x169] sm:$0xff] }
 0x4b0   : > { %8467 = vmatprep.mubr.f32.mxu1 %v11243_v57  ;;  %9187 = vmatpush3.bf16.msra.mxu1 %v9184_v31  ;;  %v5208_v57 = vld [vmem:[#allocation3 + $0x3d0] sm:$0xff]  ;;  %v5513_v31 = vld [vmem:[#allocation3 + $0x448] sm:$0xff] }
 0x4b1   : > { %9189 = vmatprep.subr.bf16.mxu1 %v9188_v13 }
 0x4b3   : > { %8468 = vmatmul.mubr.f32.gmra.mrb[2].mxu1 %v11246_v44  ;;  %v9204_v44 = vpack.c.bf16 %v5209_v52, %v5208_v57  ;;  %v5193_v57 = vld [vmem:[#allocation2 + $0x181] sm:$0xff]  ;;  %v5195_v52 = vld [vmem:[#allocation2 + $0x199] sm:$0xff] }
 0x4b4   : > { %8470 = vmatprep.mubr.f32.mxu1 %v11249_v63  ;;  %9191 = vmatpush3.bf16.msra.mxu1 %v9188_v13  ;;  %v5210_v63 = vld [vmem:[#allocation3 + $0x3e0] sm:$0xff] }
 0x4b5   : > { %9193 = vmatprep.subr.bf16.mxu1 %v9192_v50  ;;  %v5183_v13 = vld [vmem:[#allocation2 + $0x109] sm:$0xff] }
 0x4b7   : > { %8471 = vmatmul.mubr.f32.gmra.mrb[4].mxu1 %v11252_v9  ;;  %v9208_v9 = vpack.c.bf16 %v5211_v11, %v5210_v63  ;;  %v5196_v63 = vld [vmem:[#allocation2 + $0x1a1] sm:$0xff]  ;;  %v5471_v11 = vld [vmem:[#allocation2 + $0x32] sm:$0xff] }
 0x4b8   : > { %8473 = vmatprep.mubr.f32.mxu1 %v11255_v20  ;;  %9195 = vmatpush3.bf16.msra.mxu1 %v9192_v50  ;;  %v5212_v20 = vld [vmem:[#allocation3 + $0x3f0] sm:$0xff]  ;;  %v5186_v50 = vld [vmem:[#allocation2 + $0x129] sm:$0xff] }
 0x4b9   : > { %9197 = vmatprep.subr.bf16.mxu1 %v9196_v40 }
 0x4bb   : > { %8474 = vmatmul.mubr.f32.gmra.mrb[6].mxu1 %v11258_v12  ;;  %v9212_v12 = vpack.c.bf16 %v5213_v19, %v5212_v20  ;;  %v5473_v20 = vld [vmem:[#allocation2 + $0x4a] sm:$0xff]  ;;  %v5474_v19 = vld [vmem:[#allocation2 + $0x52] sm:$0xff] }
 0x4bc   : > { %8476 = vmatprep.mubr.f32.mxu1 %v11261_v27  ;;  %9199 = vmatpush3.bf16.msra.mxu1 %v9196_v40  ;;  %v5504_v27 = vld [vmem:[#allocation3 + $0x400] sm:$0xff] }
 0x4bd   : > { %9201 = vmatprep.subr.bf16.mxu1 %v9200_v29  ;;  %v5189_v40 = vld [vmem:[#allocation2 + $0x151] sm:$0xff] }
 0x4bf   : > { %8477 = vmatmul.mubr.f32.gmra.mrb[8].mxu1 %v11264_v21  ;;  %v9216_v21 = vpack.c.bf16 %v5505_v16, %v5504_v27  ;;  %v5476_v27 = vld [vmem:[#allocation2 + $0x6a] sm:$0xff]  ;;  %v5477_v16 = vld [vmem:[#allocation2 + $0x7a] sm:$0xff] }
 0x4c0   : > { %8479 = vmatprep.mubr.f32.mxu1 %v11267_v56  ;;  %9203 = vmatpush3.bf16.msra.mxu1 %v9200_v29  ;;  %v11950_v56 = vld [vmem:[#allocation10_spill] sm:$0xff] }
 0x4c1   : > { %9205 = vmatprep.subr.bf16.mxu1 %v9204_v44  ;;  %v5192_v29 = vld [vmem:[#allocation2 + $0x171] sm:$0xff] }
 0x4c3   : > { %8480 = vmatmul.mubr.f32.gmra.mrb[10].mxu1 %v11270_v1  ;;  %v11951_v1 = vld [vmem:[#allocation11_spill] sm:$0xff] }
 0x4c4   : > { %8482 = vmatprep.mubr.f32.mxu1 %v11273_v2  ;;  %9207 = vmatpush3.bf16.msra.mxu1 %v9204_v44  ;;  %v11952_v2 = vld [vmem:[#allocation38_spill] sm:$0xff]  ;;  %v5194_v44 = vld [vmem:[#allocation2 + $0x189] sm:$0xff] }
 0x4c5   : > { %9209 = vmatprep.subr.bf16.mxu1 %v9208_v9 }
 0x4c7   : > { %8483 = vmatmul.mubr.f32.gmra.mrb[12].mxu1 %v11276_v5  ;;  %v11953_v5 = vld [vmem:[#allocation39_spill] sm:$0xff] }
 0x4c8   : > { %8485 = vmatprep.mubr.f32.mxu1 %v11279_v60  ;;  %9211 = vmatpush3.bf16.msra.mxu1 %v9208_v9  ;;  %v9816_v60 = vld [vmem:[#allocation2] sm:$0xff] }
 0x4c9   : > { %9213 = vmatprep.subr.bf16.mxu1 %v9212_v12  ;;  %v5472_v9 = vld [vmem:[#allocation2 + $0x3a] sm:$0xff] }
 0x4cb   : > { %8486 = vmatmul.mubr.f32.gmra.mrb[14].mxu1 %v11282_v33  ;;  %v5506_v33 = vld [vmem:[#allocation3 + $0x410] sm:$0xff] }
 0x4cc   : > { %8488 = vmatprep.mubr.f32.mxu1 %v11285_v34  ;;  %9215 = vmatpush3.bf16.msra.mxu1 %v9212_v12  ;;  %v5507_v34 = vld [vmem:[#allocation3 + $0x418] sm:$0xff] }
 0x4cd   : > { %9217 = vmatprep.subr.bf16.mxu1 %v9216_v21  ;;  %v5475_v12 = vld [vmem:[#allocation2 + $0x62] sm:$0xff] }
 0x4cf   : > { %8489 = vmatmul.mubr.f32.gmra.mrb[16].mxu1 %v11288_v10  ;;  %v9220_v10 = vpack.c.bf16 %v5507_v34, %v5506_v33  ;;  %v5484_v33 = vld [vmem:[#allocation2 + $0xca] sm:$0xff]  ;;  %v5485_v34 = vld [vmem:[#allocation2 + $0xda] sm:$0xff] }
 0x4d0   : > { %8491 = vmatprep.mubr.f32.mxu1 %v11291_v62  ;;  %v5508_v62 = vld [vmem:[#allocation3 + $0x420] sm:$0xff] }
 0x4d3   : > { %8492 = vmatmul.mubr.f32.gmra.mrb[18].mxu1 %v11294_v49  ;;  %v5509_v49 = vld [vmem:[#allocation3 + $0x428] sm:$0xff] }
 0x4d4   : > { %8494 = vmatprep.mubr.f32.mxu1 %v11297_v59  ;;  %v11954_v59 = vld [vmem:[#allocation40_spill] sm:$0xff] }
 0x4d7   : > { %8495 = vmatmul.mubr.f32.gmra.mrb[20].mxu1 %v11300_v3  ;;  %v11955_v3 = vld [vmem:[#allocation41_spill] sm:$0xff] }
 0x4d8   : > { %8497 = vmatprep.mubr.f32.mxu1 %v11303_v24  ;;  %v9224_v24 = vpack.c.bf16 %v5509_v49, %v5508_v62  ;;  %v5487_v62 = vld [vmem:[#allocation2 + $0xf2] sm:$0xff]  ;;  %v5488_v49 = vld [vmem:[#allocation2 + $0xfa] sm:$0xff] }
 0x4db   : > { %8498 = vmatmul.mubr.f32.gmra.mrb[22].mxu1 %v11306_v28  ;;  %v5510_v28 = vld [vmem:[#allocation3 + $0x430] sm:$0xff] }
 0x4dc   : > { %8500 = vmatprep.mubr.f32.mxu1 %v11309_v30  ;;  %v5511_v30 = vld [vmem:[#allocation3 + $0x438] sm:$0xff] }
 0x4dd   : > { %v9228_v37 = vpack.c.bf16 %v5511_v30, %v5510_v28  ;;  %v5492_v28 = vld [vmem:[#allocation2 + $0x12a] sm:$0xff]  ;;  %v5493_v30 = vld [vmem:[#allocation2 + $0x13a] sm:$0xff] }
 0x4df   : > { %8501 = vmatmul.mubr.f32.gmra.mrb[24].mxu1 %v11312_v38  ;;  %v11956_v38 = vld [vmem:[#allocation42_spill] sm:$0xff] }
 0x4e0   : > { %8503 = vmatprep.mubr.f32.mxu1 %v11950_v56  ;;  %v5479_v56 = vld [vmem:[#allocation2 + $0x92] sm:$0xff] }
 0x4e3   : > { %8504 = vmatmul.mubr.f32.gmra.mrb[26].mxu1 %v11951_v1  ;;  %v5480_v1 = vld [vmem:[#allocation2 + $0x9a] sm:$0xff] }
 0x4e4   : > { %8506 = vmatprep.mubr.f32.mxu1 %v11952_v2  ;;  %v5481_v2 = vld [vmem:[#allocation2 + $0xaa] sm:$0xff] }
 0x4e7   : > { %8507 = vmatmul.mubr.f32.gmra.mrb[28].mxu1 %v11953_v5  ;;  %v5482_v5 = vld [vmem:[#allocation2 + $0xb2] sm:$0xff] }
 0x4e8   : > { %8509 = vmatprep.mubr.f32.mxu1 %v9816_v60 }
 0x4eb   : > { %8510 = vmatmul.mubr.f32.gmra.mrb[30].mxu1 %v9816_v60  ;;  %v5483_v60 = vld [vmem:[#allocation2 + $0xc2] sm:$0xff] }
 0x4ec   : > { %8544 = vmatprep.mubr.f32.mxu1 %v11447_v58  ;;  %v5512_v58 = vld [vmem:[#allocation3 + $0x440] sm:$0xff] }
 0x4ed   : > { %v9232_v48 = vpack.c.bf16 %v5513_v31, %v5512_v58  ;;  %v5497_v58 = vld [vmem:[#allocation2 + $0x16a] sm:$0xff]  ;;  %v5498_v31 = vld [vmem:[#allocation2 + $0x172] sm:$0xff] }
 0x4ef   : > { %8545 = vmatmul.mubr.f32.vlgmr.msra.gmra.mrb[0].mxu1 %v11954_v59  ;;  %v5489_v59 = vld [vmem:[#allocation2 + $0x10a] sm:$0xff] }
 0x4f0   : > { %8547 = vmatprep.mubr.f32.mxu1 %v11955_v3  ;;  %9219 = vmatpush3.bf16.msra.mxu1 %v9216_v21  ;;  %v5478_v21 = vld [vmem:[#allocation2 + $0x82] sm:$0xff]  ;;  %v5490_v3 = vld [vmem:[#allocation2 + $0x112] sm:$0xff] }
 0x4f1   : > { %9221 = vmatprep.subr.bf16.mxu1 %v9220_v10 }
 0x4f3   : > { %8548 = vmatmul.mubr.f32.gmra.mrb[2].mxu1 %v11956_v38  ;;  %v5494_v38 = vld [vmem:[#allocation2 + $0x142] sm:$0xff] }
 0x4f4   : > { %8550 = vmatprep.mubr.f32.mxu1 %v11957_v32  ;;  %9223 = vmatpush3.bf16.msra.mxu1 %v9220_v10  ;;  %v5486_v10 = vld [vmem:[#allocation2 + $0xe2] sm:$0xff]  ;;  %v5495_v32 = vld [vmem:[#allocation2 + $0x152] sm:$0xff] }
 0x4f5   : > { %9225 = vmatprep.subr.bf16.mxu1 %v9224_v24 }
 0x4f7   : > { %8551 = vmatmul.mubr.f32.gmra.mrb[4].mxu1 %v11958_v14  ;;  %v5501_v14 = vld [vmem:[#allocation2 + $0x19a] sm:$0xff] }
 0x4f8   : > { %8553 = vmatprep.mubr.f32.mxu1 %v11465_v39  ;;  %9227 = vmatpush3.bf16.msra.mxu1 %v9224_v24  ;;  %v9240_v39 = vpack.c.bf16 %v5517_v26, %v5516_v36  ;;  %v5491_v24 = vld [vmem:[#allocation2 + $0x122] sm:$0xff]  ;;  %v6329_v36 = vld [vmem:[%s10056_s6 + $0x19] sm:$0xff] }
 0x4f9   : > { %9229 = vmatprep.subr.bf16.mxu1 %v9228_v37 }
 0x4fb   : > { %8554 = vmatmul.mubr.f32.gmra.mrb[6].mxu1 %v11468_v41  ;;  %v9244_v41 = vpack.c.bf16 %v5519_v55, %v5518_v18 }
 0x4fc   : > { %8556 = vmatprep.mubr.f32.mxu1 %v5173_v0  ;;  %9231 = vmatpush3.bf16.msra.mxu1 %v9228_v37  ;;  %v5496_v37 = vld [vmem:[#allocation2 + $0x15a] sm:$0xff] }
 0x4fd   : > { %9233 = vmatprep.subr.bf16.mxu1 %v9232_v48  ;;  %v6330_v0 = vld [vmem:[%s10056_s6 + $0x21] sm:$0xff] }
 0x4ff   : > { %8557 = vmatmul.mubr.f32.gmra.mrb[8].mxu1 %v11472_v42  ;;  %v5180_v42 = vld [vmem:[#allocation2 + $0xe1] sm:$0xff] }
 0x500   : > { %8559 = vmatprep.mubr.f32.mxu1 %v5175_v17  ;;  %9235 = vmatpush3.bf16.msra.mxu1 %v9232_v48  ;;  %v5502_v48 = vld [vmem:[#allocation2 + $0x1a2] sm:$0xff] }
 0x501   : > { %9237 = vmatprep.subr.bf16.mxu1 %v9236_v23 }
 0x503   : > { %8560 = vmatmul.mubr.f32.gmra.mrb[10].mxu1 %v5176_v45  ;;  %v6332_v45 = vld [vmem:[%s10056_s6 + $0x39] sm:$0xff] }
 0x504   : > { %8562 = vmatprep.mubr.f32.mxu1 %v5177_v22  ;;  %9239 = vmatpush3.bf16.msra.mxu1 %v9236_v23  ;;  %v6331_v22 = vld [vmem:[%s10056_s6 + $0x31] sm:$0xff] }
 0x505   : > { %9241 = vmatprep.subr.bf16.mxu1 %v9240_v39 }
 0x507   : > { %8563 = vmatmul.mubr.f32.gmra.mrb[12].mxu1 %v5178_v4 }
 0x508   : > { %8565 = vmatprep.mubr.f32.mxu1 %v5179_v6  ;;  %9243 = vmatpush3.bf16.msra.mxu1 %v9240_v39 }
 0x509   : > { %9245 = vmatprep.subr.bf16.mxu1 %v9244_v41 }
 0x50b   : > { %8566 = vmatmul.mubr.f32.gmra.mrb[14].mxu1 %v5180_v42 }
 0x50c   : > { %8568 = vmatprep.mubr.f32.mxu1 %v5181_v15  ;;  %9247 = vmatpush3.bf16.msra.mxu1 %v9244_v41  ;;  %v6334_v15 = vld [vmem:[%s10056_s6 + $0x51] sm:$0xff] }
 0x50f   : > { %8569 = vmatmul.mubr.f32.gmra.mrb[16].mxu1 %v5182_v51 }
 0x510   : > { %8571 = vmatprep.mubr.f32.mxu1 %v5183_v13 }
 0x513   : > { %8572 = vmatmul.mubr.f32.gmra.mrb[18].mxu1 %v5184_v54  ;;  %v6333_v54 = vld [vmem:[%s10056_s6 + $0x49] sm:$0xff] }
 0x514   : > { %8574 = vmatprep.mubr.f32.mxu1 %v5185_v43 }
 0x517   : > { %8575 = vmatmul.mubr.f32.gmra.mrb[20].mxu1 %v5186_v50 }
 0x518   : > { %8577 = vmatprep.mubr.f32.mxu1 %v5187_v61 }
 0x51b   : > { %8578 = vmatmul.mubr.f32.gmra.mrb[22].mxu1 %v5188_v7 }
 0x51c   : > { %8580 = vmatprep.mubr.f32.mxu1 %v5189_v40  ;;  %v6336_v40 = vld [vmem:[%s10056_s6 + $0x69] sm:$0xff] }
 0x51f   : > { %8581 = vmatmul.mubr.f32.gmra.mrb[24].mxu1 %v5190_v25 }
 0x520   : > { %8583 = vmatprep.mubr.f32.mxu1 %v5191_v8 }
 0x523   : > { %8584 = vmatmul.mubr.f32.gmra.mrb[26].mxu1 %v5192_v29  ;;  %v6335_v29 = vld [vmem:[%s10056_s6 + $0x61] sm:$0xff] }
 0x524   : > { %8586 = vmatprep.mubr.f32.mxu1 %v5193_v57 }
 0x527   : > { %8587 = vmatmul.mubr.f32.gmra.mrb[28].mxu1 %v5194_v44 }
 0x528   : > { %8589 = vmatprep.mubr.f32.mxu1 %v5195_v52 }
 0x52b   : > { %8590 = vmatmul.mubr.f32.gmra.mrb[30].mxu1 %v5196_v63 }
 0x52c   : > { %8624 = vmatprep.mubr.f32.mxu1 %v5471_v11  ;;  %v6338_v11 = vld [vmem:[%s10056_s6 + $0x81] sm:$0xff] }
 0x52f   : > { %8625 = vmatmul.mubr.f32.vlgmr.msra.gmra.mrb[0].mxu1 %v5472_v9 }
 0x530   : > { %8627 = vmatprep.mubr.f32.mxu1 %v5473_v20 }
 0x533   : > { %8628 = vmatmul.mubr.f32.gmra.mrb[2].mxu1 %v5474_v19  ;;  %v6337_v19 = vld [vmem:[%s10056_s6 + $0x79] sm:$0xff] }
 0x534   : > { %8630 = vmatprep.mubr.f32.mxu1 %v5475_v12 }
 0x537   : > { %8631 = vmatmul.mubr.f32.gmra.mrb[4].mxu1 %v5476_v27 }
 0x538   : > { %8633 = vmatprep.mubr.f32.mxu1 %v5477_v16 }
 0x53b   : > { %8634 = vmatmul.mubr.f32.gmra.mrb[6].mxu1 %v5478_v21 }
 0x53c   : > { %8636 = vmatprep.mubr.f32.mxu1 %v5479_v56  ;;  %v6340_v56 = vld [vmem:[%s10056_s6 + $0x99] sm:$0xff] }
 0x53f   : > { %8637 = vmatmul.mubr.f32.gmra.mrb[8].mxu1 %v5480_v1 }
 0x540   : > { %8639 = vmatprep.mubr.f32.mxu1 %v5481_v2 }
 0x543   : > { %8640 = vmatmul.mubr.f32.gmra.mrb[10].mxu1 %v5482_v5  ;;  %v6339_v5 = vld [vmem:[%s10056_s6 + $0x91] sm:$0xff] }
 0x544   : > { %8642 = vmatprep.mubr.f32.mxu1 %v5483_v60 }
 0x547   : > { %8643 = vmatmul.mubr.f32.gmra.mrb[12].mxu1 %v5484_v33 }
 0x548   : > { %8645 = vmatprep.mubr.f32.mxu1 %v5485_v34 }
 0x54b   : > { %8646 = vmatmul.mubr.f32.gmra.mrb[14].mxu1 %v5486_v10 }
 0x54c   : > { %8648 = vmatprep.mubr.f32.mxu1 %v5487_v62  ;;  %v6342_v62 = vld [vmem:[%s10056_s6 + $0xb1] sm:$0xff] }
 0x54f   : > { %8649 = vmatmul.mubr.f32.gmra.mrb[16].mxu1 %v5488_v49 }
 0x550   : > { %8651 = vmatprep.mubr.f32.mxu1 %v5489_v59 }
 0x553   : > { %8652 = vmatmul.mubr.f32.gmra.mrb[18].mxu1 %v5490_v3  ;;  %v6341_v3 = vld [vmem:[%s10056_s6 + $0xa9] sm:$0xff] }
 0x554   : > { %8654 = vmatprep.mubr.f32.mxu1 %v5491_v24 }
 0x557   : > { %8655 = vmatmul.mubr.f32.gmra.mrb[20].mxu1 %v5492_v28 }
 0x558   : > { %8657 = vmatprep.mubr.f32.mxu1 %v5493_v30 }
 0x55b   : > { %8658 = vmatmul.mubr.f32.gmra.mrb[22].mxu1 %v5494_v38 }
 0x55c   : > { %8660 = vmatprep.mubr.f32.mxu1 %v5495_v32  ;;  %v6344_v32 = vld [vmem:[%s10056_s6 + $0xc9] sm:$0xff] }
 0x55f   : > { %8661 = vmatmul.mubr.f32.gmra.mrb[24].mxu1 %v5496_v37 }
 0x560   : > { %8663 = vmatprep.mubr.f32.mxu1 %v5497_v58 }
 0x563   : > { %8664 = vmatmul.mubr.f32.gmra.mrb[26].mxu1 %v5498_v31  ;;  %v6343_v31 = vld [vmem:[%s10056_s6 + $0xc1] sm:$0xff] }
 0x564   : > { %8666 = vmatprep.mubr.f32.mxu1 %v11527_v46 }
 0x567   : > { %8667 = vmatmul.mubr.f32.gmra.mrb[28].mxu1 %v11530_v35 }
 0x568   : > { %8669 = vmatprep.mubr.f32.mxu1 %v5501_v14 }
 0x56b   : > { %8670 = vmatmul.mubr.f32.gmra.mrb[30].mxu1 %v5502_v48 }
 0x602   : > { %v8626_v53 = vpop.f32.mrb[0].mxu1 }
 0x603   : > { %v5817_v46 = vadd.f32 %v8626_v53, %v11578_v47  ;;  %v5586_v23 = vpop.f32.mrb[1].mxu1 }
 0x604   : > { %v5816_v35 = vadd.f32 %v11578_v47, %v5586_v23 }
 0x605   : > { %v5849_v26 = vadd.f32 %v6330_v0, %v5817_v46  ;;  %v6346_v46 = vld [vmem:[%s10056_s6 + $0xe1] sm:$0xff] }
 0x606   : > { %v5848_v17 = vadd.f32 %v6329_v36, %v5816_v35  ;;  %v8629_v39 = vpop.f32.mrb[2].mxu1  ;;  %v6345_v35 = vld [vmem:[%s10056_s6 + $0xd9] sm:$0xff] }
 0x607   : > { %5881 = vst [vmem:[%s11587_s23 + $0x8] sm:$0xff] %v5849_v26  ;;  %v5819_v18 = vadd.f32 %v8629_v39, %v11578_v47  ;;  %v5596_v55 = vpop.f32.mrb[3].mxu1 }
 0x608   : > { %5880 = vst [vmem:[%s11587_s23] sm:$0xff] %v5848_v17  ;;  %v5818_v41 = vadd.f32 %v11578_v47, %v5596_v55 }
 0x609   : > { %v5851_v4 = vadd.f32 %v6332_v45, %v5819_v18  ;;  %v6348_v18 = vld [vmem:[%s10056_s6 + $0xf9] sm:$0xff] }
 0x60a   : > { %v5850_v6 = vadd.f32 %v6331_v22, %v5818_v41  ;;  %v8632_v42 = vpop.f32.mrb[4].mxu1  ;;  %v6347_v41 = vld [vmem:[%s10056_s6 + $0xf1] sm:$0xff] }
 0x60b   : > { %5883 = vst [vmem:[%s11587_s23 + $0x18] sm:$0xff] %v5851_v4  ;;  %v5821_v51 = vadd.f32 %v8632_v42, %v11578_v47  ;;  %v5606_v13 = vpop.f32.mrb[5].mxu1 }
 0x60c   : > { %5882 = vst [vmem:[%s11587_s23 + $0x10] sm:$0xff] %v5850_v6  ;;  %v5820_v43 = vadd.f32 %v11578_v47, %v5606_v13 }
 0x60d   : > { %v5853_v50 = vadd.f32 %v6334_v15, %v5821_v51  ;;  %v6350_v51 = vld [vmem:[%s10056_s6 + $0x111] sm:$0xff] }
 0x60e   : > { %v5852_v61 = vadd.f32 %v6333_v54, %v5820_v43  ;;  %v8635_v7 = vpop.f32.mrb[6].mxu1  ;;  %v6349_v43 = vld [vmem:[%s10056_s6 + $0x109] sm:$0xff] }
 0x60f   : > { %5885 = vst [vmem:[%s11587_s23 + $0x28] sm:$0xff] %v5853_v50  ;;  %v5823_v25 = vadd.f32 %v8635_v7, %v11578_v47  ;;  %v5616_v8 = vpop.f32.mrb[7].mxu1 }
 0x610   : > { %5884 = vst [vmem:[%s11587_s23 + $0x20] sm:$0xff] %v5852_v61  ;;  %v5822_v57 = vadd.f32 %v11578_v47, %v5616_v8 }
 0x611   : > { %v5855_v52 = vadd.f32 %v6336_v40, %v5823_v25  ;;  %v6352_v25 = vld [vmem:[%s10056_s6 + $0x129] sm:$0xff] }
 0x612   : > { %v5854_v44 = vadd.f32 %v6335_v29, %v5822_v57  ;;  %v8638_v63 = vpop.f32.mrb[8].mxu1  ;;  %v6351_v57 = vld [vmem:[%s10056_s6 + $0x121] sm:$0xff] }
 0x613   : > { %5887 = vst [vmem:[%s11587_s23 + $0x38] sm:$0xff] %v5855_v52  ;;  %v5825_v9 = vadd.f32 %v8638_v63, %v11578_v47  ;;  %v5626_v20 = vpop.f32.mrb[9].mxu1 }
 0x614   : > { %5886 = vst [vmem:[%s11587_s23 + $0x30] sm:$0xff] %v5854_v44  ;;  %v5824_v12 = vadd.f32 %v11578_v47, %v5626_v20 }
 0x615   : > { %v5857_v27 = vadd.f32 %v6338_v11, %v5825_v9  ;;  %v6354_v9 = vld [vmem:[%s10056_s6 + $0x141] sm:$0xff] }
 0x616   : > { %v5856_v16 = vadd.f32 %v6337_v19, %v5824_v12  ;;  %v8641_v21 = vpop.f32.mrb[10].mxu1  ;;  %v6353_v12 = vld [vmem:[%s10056_s6 + $0x139] sm:$0xff] }
 0x617   : > { %5889 = vst [vmem:[%s11587_s23 + $0x48] sm:$0xff] %v5857_v27  ;;  %v5827_v1 = vadd.f32 %v8641_v21, %v11578_v47  ;;  %v5636_v2 = vpop.f32.mrb[11].mxu1 }
 0x618   : > { %5888 = vst [vmem:[%s11587_s23 + $0x40] sm:$0xff] %v5856_v16  ;;  %v5826_v60 = vadd.f32 %v11578_v47, %v5636_v2 }
 0x619   : > { %v5859_v33 = vadd.f32 %v6340_v56, %v5827_v1  ;;  %v6356_v1 = vld [vmem:[%s10056_s6 + $0x159] sm:$0xff] }
 0x61a   : > { %v5858_v34 = vadd.f32 %v6339_v5, %v5826_v60  ;;  %v8644_v10 = vpop.f32.mrb[12].mxu1  ;;  %v6355_v60 = vld [vmem:[%s10056_s6 + $0x151] sm:$0xff] }
 0x61b   : > { %5891 = vst [vmem:[%s11587_s23 + $0x58] sm:$0xff] %v5859_v33  ;;  %v5829_v49 = vadd.f32 %v8644_v10, %v11578_v47  ;;  %v5646_v59 = vpop.f32.mrb[13].mxu1 }
 0x61c   : > { %5890 = vst [vmem:[%s11587_s23 + $0x50] sm:$0xff] %v5858_v34  ;;  %v5828_v24 = vadd.f32 %v11578_v47, %v5646_v59 }
 0x61d   : > { %v5861_v28 = vadd.f32 %v6342_v62, %v5829_v49  ;;  %v6358_v49 = vld [vmem:[%s10056_s6 + $0x171] sm:$0xff] }
 0x61e   : > { %v5860_v30 = vadd.f32 %v6341_v3, %v5828_v24  ;;  %v8647_v38 = vpop.f32.mrb[14].mxu1  ;;  %v6357_v24 = vld [vmem:[%s10056_s6 + $0x169] sm:$0xff] }
 0x61f   : > { %5893 = vst [vmem:[%s11587_s23 + $0x68] sm:$0xff] %v5861_v28  ;;  %v5831_v37 = vadd.f32 %v8647_v38, %v11578_v47  ;;  %v5656_v58 = vpop.f32.mrb[15].mxu1 }
 0x620   : > { %5892 = vst [vmem:[%s11587_s23 + $0x60] sm:$0xff] %v5860_v30  ;;  %v5830_v14 = vadd.f32 %v11578_v47, %v5656_v58 }
 0x621   : > { %v5863_v48 = vadd.f32 %v6344_v32, %v5831_v37  ;;  %v6360_v37 = vld [vmem:[%s10056_s6 + $0x189] sm:$0xff] }
 0x622   : > { %v5862_v53 = vadd.f32 %v6343_v31, %v5830_v14  ;;  %v8650_v0 = vpop.f32.mrb[16].mxu1  ;;  %v6359_v14 = vld [vmem:[%s10056_s6 + $0x181] sm:$0xff]  ;;  %s9845_s6 = scalar_lea.vmem %s11685_s26, 4096 }
 0x623   : > { %5895 = vst [vmem:[%s11587_s23 + $0x78] sm:$0xff] %v5863_v48  ;;  %v5833_v23 = vadd.f32 %v8650_v0, %v11578_v47  ;;  %v5666_v36 = vpop.f32.mrb[17].mxu1  ;;  %p9846_p6 = scmp.ne.s32.totalorder %s11685_s26, %s9845_s6  ;;  %p9853_p3 = scmp.lt.s32.totalorder %s9851_s30, %s9845_s6 }
 0x624   : > { %5894 = vst [vmem:[%s11587_s23 + $0x70] sm:$0xff] %v5862_v53  ;;  %v5832_v26 = vadd.f32 %v11578_v47, %v5666_v36 }
 0x625   : > { %v5865_v17 = vadd.f32 %v6346_v46, %v5833_v23  ;;  %p9847_p10 = pnand %p9846_p6, %p11959_p9  ;;  %p9854_p4 = por %p9853_p3, %p9852_p2 }
 0x626   : > { %v5864_v39 = vadd.f32 %v6345_v35, %v5832_v26  ;;  %v8653_v45 = vpop.f32.mrb[18].mxu1 }
 0x627   : > { %5897 = vst [vmem:[%s11587_s23 + $0x88] sm:$0xff] %v5865_v17  ;;  %v5835_v55 = vadd.f32 %v8653_v45, %v11578_v47  ;;  %v5676_v22 = vpop.f32.mrb[19].mxu1  ;;  %p9848_p12 = pneg %p9847_p10 }
 0x628   : > { %5896 = vst [vmem:[%s11587_s23 + $0x80] sm:$0xff] %v5864_v39  ;;  %v5834_v4 = vadd.f32 %v11578_v47, %v5676_v22 }
 0x629   : > { %v5867_v6 = vadd.f32 %v6348_v18, %v5835_v55  ;;  %p9855_p7 = pnand %p9854_p4, %p9848_p12 }
 0x62a   : > { %v5866_v42 = vadd.f32 %v6347_v41, %v5834_v4  ;;  %v8656_v15 = vpop.f32.mrb[20].mxu1 }
 0x62b   : > { %5899 = vst [vmem:[%s11587_s23 + $0x98] sm:$0xff] %v5867_v6  ;;  %v5837_v13 = vadd.f32 %v8656_v15, %v11578_v47  ;;  %v5686_v54 = vpop.f32.mrb[21].mxu1 }
 0x62c   : > { %5898 = vst [vmem:[%s11587_s23 + $0x90] sm:$0xff] %v5866_v42  ;;  %v5836_v50 = vadd.f32 %v11578_v47, %v5686_v54 }
 0x62d   : > { %v5869_v61 = vadd.f32 %v6350_v51, %v5837_v13 }
 0x62e   : > { %v5868_v7 = vadd.f32 %v6349_v43, %v5836_v50  ;;  %v8659_v40 = vpop.f32.mrb[22].mxu1 }
 0x62f   : > { %5901 = vst [vmem:[%s11587_s23 + $0xa8] sm:$0xff] %v5869_v61  ;;  %v5839_v8 = vadd.f32 %v8659_v40, %v11578_v47  ;;  %v5696_v29 = vpop.f32.mrb[23].mxu1 }
 0x630   : > { %5900 = vst [vmem:[%s11587_s23 + $0xa0] sm:$0xff] %v5868_v7  ;;  %v5838_v52 = vadd.f32 %v11578_v47, %v5696_v29 }
 0x631   : > { %v5871_v44 = vadd.f32 %v6352_v25, %v5839_v8 }
 0x632   : > { %v5870_v63 = vadd.f32 %v6351_v57, %v5838_v52  ;;  %v8662_v11 = vpop.f32.mrb[24].mxu1 }
 0x633   : > { %5903 = vst [vmem:[%s11587_s23 + $0xb8] sm:$0xff] %v5871_v44  ;;  %v5841_v20 = vadd.f32 %v8662_v11, %v11578_v47  ;;  %v5706_v19 = vpop.f32.mrb[25].mxu1 }
 0x634   : > { %5902 = vst [vmem:[%s11587_s23 + $0xb0] sm:$0xff] %v5870_v63  ;;  %v5840_v27 = vadd.f32 %v11578_v47, %v5706_v19 }
 0x635   : > { %v5873_v16 = vadd.f32 %v6354_v9, %v5841_v20 }
 0x636   : > { %v5872_v21 = vadd.f32 %v6353_v12, %v5840_v27  ;;  %v8665_v56 = vpop.f32.mrb[26].mxu1 }
 0x637   : > { %5905 = vst [vmem:[%s11587_s23 + $0xc8] sm:$0xff] %v5873_v16  ;;  %v5843_v2 = vadd.f32 %v8665_v56, %v11578_v47  ;;  %v5716_v5 = vpop.f32.mrb[27].mxu1 }
 0x638   : > { %5904 = vst [vmem:[%s11587_s23 + $0xc0] sm:$0xff] %v5872_v21  ;;  %v5842_v33 = vadd.f32 %v11578_v47, %v5716_v5 }
 0x639   : > { %v5875_v34 = vadd.f32 %v6356_v1, %v5843_v2 }
 0x63a   : > { %v5874_v10 = vadd.f32 %v6355_v60, %v5842_v33  ;;  %v8668_v62 = vpop.f32.mrb[28].mxu1 }
 0x63b   : > { %5907 = vst [vmem:[%s11587_s23 + $0xd8] sm:$0xff] %v5875_v34  ;;  %v5845_v59 = vadd.f32 %v8668_v62, %v11578_v47  ;;  %v5726_v3 = vpop.f32.mrb[29].mxu1 }
 0x63c   : > { %5906 = vst [vmem:[%s11587_s23 + $0xd0] sm:$0xff] %v5874_v10  ;;  %v5844_v28 = vadd.f32 %v11578_v47, %v5726_v3 }
 0x63d   : > { %v5877_v30 = vadd.f32 %v6358_v49, %v5845_v59 }
 0x63e   : > { %v5876_v38 = vadd.f32 %v6357_v24, %v5844_v28  ;;  %v8671_v32 = vpop.f32.mrb[30].mxu1 }
 0x63f   : > { %5909 = vst [vmem:[%s11587_s23 + $0xe8] sm:$0xff] %v5877_v30  ;;  %v5847_v58 = vadd.f32 %v8671_v32, %v11578_v47  ;;  %v5736_v31 = vpop.f32.mrb[31].mxu1 }
 0x640   : > { %5908 = vst [vmem:[%s11587_s23 + $0xe0] sm:$0xff] %v5876_v38  ;;  %v5846_v48 = vadd.f32 %v11578_v47, %v5736_v31 }
 0x641   : > { %v5879_v53 = vadd.f32 %v6360_v37, %v5847_v58 }
 0x642   : > { %v5878_v0 = vadd.f32 %v6359_v14, %v5846_v48 }
 0x643   : > { %5911 = vst [vmem:[%s11587_s23 + $0xf8] sm:$0xff] %v5879_v53 }
 0x644   : > { %5910 = vst [vmem:[%s11587_s23 + $0xf0] sm:$0xff] %v5878_v0 }
 0x645   : > { %9858 = shalt.err (!%p9855_p7)
}
 0x646   : > { %s9859_s12 = scalar_lea.hbm %s11683_s11, 4096  ;;  %s9863_s15 = scalar_lea.hbm %s11737_s5, 8192 }
 0x647   : > { %p9860_p8 = scmp.ne.s32.totalorder %s11683_s11, %s9859_s12  ;;  %p9864_p1 = scmp.lt.u32.totalorder %s11683_s11, %s11737_s5 }
 0x648   : > { %p9865_p0 = scmp.lt.u32.totalorder %s9863_s15, %s9859_s12  ;;  %p9867_p6 = scmp.lt.u32.totalorder %s9859_s12, %s11683_s11 }
 0x649   : > { %p9861_p11 = pnand %p9860_p8, %p11959_p9 }
 0x64a   : > { %p9866_p5 = por %p9865_p0, %p9864_p1 }
 0x64b   : > { %p9862_p13 = pneg %p9861_p11 }
 0x64c   : > { %p9868_p10 = por %p9867_p6, %p9866_p5 }
 0x64e   : > { %p9869_p12 = pnand %p9868_p10, %p9862_p13 }
 0x650   : > { %9872 = shalt.err (!%p9869_p12)
}
 0x651   : > { %s9918_s23 = smov 128   ;;  %s9919_s25 = smov 8  }
 0x652   : > { %9765 = dma.vmem_to_hbm [thread:$0]  (%p11959_p9), %s11685_s26, 4096, %s11683_s11, %s11691_s22, %s9918_s23, %s9918_s23, %s9919_s25  }
 0x653 PF: > { %p9777_p2 = scmp.ge.s32.totalorder %s9911_s21, 2  ;;  %s5941_s10 = sand.u32 1, %s9899_s18  }
 0x654   : > { %p11960_p3 = scmp.ne.s32.totalorder %s11813_s29, 0  ;;  %s5942_s8 = scalar_lea.sflag [#allocation5], %s5941_s10 }
 0x656   : > { %p9772_p4 = pnand %p9777_p2, %p11960_p3 }
 0x658   : > { %9894 = dma.done.wait (!%p9772_p4), %s5942_s8, 4096  }
 0x659   : > { %9896 = vsyncadd (!%p9772_p4), %s5942_s8, 4294963200  ;;  %p16_p7 = scmp.ge.s32.totalorder %s9975_s24, 4   ;;  %s11961_s18 = smov %s9903_s19 }
 0x65a   : > { %s11962_s19 = smov %s9907_s20  ;;  %s11963_s20 = smov %s9986_s27 }
 0x65b   : > { %s11964_s21 = smov %s9975_s24  ;;  %18 = sbr.rel (!%p16_p7) target bundleno = 4 (0x4), region = 100 }
 0x662   :  { %5947 = vsyncpa [#allocation4], 1 }
 0x663   :  { %5949 = vsyncpa [#allocation4 + $0x1], 1 }
 0x664   :  { %5950 = vsyncpa [#allocation5], 1 }
 0x665   :  { %5952 = vsyncpa [#allocation5 + $0x1], 1 }

</bundles_post_ra>
